<compile_context>
chip_gen: v7x
topology: tpu7x:2x2x1
jax: 0.10.0
libtpu: 0.0.40
codegen_flags: <defaults>
</compile_context>

<pallas_src>
import functools

import jax
import jax.numpy as jnp
from jax.experimental import pallas as pl
from jax.experimental.pallas import tpu as pltpu


# ----------------------------------------------------------------------------
# Fused per-temporal-group kernel.
#   bottleneck_t = bn1(conv1(x_t))          (1x1 conv -> MXU matmul, f32 acc)
#   conv_t       = dw3x3(bottleneck_t)      (depthwise 3x3, pad=1, in-VMEM)
#   diff_t       = conv_t - bottleneck_mid  (mid = frame T//2 of the group)
#   y_t          = bn3(conv3(diff_t))       (1x1 conv -> MXU matmul, f32 acc)
# Layout inside the kernel: channels on sublanes, flat spatial P=H*W on lanes.
# ----------------------------------------------------------------------------
def me_group_kernel(x_ref, w1t_ref, s1_ref, b1_ref, w2k_ref, w3t_ref,
                    s3_ref, b3_ref, o_ref, *, W):
    T, C, P = x_ref.shape
    CR = w1t_ref.shape[0]
    f32 = jnp.float32

    # Hoisted once per grid step (shared by all T unrolled frames).
    w1m = w1t_ref[...]                       # (CR, C)  matmul dtype (bf16/f32)
    w3m = w3t_ref[...]                       # (C, CR)
    s1v, b1v = s1_ref[...], b1_ref[...]      # (CR, 1)  f32 (folded BN1)
    s3v, b3v = s3_ref[...], b3_ref[...]      # (C, 1)   f32 (folded BN3)
    w2m = w2k_ref[...]                       # (CR, 9)  f32 depthwise taps
    taps = [w2m[:, k:k + 1] for k in range(9)]

    # Column index (j = p mod W) masks for taps that would wrap across a row.
    col = jax.lax.broadcasted_iota(jnp.int32, (1, P), 1) % W
    ok_left = col >= 1            # reading column j-1 is valid
    ok_right = col <= W - 2       # reading column j+1 is valid
    zpad = jnp.zeros((CR, W + 1), f32)
    mm_dtype = w1m.dtype

    def bottleneck(t):
        # bn1(conv1(x_t)) : (CR, C) @ (C, P) on the MXU with f32 accumulation.
        bt = jnp.dot(w1m, x_ref[t], preferred_element_type=f32)
        return bt * s1v + b1v

    def dw3x3(bt):
        # Depthwise 3x3, padding=1, on the flattened spatial (lane) axis.
        # Zero-padding the flat axis by W+1 on each side makes vertical
        # out-of-image neighbours read zeros; horizontal row-wrap is masked.
        btp = jnp.concatenate([zpad, bt, zpad], axis=1)       # (CR, P + 2W + 2)
        acc = jnp.zeros((CR, P), f32)
        for a in (-1, 0, 1):            # row offset
            for b in (-1, 0, 1):        # column offset
                start = (W + 1) + a * W + b
                patch = btp[:, start:start + P]
                if b == -1:
                    patch = jnp.where(ok_left, patch, 0.0)
                elif b == 1:
                    patch = jnp.where(ok_right, patch, 0.0)
                acc = acc + patch * taps[(a + 1) * 3 + (b + 1)]
        return acc

    # Mid-segment bottleneck: computed ONCE per group, reused by all frames.
    mid = bottleneck(T // 2)                                  # (CR, P) f32

    for t in range(T):                                        # static unroll, T small
        bt = bottleneck(t)
        diff = (dw3x3(bt) - mid).astype(mm_dtype)             # motion difference
        y = jnp.dot(w3m, diff, preferred_element_type=f32)    # (C, P) on the MXU
        o_ref[t] = (y * s3v + b3v).astype(o_ref.dtype)


# ----------------------------------------------------------------------------
# Wrapper: NCHW in / NCHW out (matches the PyTorch interface).
# ----------------------------------------------------------------------------
@functools.partial(jax.jit, static_argnums=(2, 3))
def me_module_forward(x_nchw, params, n_segment, compute_dtype=jnp.bfloat16):
    """compute_dtype = operand dtype for the two 1x1-conv MXU matmuls.
    BN scale/bias, depthwise taps and all elementwise math stay f32."""
    w1, s1, b1, w2, w3, s3, b3 = params
    nt, c, h, w = x_nchw.shape
    cr = w1.shape[1]
    T = n_segment
    assert nt % T == 0, "nt must be a multiple of n_segment"
    groups = nt // T
    P = h * w

    # Free reshape of NCHW to (nt, C, H*W): no transposes, H*W on the lanes.
    # (In a real bf16 model x would already arrive as bf16 -> half the HBM DMA.)
    x_flat = x_nchw.reshape(nt, c, P).astype(compute_dtype)

    w1t = jnp.transpose(w1, (1, 0)).astype(compute_dtype)     # (CR, C)
    w3t = jnp.transpose(w3, (1, 0)).astype(compute_dtype)     # (C, CR)
    w2k = w2.reshape(cr, 9).astype(jnp.float32)               # depthwise taps
    s1c = s1.reshape(cr, 1).astype(jnp.float32)
    b1c = b1.reshape(cr, 1).astype(jnp.float32)
    s3c = s3.reshape(c, 1).astype(jnp.float32)
    b3c = b3.reshape(c, 1).astype(jnp.float32)

    # TODO(synk): at production sizes (T=8, 56x56, C>=256) tile the spatial axis
    # inside a group and/or emit a bf16 output so the per-step working set stays
    # under v7x's 64 MiB VMEM; at these test sizes it is ~1 MiB.
    out = pl.pallas_call(
        functools.partial(me_group_kernel, W=w),
        out_shape=jax.ShapeDtypeStruct((nt, c, P), jnp.float32),
        grid=(groups,),
        in_specs=[
            pl.BlockSpec((T, c, P), lambda g: (g, 0, 0)),   # all T frames of group g
            pl.BlockSpec((cr, c), lambda g: (0, 0)),
            pl.BlockSpec((cr, 1), lambda g: (0, 0)),
            pl.BlockSpec((cr, 1), lambda g: (0, 0)),
            pl.BlockSpec((cr, 9), lambda g: (0, 0)),
            pl.BlockSpec((c, cr), lambda g: (0, 0)),
            pl.BlockSpec((c, 1), lambda g: (0, 0)),
            pl.BlockSpec((c, 1), lambda g: (0, 0)),
        ],
        out_specs=pl.BlockSpec((T, c, P), lambda g: (g, 0, 0)),
        compiler_params=pltpu.CompilerParams(
            dimension_semantics=("parallel",),   # groups shard over v7x's 2 TCs
            vmem_limit_bytes=32 * 1024 * 1024),
    )(x_flat, w1t, s1c, b1c, w2k, w3t, s3c, b3c)

    return out.reshape(nt, c, h, w)


# ----------------------------------------------------------------------------
# Pure-JAX reference (lax.conv based) for the correctness check.
# ----------------------------------------------------------------------------
def ref_forward(x_nchw, params, n_segment):
    w1, s1, b1, w2, w3, s3, b3 = params
    nt, c, h, wd = x_nchw.shape
    cr = w1.shape[1]
    dn = ("NCHW", "OIHW", "NCHW")

    w1_oihw = jnp.transpose(w1, (1, 0))[:, :, None, None]           # (cr, c, 1, 1)
    bt = jax.lax.conv_general_dilated(x_nchw, w1_oihw, (1, 1), "VALID",
                                      dimension_numbers=dn)
    bt = bt * s1[None, :, None, None] + b1[None, :, None, None]

    w2_oihw = w2[:, None, :, :]                                      # (cr, 1, 3, 3)
    cb = jax.lax.conv_general_dilated(bt, w2_oihw, (1, 1), ((1, 1), (1, 1)),
                                      dimension_numbers=dn,
                                      feature_group_count=cr)

    rb = bt.reshape(-1, n_segment, cr, h, wd)
    rcb = cb.reshape(-1, n_segment, cr, h, wd)
    tfea = rb[:, n_segment // 2][:, None]
    diff = (rcb - tfea).reshape(nt, cr, h, wd)

    w3_oihw = jnp.transpose(w3, (1, 0))[:, :, None, None]            # (c, cr, 1, 1)
    y = jax.lax.conv_general_dilated(diff, w3_oihw, (1, 1), "VALID",
                                     dimension_numbers=dn)
    y = y * s3[None, :, None, None] + b3[None, :, None, None]
    return y


if __name__ == "__main__":
    channel, reduction, n_segment = 64, 16, 8
    batch = 4
    nt = batch * n_segment
    h = w = 16
    cr = channel // reduction

    key = jax.random.PRNGKey(0)
    keys = jax.random.split(key, 12)

    x = jax.random.normal(keys[0], (nt, channel, h, w), jnp.float32)

    # Conv weights: w1 stored (Cin, CR), depthwise w2 (CR, 3, 3), w3 (CR, Cout).
    w1 = 0.1 * jax.random.normal(keys[1], (channel, cr), jnp.float32)
    w2 = 0.1 * jax.random.normal(keys[2], (cr, 3, 3), jnp.float32)
    w3 = 0.1 * jax.random.normal(keys[3], (cr, channel), jnp.float32)

    # BatchNorm params (inference mode, folded into scale/bias), eps = 1e-5.
    eps = 1e-5
    g1 = 1.0 + 0.1 * jax.random.normal(keys[4], (cr,), jnp.float32)
    be1 = 0.1 * jax.random.normal(keys[5], (cr,), jnp.float32)
    m1 = 0.1 * jax.random.normal(keys[6], (cr,), jnp.float32)
    v1 = jnp.abs(jax.random.normal(keys[7], (cr,), jnp.float32)) + 0.5
    g3 = 1.0 + 0.1 * jax.random.normal(keys[8], (channel,), jnp.float32)
    be3 = 0.1 * jax.random.normal(keys[9], (channel,), jnp.float32)
    m3 = 0.1 * jax.random.normal(keys[10], (channel,), jnp.float32)
    v3 = jnp.abs(jax.random.normal(keys[11], (channel,), jnp.float32)) + 0.5

    s1 = g1 / jnp.sqrt(v1 + eps)
    b1 = be1 - m1 * s1
    s3 = g3 / jnp.sqrt(v3 + eps)
    b3 = be3 - m3 * s3

    params = (w1, s1, b1, w2, w3, s3, b3)

    y_ref = jax.block_until_ready(ref_forward(x, params, n_segment))

    # f32 matmul operands: tight check against the lax.conv reference.
    y_f32 = jax.block_until_ready(
        me_module_forward(x, params, n_segment, jnp.float32))
    assert y_f32.shape == (nt, channel, h, w), y_f32.shape
    err_f32 = float(jnp.max(jnp.abs(y_f32 - y_ref)))
    assert err_f32 < 1e-3, f"f32 max abs err = {err_f32}"

    # Default bf16 matmul operands (f32 accumulation): looser tolerance.
    y_bf16 = jax.block_until_ready(
        me_module_forward(x, params, n_segment, jnp.bfloat16))
    err_bf16 = float(jnp.max(jnp.abs(y_bf16 - y_ref)))
    assert err_bf16 < 5e-2, f"bf16 max abs err = {err_bf16}"

    print("KERNEL_OK")
</pallas_src>

<mosaic_0001>
module attributes {stable_mosaic.version = 11 : i64} {
  func.func @me_group_kernel(%arg0: i32, %arg1: memref<8x64x256xf32, #tpu.memory_space<vmem>>, %arg2: memref<4x64xf32, #tpu.memory_space<vmem>>, %arg3: memref<4x1xf32, #tpu.memory_space<vmem>>, %arg4: memref<4x1xf32, #tpu.memory_space<vmem>>, %arg5: memref<4x9xf32, #tpu.memory_space<vmem>>, %arg6: memref<64x4xf32, #tpu.memory_space<vmem>>, %arg7: memref<64x1xf32, #tpu.memory_space<vmem>>, %arg8: memref<64x1xf32, #tpu.memory_space<vmem>>, %arg9: memref<8x64x256xf32, #tpu.memory_space<vmem>>) attributes {dimension_semantics = [#tpu.dimension_semantics<parallel>], iteration_bounds = array<i64: 4>, scalar_prefetch = 0 : i64, scratch_operands = 0 : i64, tpu.core_type = #tpu.core_type<tc>, window_params = [{transform_indices = @transform_0, window_bounds = array<i64: 8, 64, 256>}, {pipeline_mode = #tpu.pipeline_mode<synchronous>, transform_indices = @transform_1, window_bounds = array<i64: 4, 64>}, {pipeline_mode = #tpu.pipeline_mode<synchronous>, transform_indices = @transform_2, window_bounds = array<i64: 4, 1>}, {pipeline_mode = #tpu.pipeline_mode<synchronous>, transform_indices = @transform_3, window_bounds = array<i64: 4, 1>}, {pipeline_mode = #tpu.pipeline_mode<synchronous>, transform_indices = @transform_4, window_bounds = array<i64: 4, 9>}, {pipeline_mode = #tpu.pipeline_mode<synchronous>, transform_indices = @transform_5, window_bounds = array<i64: 64, 4>}, {pipeline_mode = #tpu.pipeline_mode<synchronous>, transform_indices = @transform_6, window_bounds = array<i64: 64, 1>}, {pipeline_mode = #tpu.pipeline_mode<synchronous>, transform_indices = @transform_7, window_bounds = array<i64: 64, 1>}, {transform_indices = @transform_8, window_bounds = array<i64: 8, 64, 256>}]} {
    %c0 = arith.constant 0 : index
    %c0_0 = arith.constant 0 : index
    %0 = vector.load %arg2[%c0, %c0_0] : memref<4x64xf32, #tpu.memory_space<vmem>>, vector<4x64xf32>
    %c0_1 = arith.constant 0 : index
    %c0_2 = arith.constant 0 : index
    %1 = vector.load %arg6[%c0_1, %c0_2] : memref<64x4xf32, #tpu.memory_space<vmem>>, vector<64x4xf32>
    %c0_3 = arith.constant 0 : index
    %c0_4 = arith.constant 0 : index
    %2 = vector.load %arg3[%c0_3, %c0_4] : memref<4x1xf32, #tpu.memory_space<vmem>>, vector<4x1xf32>
    %c0_5 = arith.constant 0 : index
    %c0_6 = arith.constant 0 : index
    %3 = vector.load %arg4[%c0_5, %c0_6] : memref<4x1xf32, #tpu.memory_space<vmem>>, vector<4x1xf32>
    %c0_7 = arith.constant 0 : index
    %c0_8 = arith.constant 0 : index
    %4 = vector.load %arg7[%c0_7, %c0_8] : memref<64x1xf32, #tpu.memory_space<vmem>>, vector<64x1xf32>
    %c0_9 = arith.constant 0 : index
    %c0_10 = arith.constant 0 : index
    %5 = vector.load %arg8[%c0_9, %c0_10] : memref<64x1xf32, #tpu.memory_space<vmem>>, vector<64x1xf32>
    %c0_11 = arith.constant 0 : index
    %c0_12 = arith.constant 0 : index
    %6 = vector.load %arg5[%c0_11, %c0_12] : memref<4x9xf32, #tpu.memory_space<vmem>>, vector<4x9xf32>
    %7 = vector.extract_strided_slice %6 {offsets = [0, 0], sizes = [4, 1], strides = [1, 1]} : vector<4x9xf32> to vector<4x1xf32>
    %8 = vector.extract_strided_slice %6 {offsets = [0, 1], sizes = [4, 1], strides = [1, 1]} : vector<4x9xf32> to vector<4x1xf32>
    %9 = vector.extract_strided_slice %6 {offsets = [0, 2], sizes = [4, 1], strides = [1, 1]} : vector<4x9xf32> to vector<4x1xf32>
    %10 = vector.extract_strided_slice %6 {offsets = [0, 3], sizes = [4, 1], strides = [1, 1]} : vector<4x9xf32> to vector<4x1xf32>
    %11 = vector.extract_strided_slice %6 {offsets = [0, 4], sizes = [4, 1], strides = [1, 1]} : vector<4x9xf32> to vector<4x1xf32>
    %12 = vector.extract_strided_slice %6 {offsets = [0, 5], sizes = [4, 1], strides = [1, 1]} : vector<4x9xf32> to vector<4x1xf32>
    %13 = vector.extract_strided_slice %6 {offsets = [0, 6], sizes = [4, 1], strides = [1, 1]} : vector<4x9xf32> to vector<4x1xf32>
    %14 = vector.extract_strided_slice %6 {offsets = [0, 7], sizes = [4, 1], strides = [1, 1]} : vector<4x9xf32> to vector<4x1xf32>
    %15 = vector.extract_strided_slice %6 {offsets = [0, 8], sizes = [4, 1], strides = [1, 1]} : vector<4x9xf32> to vector<4x1xf32>
    %16 = tpu.iota {dimensions = array<i32: 1>} : vector<1x256xi32>
    %c16_i32 = arith.constant 16 : i32
    %c0_i32 = arith.constant 0 : i32
    %17 = arith.cmpi eq, %c16_i32, %c0_i32 : i32
    %c1_i32 = arith.constant 1 : i32
    %18 = arith.select %17, %c1_i32, %c16_i32 : i32
    %19 = vector.broadcast %18 : i32 to vector<1x256xi32>
    %20 = arith.remsi %16, %19 : vector<1x256xi32>
    %c0_i32_13 = arith.constant 0 : i32
    %21 = vector.broadcast %c0_i32_13 : i32 to vector<1x256xi32>
    %22 = arith.cmpi ne, %20, %21 : vector<1x256xi32>
    %c0_i32_14 = arith.constant 0 : i32
    %23 = vector.broadcast %c0_i32_14 : i32 to vector<1x256xi32>
    %24 = arith.cmpi slt, %20, %23 : vector<1x256xi32>
    %c0_i32_15 = arith.constant 0 : i32
    %25 = arith.cmpi slt, %18, %c0_i32_15 : i32
    %26 = vector.broadcast %25 : i1 to vector<1x256xi1>
    %27 = vector.broadcast %26 : vector<1x256xi1> to vector<1x256xi1>
    %28 = arith.xori %24, %27 : vector<1x256xi1>
    %29 = arith.andi %28, %22 : vector<1x256xi1>
    %30 = vector.broadcast %18 : i32 to vector<1x256xi32>
    %31 = arith.addi %20, %30 : vector<1x256xi32>
    %32 = arith.select %29, %31, %20 : vector<1x256xi1>, vector<1x256xi32>
    %c1_i32_16 = arith.constant 1 : i32
    %33 = vector.broadcast %c1_i32_16 : i32 to vector<1x256xi32>
    %34 = arith.cmpi sge, %32, %33 : vector<1x256xi32>
    %c14_i32 = arith.constant 14 : i32
    %35 = vector.broadcast %c14_i32 : i32 to vector<1x256xi32>
    %36 = arith.cmpi sle, %32, %35 : vector<1x256xi32>
    %cst = arith.constant 0.000000e+00 : f32
    %37 = vector.broadcast %cst : f32 to vector<4x17xf32>
    %c4 = arith.constant 4 : index
    %c0_17 = arith.constant 0 : index
    %c0_18 = arith.constant 0 : index
    %38 = vector.load %arg1[%c4, %c0_17, %c0_18] : memref<8x64x256xf32, #tpu.memory_space<vmem>>, vector<1x64x256xf32>
    %39 = vector.shape_cast %38 : vector<1x64x256xf32> to vector<64x256xf32>
    %cst_19 = arith.constant dense<0.000000e+00> : vector<4x256xf32>
    %40 = tpu.matmul %0, %39, %cst_19 {dimension_numbers = #tpu.dot_dimension_numbers<[1], [0], [0], [1], [0, 0, 1, 1], [], []>} : vector<4x64xf32>, vector<64x256xf32>, vector<4x256xf32> -> vector<4x256xf32>
    %41 = vector.broadcast %2 : vector<4x1xf32> to vector<4x256xf32>
    %42 = arith.mulf %40, %41 : vector<4x256xf32>
    %43 = vector.broadcast %3 : vector<4x1xf32> to vector<4x256xf32>
    %44 = arith.addf %42, %43 : vector<4x256xf32>
    %c0_20 = arith.constant 0 : index
    %c0_21 = arith.constant 0 : index
    %c0_22 = arith.constant 0 : index
    %45 = vector.load %arg1[%c0_20, %c0_21, %c0_22] : memref<8x64x256xf32, #tpu.memory_space<vmem>>, vector<1x64x256xf32>
    %46 = vector.shape_cast %45 : vector<1x64x256xf32> to vector<64x256xf32>
    %cst_23 = arith.constant dense<0.000000e+00> : vector<4x256xf32>
    %47 = tpu.matmul %0, %46, %cst_23 {dimension_numbers = #tpu.dot_dimension_numbers<[1], [0], [0], [1], [0, 0, 1, 1], [], []>} : vector<4x64xf32>, vector<64x256xf32>, vector<4x256xf32> -> vector<4x256xf32>
    %48 = vector.broadcast %2 : vector<4x1xf32> to vector<4x256xf32>
    %49 = arith.mulf %47, %48 : vector<4x256xf32>
    %50 = vector.broadcast %3 : vector<4x1xf32> to vector<4x256xf32>
    %51 = arith.addf %49, %50 : vector<4x256xf32>
    %52 = tpu.concatenate %37, %51, %37 in 1 : vector<4x17xf32>, vector<4x256xf32>, vector<4x17xf32> -> vector<4x290xf32>
    %cst_24 = arith.constant 0.000000e+00 : f32
    %53 = vector.broadcast %cst_24 : f32 to vector<4x256xf32>
    %54 = vector.extract_strided_slice %52 {offsets = [0, 0], sizes = [4, 256], strides = [1, 1]} : vector<4x290xf32> to vector<4x256xf32>
    %cst_25 = arith.constant 0.000000e+00 : f32
    %55 = vector.shape_cast %34 : vector<1x256xi1> to vector<1x256xi1>
    %56 = vector.broadcast %55 : vector<1x256xi1> to vector<4x256xi1>
    %57 = vector.broadcast %cst_25 : f32 to vector<4x256xf32>
    %58 = arith.select %56, %54, %57 : vector<4x256xi1>, vector<4x256xf32>
    %59 = vector.broadcast %7 : vector<4x1xf32> to vector<4x256xf32>
    %60 = arith.mulf %58, %59 : vector<4x256xf32>
    %61 = arith.addf %53, %60 : vector<4x256xf32>
    %62 = vector.extract_strided_slice %52 {offsets = [0, 1], sizes = [4, 256], strides = [1, 1]} : vector<4x290xf32> to vector<4x256xf32>
    %63 = vector.broadcast %8 : vector<4x1xf32> to vector<4x256xf32>
    %64 = arith.mulf %62, %63 : vector<4x256xf32>
    %65 = arith.addf %61, %64 : vector<4x256xf32>
    %66 = vector.extract_strided_slice %52 {offsets = [0, 2], sizes = [4, 256], strides = [1, 1]} : vector<4x290xf32> to vector<4x256xf32>
    %cst_26 = arith.constant 0.000000e+00 : f32
    %67 = vector.shape_cast %36 : vector<1x256xi1> to vector<1x256xi1>
    %68 = vector.broadcast %67 : vector<1x256xi1> to vector<4x256xi1>
    %69 = vector.broadcast %cst_26 : f32 to vector<4x256xf32>
    %70 = arith.select %68, %66, %69 : vector<4x256xi1>, vector<4x256xf32>
    %71 = vector.broadcast %9 : vector<4x1xf32> to vector<4x256xf32>
    %72 = arith.mulf %70, %71 : vector<4x256xf32>
    %73 = arith.addf %65, %72 : vector<4x256xf32>
    %74 = vector.extract_strided_slice %52 {offsets = [0, 16], sizes = [4, 256], strides = [1, 1]} : vector<4x290xf32> to vector<4x256xf32>
    %cst_27 = arith.constant 0.000000e+00 : f32
    %75 = vector.shape_cast %34 : vector<1x256xi1> to vector<1x256xi1>
    %76 = vector.broadcast %75 : vector<1x256xi1> to vector<4x256xi1>
    %77 = vector.broadcast %cst_27 : f32 to vector<4x256xf32>
    %78 = arith.select %76, %74, %77 : vector<4x256xi1>, vector<4x256xf32>
    %79 = vector.broadcast %10 : vector<4x1xf32> to vector<4x256xf32>
    %80 = arith.mulf %78, %79 : vector<4x256xf32>
    %81 = arith.addf %73, %80 : vector<4x256xf32>
    %82 = vector.extract_strided_slice %52 {offsets = [0, 17], sizes = [4, 256], strides = [1, 1]} : vector<4x290xf32> to vector<4x256xf32>
    %83 = vector.broadcast %11 : vector<4x1xf32> to vector<4x256xf32>
    %84 = arith.mulf %82, %83 : vector<4x256xf32>
    %85 = arith.addf %81, %84 : vector<4x256xf32>
    %86 = vector.extract_strided_slice %52 {offsets = [0, 18], sizes = [4, 256], strides = [1, 1]} : vector<4x290xf32> to vector<4x256xf32>
    %cst_28 = arith.constant 0.000000e+00 : f32
    %87 = vector.shape_cast %36 : vector<1x256xi1> to vector<1x256xi1>
    %88 = vector.broadcast %87 : vector<1x256xi1> to vector<4x256xi1>
    %89 = vector.broadcast %cst_28 : f32 to vector<4x256xf32>
    %90 = arith.select %88, %86, %89 : vector<4x256xi1>, vector<4x256xf32>
    %91 = vector.broadcast %12 : vector<4x1xf32> to vector<4x256xf32>
    %92 = arith.mulf %90, %91 : vector<4x256xf32>
    %93 = arith.addf %85, %92 : vector<4x256xf32>
    %94 = vector.extract_strided_slice %52 {offsets = [0, 32], sizes = [4, 256], strides = [1, 1]} : vector<4x290xf32> to vector<4x256xf32>
    %cst_29 = arith.constant 0.000000e+00 : f32
    %95 = vector.shape_cast %34 : vector<1x256xi1> to vector<1x256xi1>
    %96 = vector.broadcast %95 : vector<1x256xi1> to vector<4x256xi1>
    %97 = vector.broadcast %cst_29 : f32 to vector<4x256xf32>
    %98 = arith.select %96, %94, %97 : vector<4x256xi1>, vector<4x256xf32>
    %99 = vector.broadcast %13 : vector<4x1xf32> to vector<4x256xf32>
    %100 = arith.mulf %98, %99 : vector<4x256xf32>
    %101 = arith.addf %93, %100 : vector<4x256xf32>
    %102 = vector.extract_strided_slice %52 {offsets = [0, 33], sizes = [4, 256], strides = [1, 1]} : vector<4x290xf32> to vector<4x256xf32>
    %103 = vector.broadcast %14 : vector<4x1xf32> to vector<4x256xf32>
    %104 = arith.mulf %102, %103 : vector<4x256xf32>
    %105 = arith.addf %101, %104 : vector<4x256xf32>
    %106 = vector.extract_strided_slice %52 {offsets = [0, 34], sizes = [4, 256], strides = [1, 1]} : vector<4x290xf32> to vector<4x256xf32>
    %cst_30 = arith.constant 0.000000e+00 : f32
    %107 = vector.shape_cast %36 : vector<1x256xi1> to vector<1x256xi1>
    %108 = vector.broadcast %107 : vector<1x256xi1> to vector<4x256xi1>
    %109 = vector.broadcast %cst_30 : f32 to vector<4x256xf32>
    %110 = arith.select %108, %106, %109 : vector<4x256xi1>, vector<4x256xf32>
    %111 = vector.broadcast %15 : vector<4x1xf32> to vector<4x256xf32>
    %112 = arith.mulf %110, %111 : vector<4x256xf32>
    %113 = arith.addf %105, %112 : vector<4x256xf32>
    %114 = arith.subf %113, %44 : vector<4x256xf32>
    %cst_31 = arith.constant dense<0.000000e+00> : vector<64x256xf32>
    %115 = tpu.matmul %1, %114, %cst_31 {dimension_numbers = #tpu.dot_dimension_numbers<[1], [0], [0], [1], [0, 0, 1, 1], [], []>} : vector<64x4xf32>, vector<4x256xf32>, vector<64x256xf32> -> vector<64x256xf32>
    %116 = vector.broadcast %4 : vector<64x1xf32> to vector<64x256xf32>
    %117 = arith.mulf %115, %116 : vector<64x256xf32>
    %118 = vector.broadcast %5 : vector<64x1xf32> to vector<64x256xf32>
    %119 = arith.addf %117, %118 : vector<64x256xf32>
    %c0_32 = arith.constant 0 : index
    %c0_33 = arith.constant 0 : index
    %c0_34 = arith.constant 0 : index
    %120 = vector.load %arg9[%c0_32, %c0_33, %c0_34] : memref<8x64x256xf32, #tpu.memory_space<vmem>>, vector<1x64x256xf32>
    %121 = vector.shape_cast %120 : vector<1x64x256xf32> to vector<64x256xf32>
    %122 = vector.shape_cast %119 : vector<64x256xf32> to vector<1x64x256xf32>
    tpu.vector_store %arg9[%c0_32, %c0_33, %c0_34], %122 {strides = array<i32>} : memref<8x64x256xf32, #tpu.memory_space<vmem>>, vector<1x64x256xf32>,
    %c1 = arith.constant 1 : index
    %c0_35 = arith.constant 0 : index
    %c0_36 = arith.constant 0 : index
    %123 = vector.load %arg1[%c1, %c0_35, %c0_36] : memref<8x64x256xf32, #tpu.memory_space<vmem>>, vector<1x64x256xf32>
    %124 = vector.shape_cast %123 : vector<1x64x256xf32> to vector<64x256xf32>
    %cst_37 = arith.constant dense<0.000000e+00> : vector<4x256xf32>
    %125 = tpu.matmul %0, %124, %cst_37 {dimension_numbers = #tpu.dot_dimension_numbers<[1], [0], [0], [1], [0, 0, 1, 1], [], []>} : vector<4x64xf32>, vector<64x256xf32>, vector<4x256xf32> -> vector<4x256xf32>
    %126 = vector.broadcast %2 : vector<4x1xf32> to vector<4x256xf32>
    %127 = arith.mulf %125, %126 : vector<4x256xf32>
    %128 = vector.broadcast %3 : vector<4x1xf32> to vector<4x256xf32>
    %129 = arith.addf %127, %128 : vector<4x256xf32>
    %130 = tpu.concatenate %37, %129, %37 in 1 : vector<4x17xf32>, vector<4x256xf32>, vector<4x17xf32> -> vector<4x290xf32>
    %cst_38 = arith.constant 0.000000e+00 : f32
    %131 = vector.broadcast %cst_38 : f32 to vector<4x256xf32>
    %132 = vector.extract_strided_slice %130 {offsets = [0, 0], sizes = [4, 256], strides = [1, 1]} : vector<4x290xf32> to vector<4x256xf32>
    %cst_39 = arith.constant 0.000000e+00 : f32
    %133 = vector.shape_cast %34 : vector<1x256xi1> to vector<1x256xi1>
    %134 = vector.broadcast %133 : vector<1x256xi1> to vector<4x256xi1>
    %135 = vector.broadcast %cst_39 : f32 to vector<4x256xf32>
    %136 = arith.select %134, %132, %135 : vector<4x256xi1>, vector<4x256xf32>
    %137 = vector.broadcast %7 : vector<4x1xf32> to vector<4x256xf32>
    %138 = arith.mulf %136, %137 : vector<4x256xf32>
    %139 = arith.addf %131, %138 : vector<4x256xf32>
    %140 = vector.extract_strided_slice %130 {offsets = [0, 1], sizes = [4, 256], strides = [1, 1]} : vector<4x290xf32> to vector<4x256xf32>
    %141 = vector.broadcast %8 : vector<4x1xf32> to vector<4x256xf32>
    %142 = arith.mulf %140, %141 : vector<4x256xf32>
    %143 = arith.addf %139, %142 : vector<4x256xf32>
    %144 = vector.extract_strided_slice %130 {offsets = [0, 2], sizes = [4, 256], strides = [1, 1]} : vector<4x290xf32> to vector<4x256xf32>
    %cst_40 = arith.constant 0.000000e+00 : f32
    %145 = vector.shape_cast %36 : vector<1x256xi1> to vector<1x256xi1>
    %146 = vector.broadcast %145 : vector<1x256xi1> to vector<4x256xi1>
    %147 = vector.broadcast %cst_40 : f32 to vector<4x256xf32>
    %148 = arith.select %146, %144, %147 : vector<4x256xi1>, vector<4x256xf32>
    %149 = vector.broadcast %9 : vector<4x1xf32> to vector<4x256xf32>
    %150 = arith.mulf %148, %149 : vector<4x256xf32>
    %151 = arith.addf %143, %150 : vector<4x256xf32>
    %152 = vector.extract_strided_slice %130 {offsets = [0, 16], sizes = [4, 256], strides = [1, 1]} : vector<4x290xf32> to vector<4x256xf32>
    %cst_41 = arith.constant 0.000000e+00 : f32
    %153 = vector.shape_cast %34 : vector<1x256xi1> to vector<1x256xi1>
    %154 = vector.broadcast %153 : vector<1x256xi1> to vector<4x256xi1>
    %155 = vector.broadcast %cst_41 : f32 to vector<4x256xf32>
    %156 = arith.select %154, %152, %155 : vector<4x256xi1>, vector<4x256xf32>
    %157 = vector.broadcast %10 : vector<4x1xf32> to vector<4x256xf32>
    %158 = arith.mulf %156, %157 : vector<4x256xf32>
    %159 = arith.addf %151, %158 : vector<4x256xf32>
    %160 = vector.extract_strided_slice %130 {offsets = [0, 17], sizes = [4, 256], strides = [1, 1]} : vector<4x290xf32> to vector<4x256xf32>
    %161 = vector.broadcast %11 : vector<4x1xf32> to vector<4x256xf32>
    %162 = arith.mulf %160, %161 : vector<4x256xf32>
    %163 = arith.addf %159, %162 : vector<4x256xf32>
    %164 = vector.extract_strided_slice %130 {offsets = [0, 18], sizes = [4, 256], strides = [1, 1]} : vector<4x290xf32> to vector<4x256xf32>
    %cst_42 = arith.constant 0.000000e+00 : f32
    %165 = vector.shape_cast %36 : vector<1x256xi1> to vector<1x256xi1>
    %166 = vector.broadcast %165 : vector<1x256xi1> to vector<4x256xi1>
    %167 = vector.broadcast %cst_42 : f32 to vector<4x256xf32>
    %168 = arith.select %166, %164, %167 : vector<4x256xi1>, vector<4x256xf32>
    %169 = vector.broadcast %12 : vector<4x1xf32> to vector<4x256xf32>
    %170 = arith.mulf %168, %169 : vector<4x256xf32>
    %171 = arith.addf %163, %170 : vector<4x256xf32>
    %172 = vector.extract_strided_slice %130 {offsets = [0, 32], sizes = [4, 256], strides = [1, 1]} : vector<4x290xf32> to vector<4x256xf32>
    %cst_43 = arith.constant 0.000000e+00 : f32
    %173 = vector.shape_cast %34 : vector<1x256xi1> to vector<1x256xi1>
    %174 = vector.broadcast %173 : vector<1x256xi1> to vector<4x256xi1>
    %175 = vector.broadcast %cst_43 : f32 to vector<4x256xf32>
    %176 = arith.select %174, %172, %175 : vector<4x256xi1>, vector<4x256xf32>
    %177 = vector.broadcast %13 : vector<4x1xf32> to vector<4x256xf32>
    %178 = arith.mulf %176, %177 : vector<4x256xf32>
    %179 = arith.addf %171, %178 : vector<4x256xf32>
    %180 = vector.extract_strided_slice %130 {offsets = [0, 33], sizes = [4, 256], strides = [1, 1]} : vector<4x290xf32> to vector<4x256xf32>
    %181 = vector.broadcast %14 : vector<4x1xf32> to vector<4x256xf32>
    %182 = arith.mulf %180, %181 : vector<4x256xf32>
    %183 = arith.addf %179, %182 : vector<4x256xf32>
    %184 = vector.extract_strided_slice %130 {offsets = [0, 34], sizes = [4, 256], strides = [1, 1]} : vector<4x290xf32> to vector<4x256xf32>
    %cst_44 = arith.constant 0.000000e+00 : f32
    %185 = vector.shape_cast %36 : vector<1x256xi1> to vector<1x256xi1>
    %186 = vector.broadcast %185 : vector<1x256xi1> to vector<4x256xi1>
    %187 = vector.broadcast %cst_44 : f32 to vector<4x256xf32>
    %188 = arith.select %186, %184, %187 : vector<4x256xi1>, vector<4x256xf32>
    %189 = vector.broadcast %15 : vector<4x1xf32> to vector<4x256xf32>
    %190 = arith.mulf %188, %189 : vector<4x256xf32>
    %191 = arith.addf %183, %190 : vector<4x256xf32>
    %192 = arith.subf %191, %44 : vector<4x256xf32>
    %cst_45 = arith.constant dense<0.000000e+00> : vector<64x256xf32>
    %193 = tpu.matmul %1, %192, %cst_45 {dimension_numbers = #tpu.dot_dimension_numbers<[1], [0], [0], [1], [0, 0, 1, 1], [], []>} : vector<64x4xf32>, vector<4x256xf32>, vector<64x256xf32> -> vector<64x256xf32>
    %194 = vector.broadcast %4 : vector<64x1xf32> to vector<64x256xf32>
    %195 = arith.mulf %193, %194 : vector<64x256xf32>
    %196 = vector.broadcast %5 : vector<64x1xf32> to vector<64x256xf32>
    %197 = arith.addf %195, %196 : vector<64x256xf32>
    %c1_46 = arith.constant 1 : index
    %c0_47 = arith.constant 0 : index
    %c0_48 = arith.constant 0 : index
    %198 = vector.load %arg9[%c1_46, %c0_47, %c0_48] : memref<8x64x256xf32, #tpu.memory_space<vmem>>, vector<1x64x256xf32>
    %199 = vector.shape_cast %198 : vector<1x64x256xf32> to vector<64x256xf32>
    %200 = vector.shape_cast %197 : vector<64x256xf32> to vector<1x64x256xf32>
    tpu.vector_store %arg9[%c1_46, %c0_47, %c0_48], %200 {strides = array<i32>} : memref<8x64x256xf32, #tpu.memory_space<vmem>>, vector<1x64x256xf32>,
    %c2 = arith.constant 2 : index
    %c0_49 = arith.constant 0 : index
    %c0_50 = arith.constant 0 : index
    %201 = vector.load %arg1[%c2, %c0_49, %c0_50] : memref<8x64x256xf32, #tpu.memory_space<vmem>>, vector<1x64x256xf32>
    %202 = vector.shape_cast %201 : vector<1x64x256xf32> to vector<64x256xf32>
    %cst_51 = arith.constant dense<0.000000e+00> : vector<4x256xf32>
    %203 = tpu.matmul %0, %202, %cst_51 {dimension_numbers = #tpu.dot_dimension_numbers<[1], [0], [0], [1], [0, 0, 1, 1], [], []>} : vector<4x64xf32>, vector<64x256xf32>, vector<4x256xf32> -> vector<4x256xf32>
    %204 = vector.broadcast %2 : vector<4x1xf32> to vector<4x256xf32>
    %205 = arith.mulf %203, %204 : vector<4x256xf32>
    %206 = vector.broadcast %3 : vector<4x1xf32> to vector<4x256xf32>
    %207 = arith.addf %205, %206 : vector<4x256xf32>
    %208 = tpu.concatenate %37, %207, %37 in 1 : vector<4x17xf32>, vector<4x256xf32>, vector<4x17xf32> -> vector<4x290xf32>
    %cst_52 = arith.constant 0.000000e+00 : f32
    %209 = vector.broadcast %cst_52 : f32 to vector<4x256xf32>
    %210 = vector.extract_strided_slice %208 {offsets = [0, 0], sizes = [4, 256], strides = [1, 1]} : vector<4x290xf32> to vector<4x256xf32>
    %cst_53 = arith.constant 0.000000e+00 : f32
    %211 = vector.shape_cast %34 : vector<1x256xi1> to vector<1x256xi1>
    %212 = vector.broadcast %211 : vector<1x256xi1> to vector<4x256xi1>
    %213 = vector.broadcast %cst_53 : f32 to vector<4x256xf32>
    %214 = arith.select %212, %210, %213 : vector<4x256xi1>, vector<4x256xf32>
    %215 = vector.broadcast %7 : vector<4x1xf32> to vector<4x256xf32>
    %216 = arith.mulf %214, %215 : vector<4x256xf32>
    %217 = arith.addf %209, %216 : vector<4x256xf32>
    %218 = vector.extract_strided_slice %208 {offsets = [0, 1], sizes = [4, 256], strides = [1, 1]} : vector<4x290xf32> to vector<4x256xf32>
    %219 = vector.broadcast %8 : vector<4x1xf32> to vector<4x256xf32>
    %220 = arith.mulf %218, %219 : vector<4x256xf32>
    %221 = arith.addf %217, %220 : vector<4x256xf32>
    %222 = vector.extract_strided_slice %208 {offsets = [0, 2], sizes = [4, 256], strides = [1, 1]} : vector<4x290xf32> to vector<4x256xf32>
    %cst_54 = arith.constant 0.000000e+00 : f32
    %223 = vector.shape_cast %36 : vector<1x256xi1> to vector<1x256xi1>
    %224 = vector.broadcast %223 : vector<1x256xi1> to vector<4x256xi1>
    %225 = vector.broadcast %cst_54 : f32 to vector<4x256xf32>
    %226 = arith.select %224, %222, %225 : vector<4x256xi1>, vector<4x256xf32>
    %227 = vector.broadcast %9 : vector<4x1xf32> to vector<4x256xf32>
    %228 = arith.mulf %226, %227 : vector<4x256xf32>
    %229 = arith.addf %221, %228 : vector<4x256xf32>
    %230 = vector.extract_strided_slice %208 {offsets = [0, 16], sizes = [4, 256], strides = [1, 1]} : vector<4x290xf32> to vector<4x256xf32>
    %cst_55 = arith.constant 0.000000e+00 : f32
    %231 = vector.shape_cast %34 : vector<1x256xi1> to vector<1x256xi1>
    %232 = vector.broadcast %231 : vector<1x256xi1> to vector<4x256xi1>
    %233 = vector.broadcast %cst_55 : f32 to vector<4x256xf32>
    %234 = arith.select %232, %230, %233 : vector<4x256xi1>, vector<4x256xf32>
    %235 = vector.broadcast %10 : vector<4x1xf32> to vector<4x256xf32>
    %236 = arith.mulf %234, %235 : vector<4x256xf32>
    %237 = arith.addf %229, %236 : vector<4x256xf32>
    %238 = vector.extract_strided_slice %208 {offsets = [0, 17], sizes = [4, 256], strides = [1, 1]} : vector<4x290xf32> to vector<4x256xf32>
    %239 = vector.broadcast %11 : vector<4x1xf32> to vector<4x256xf32>
    %240 = arith.mulf %238, %239 : vector<4x256xf32>
    %241 = arith.addf %237, %240 : vector<4x256xf32>
    %242 = vector.extract_strided_slice %208 {offsets = [0, 18], sizes = [4, 256], strides = [1, 1]} : vector<4x290xf32> to vector<4x256xf32>
    %cst_56 = arith.constant 0.000000e+00 : f32
    %243 = vector.shape_cast %36 : vector<1x256xi1> to vector<1x256xi1>
    %244 = vector.broadcast %243 : vector<1x256xi1> to vector<4x256xi1>
    %245 = vector.broadcast %cst_56 : f32 to vector<4x256xf32>
    %246 = arith.select %244, %242, %245 : vector<4x256xi1>, vector<4x256xf32>
    %247 = vector.broadcast %12 : vector<4x1xf32> to vector<4x256xf32>
    %248 = arith.mulf %246, %247 : vector<4x256xf32>
    %249 = arith.addf %241, %248 : vector<4x256xf32>
    %250 = vector.extract_strided_slice %208 {offsets = [0, 32], sizes = [4, 256], strides = [1, 1]} : vector<4x290xf32> to vector<4x256xf32>
    %cst_57 = arith.constant 0.000000e+00 : f32
    %251 = vector.shape_cast %34 : vector<1x256xi1> to vector<1x256xi1>
    %252 = vector.broadcast %251 : vector<1x256xi1> to vector<4x256xi1>
    %253 = vector.broadcast %cst_57 : f32 to vector<4x256xf32>
    %254 = arith.select %252, %250, %253 : vector<4x256xi1>, vector<4x256xf32>
    %255 = vector.broadcast %13 : vector<4x1xf32> to vector<4x256xf32>
    %256 = arith.mulf %254, %255 : vector<4x256xf32>
    %257 = arith.addf %249, %256 : vector<4x256xf32>
    %258 = vector.extract_strided_slice %208 {offsets = [0, 33], sizes = [4, 256], strides = [1, 1]} : vector<4x290xf32> to vector<4x256xf32>
    %259 = vector.broadcast %14 : vector<4x1xf32> to vector<4x256xf32>
    %260 = arith.mulf %258, %259 : vector<4x256xf32>
    %261 = arith.addf %257, %260 : vector<4x256xf32>
    %262 = vector.extract_strided_slice %208 {offsets = [0, 34], sizes = [4, 256], strides = [1, 1]} : vector<4x290xf32> to vector<4x256xf32>
    %cst_58 = arith.constant 0.000000e+00 : f32
    %263 = vector.shape_cast %36 : vector<1x256xi1> to vector<1x256xi1>
    %264 = vector.broadcast %263 : vector<1x256xi1> to vector<4x256xi1>
    %265 = vector.broadcast %cst_58 : f32 to vector<4x256xf32>
    %266 = arith.select %264, %262, %265 : vector<4x256xi1>, vector<4x256xf32>
    %267 = vector.broadcast %15 : vector<4x1xf32> to vector<4x256xf32>
    %268 = arith.mulf %266, %267 : vector<4x256xf32>
    %269 = arith.addf %261, %268 : vector<4x256xf32>
    %270 = arith.subf %269, %44 : vector<4x256xf32>
    %cst_59 = arith.constant dense<0.000000e+00> : vector<64x256xf32>
    %271 = tpu.matmul %1, %270, %cst_59 {dimension_numbers = #tpu.dot_dimension_numbers<[1], [0], [0], [1], [0, 0, 1, 1], [], []>} : vector<64x4xf32>, vector<4x256xf32>, vector<64x256xf32> -> vector<64x256xf32>
    %272 = vector.broadcast %4 : vector<64x1xf32> to vector<64x256xf32>
    %273 = arith.mulf %271, %272 : vector<64x256xf32>
    %274 = vector.broadcast %5 : vector<64x1xf32> to vector<64x256xf32>
    %275 = arith.addf %273, %274 : vector<64x256xf32>
    %c2_60 = arith.constant 2 : index
    %c0_61 = arith.constant 0 : index
    %c0_62 = arith.constant 0 : index
    %276 = vector.load %arg9[%c2_60, %c0_61, %c0_62] : memref<8x64x256xf32, #tpu.memory_space<vmem>>, vector<1x64x256xf32>
    %277 = vector.shape_cast %276 : vector<1x64x256xf32> to vector<64x256xf32>
    %278 = vector.shape_cast %275 : vector<64x256xf32> to vector<1x64x256xf32>
    tpu.vector_store %arg9[%c2_60, %c0_61, %c0_62], %278 {strides = array<i32>} : memref<8x64x256xf32, #tpu.memory_space<vmem>>, vector<1x64x256xf32>,
    %c3 = arith.constant 3 : index
    %c0_63 = arith.constant 0 : index
    %c0_64 = arith.constant 0 : index
    %279 = vector.load %arg1[%c3, %c0_63, %c0_64] : memref<8x64x256xf32, #tpu.memory_space<vmem>>, vector<1x64x256xf32>
    %280 = vector.shape_cast %279 : vector<1x64x256xf32> to vector<64x256xf32>
    %cst_65 = arith.constant dense<0.000000e+00> : vector<4x256xf32>
    %281 = tpu.matmul %0, %280, %cst_65 {dimension_numbers = #tpu.dot_dimension_numbers<[1], [0], [0], [1], [0, 0, 1, 1], [], []>} : vector<4x64xf32>, vector<64x256xf32>, vector<4x256xf32> -> vector<4x256xf32>
    %282 = vector.broadcast %2 : vector<4x1xf32> to vector<4x256xf32>
    %283 = arith.mulf %281, %282 : vector<4x256xf32>
    %284 = vector.broadcast %3 : vector<4x1xf32> to vector<4x256xf32>
    %285 = arith.addf %283, %284 : vector<4x256xf32>
    %286 = tpu.concatenate %37, %285, %37 in 1 : vector<4x17xf32>, vector<4x256xf32>, vector<4x17xf32> -> vector<4x290xf32>
    %cst_66 = arith.constant 0.000000e+00 : f32
    %287 = vector.broadcast %cst_66 : f32 to vector<4x256xf32>
    %288 = vector.extract_strided_slice %286 {offsets = [0, 0], sizes = [4, 256], strides = [1, 1]} : vector<4x290xf32> to vector<4x256xf32>
    %cst_67 = arith.constant 0.000000e+00 : f32
    %289 = vector.shape_cast %34 : vector<1x256xi1> to vector<1x256xi1>
    %290 = vector.broadcast %289 : vector<1x256xi1> to vector<4x256xi1>
    %291 = vector.broadcast %cst_67 : f32 to vector<4x256xf32>
    %292 = arith.select %290, %288, %291 : vector<4x256xi1>, vector<4x256xf32>
    %293 = vector.broadcast %7 : vector<4x1xf32> to vector<4x256xf32>
    %294 = arith.mulf %292, %293 : vector<4x256xf32>
    %295 = arith.addf %287, %294 : vector<4x256xf32>
    %296 = vector.extract_strided_slice %286 {offsets = [0, 1], sizes = [4, 256], strides = [1, 1]} : vector<4x290xf32> to vector<4x256xf32>
    %297 = vector.broadcast %8 : vector<4x1xf32> to vector<4x256xf32>
    %298 = arith.mulf %296, %297 : vector<4x256xf32>
    %299 = arith.addf %295, %298 : vector<4x256xf32>
    %300 = vector.extract_strided_slice %286 {offsets = [0, 2], sizes = [4, 256], strides = [1, 1]} : vector<4x290xf32> to vector<4x256xf32>
    %cst_68 = arith.constant 0.000000e+00 : f32
    %301 = vector.shape_cast %36 : vector<1x256xi1> to vector<1x256xi1>
    %302 = vector.broadcast %301 : vector<1x256xi1> to vector<4x256xi1>
    %303 = vector.broadcast %cst_68 : f32 to vector<4x256xf32>
    %304 = arith.select %302, %300, %303 : vector<4x256xi1>, vector<4x256xf32>
    %305 = vector.broadcast %9 : vector<4x1xf32> to vector<4x256xf32>
    %306 = arith.mulf %304, %305 : vector<4x256xf32>
    %307 = arith.addf %299, %306 : vector<4x256xf32>
    %308 = vector.extract_strided_slice %286 {offsets = [0, 16], sizes = [4, 256], strides = [1, 1]} : vector<4x290xf32> to vector<4x256xf32>
    %cst_69 = arith.constant 0.000000e+00 : f32
    %309 = vector.shape_cast %34 : vector<1x256xi1> to vector<1x256xi1>
    %310 = vector.broadcast %309 : vector<1x256xi1> to vector<4x256xi1>
    %311 = vector.broadcast %cst_69 : f32 to vector<4x256xf32>
    %312 = arith.select %310, %308, %311 : vector<4x256xi1>, vector<4x256xf32>
    %313 = vector.broadcast %10 : vector<4x1xf32> to vector<4x256xf32>
    %314 = arith.mulf %312, %313 : vector<4x256xf32>
    %315 = arith.addf %307, %314 : vector<4x256xf32>
    %316 = vector.extract_strided_slice %286 {offsets = [0, 17], sizes = [4, 256], strides = [1, 1]} : vector<4x290xf32> to vector<4x256xf32>
    %317 = vector.broadcast %11 : vector<4x1xf32> to vector<4x256xf32>
    %318 = arith.mulf %316, %317 : vector<4x256xf32>
    %319 = arith.addf %315, %318 : vector<4x256xf32>
    %320 = vector.extract_strided_slice %286 {offsets = [0, 18], sizes = [4, 256], strides = [1, 1]} : vector<4x290xf32> to vector<4x256xf32>
    %cst_70 = arith.constant 0.000000e+00 : f32
    %321 = vector.shape_cast %36 : vector<1x256xi1> to vector<1x256xi1>
    %322 = vector.broadcast %321 : vector<1x256xi1> to vector<4x256xi1>
    %323 = vector.broadcast %cst_70 : f32 to vector<4x256xf32>
    %324 = arith.select %322, %320, %323 : vector<4x256xi1>, vector<4x256xf32>
    %325 = vector.broadcast %12 : vector<4x1xf32> to vector<4x256xf32>
    %326 = arith.mulf %324, %325 : vector<4x256xf32>
    %327 = arith.addf %319, %326 : vector<4x256xf32>
    %328 = vector.extract_strided_slice %286 {offsets = [0, 32], sizes = [4, 256], strides = [1, 1]} : vector<4x290xf32> to vector<4x256xf32>
    %cst_71 = arith.constant 0.000000e+00 : f32
    %329 = vector.shape_cast %34 : vector<1x256xi1> to vector<1x256xi1>
    %330 = vector.broadcast %329 : vector<1x256xi1> to vector<4x256xi1>
    %331 = vector.broadcast %cst_71 : f32 to vector<4x256xf32>
    %332 = arith.select %330, %328, %331 : vector<4x256xi1>, vector<4x256xf32>
    %333 = vector.broadcast %13 : vector<4x1xf32> to vector<4x256xf32>
    %334 = arith.mulf %332, %333 : vector<4x256xf32>
    %335 = arith.addf %327, %334 : vector<4x256xf32>
    %336 = vector.extract_strided_slice %286 {offsets = [0, 33], sizes = [4, 256], strides = [1, 1]} : vector<4x290xf32> to vector<4x256xf32>
    %337 = vector.broadcast %14 : vector<4x1xf32> to vector<4x256xf32>
    %338 = arith.mulf %336, %337 : vector<4x256xf32>
    %339 = arith.addf %335, %338 : vector<4x256xf32>
    %340 = vector.extract_strided_slice %286 {offsets = [0, 34], sizes = [4, 256], strides = [1, 1]} : vector<4x290xf32> to vector<4x256xf32>
    %cst_72 = arith.constant 0.000000e+00 : f32
    %341 = vector.shape_cast %36 : vector<1x256xi1> to vector<1x256xi1>
    %342 = vector.broadcast %341 : vector<1x256xi1> to vector<4x256xi1>
    %343 = vector.broadcast %cst_72 : f32 to vector<4x256xf32>
    %344 = arith.select %342, %340, %343 : vector<4x256xi1>, vector<4x256xf32>
    %345 = vector.broadcast %15 : vector<4x1xf32> to vector<4x256xf32>
    %346 = arith.mulf %344, %345 : vector<4x256xf32>
    %347 = arith.addf %339, %346 : vector<4x256xf32>
    %348 = arith.subf %347, %44 : vector<4x256xf32>
    %cst_73 = arith.constant dense<0.000000e+00> : vector<64x256xf32>
    %349 = tpu.matmul %1, %348, %cst_73 {dimension_numbers = #tpu.dot_dimension_numbers<[1], [0], [0], [1], [0, 0, 1, 1], [], []>} : vector<64x4xf32>, vector<4x256xf32>, vector<64x256xf32> -> vector<64x256xf32>
    %350 = vector.broadcast %4 : vector<64x1xf32> to vector<64x256xf32>
    %351 = arith.mulf %349, %350 : vector<64x256xf32>
    %352 = vector.broadcast %5 : vector<64x1xf32> to vector<64x256xf32>
    %353 = arith.addf %351, %352 : vector<64x256xf32>
    %c3_74 = arith.constant 3 : index
    %c0_75 = arith.constant 0 : index
    %c0_76 = arith.constant 0 : index
    %354 = vector.load %arg9[%c3_74, %c0_75, %c0_76] : memref<8x64x256xf32, #tpu.memory_space<vmem>>, vector<1x64x256xf32>
    %355 = vector.shape_cast %354 : vector<1x64x256xf32> to vector<64x256xf32>
    %356 = vector.shape_cast %353 : vector<64x256xf32> to vector<1x64x256xf32>
    tpu.vector_store %arg9[%c3_74, %c0_75, %c0_76], %356 {strides = array<i32>} : memref<8x64x256xf32, #tpu.memory_space<vmem>>, vector<1x64x256xf32>,
    %c4_77 = arith.constant 4 : index
    %c0_78 = arith.constant 0 : index
    %c0_79 = arith.constant 0 : index
    %357 = vector.load %arg1[%c4_77, %c0_78, %c0_79] : memref<8x64x256xf32, #tpu.memory_space<vmem>>, vector<1x64x256xf32>
    %358 = vector.shape_cast %357 : vector<1x64x256xf32> to vector<64x256xf32>
    %cst_80 = arith.constant dense<0.000000e+00> : vector<4x256xf32>
    %359 = tpu.matmul %0, %358, %cst_80 {dimension_numbers = #tpu.dot_dimension_numbers<[1], [0], [0], [1], [0, 0, 1, 1], [], []>} : vector<4x64xf32>, vector<64x256xf32>, vector<4x256xf32> -> vector<4x256xf32>
    %360 = vector.broadcast %2 : vector<4x1xf32> to vector<4x256xf32>
    %361 = arith.mulf %359, %360 : vector<4x256xf32>
    %362 = vector.broadcast %3 : vector<4x1xf32> to vector<4x256xf32>
    %363 = arith.addf %361, %362 : vector<4x256xf32>
    %364 = tpu.concatenate %37, %363, %37 in 1 : vector<4x17xf32>, vector<4x256xf32>, vector<4x17xf32> -> vector<4x290xf32>
    %cst_81 = arith.constant 0.000000e+00 : f32
    %365 = vector.broadcast %cst_81 : f32 to vector<4x256xf32>
    %366 = vector.extract_strided_slice %364 {offsets = [0, 0], sizes = [4, 256], strides = [1, 1]} : vector<4x290xf32> to vector<4x256xf32>
    %cst_82 = arith.constant 0.000000e+00 : f32
    %367 = vector.shape_cast %34 : vector<1x256xi1> to vector<1x256xi1>
    %368 = vector.broadcast %367 : vector<1x256xi1> to vector<4x256xi1>
    %369 = vector.broadcast %cst_82 : f32 to vector<4x256xf32>
    %370 = arith.select %368, %366, %369 : vector<4x256xi1>, vector<4x256xf32>
    %371 = vector.broadcast %7 : vector<4x1xf32> to vector<4x256xf32>
    %372 = arith.mulf %370, %371 : vector<4x256xf32>
    %373 = arith.addf %365, %372 : vector<4x256xf32>
    %374 = vector.extract_strided_slice %364 {offsets = [0, 1], sizes = [4, 256], strides = [1, 1]} : vector<4x290xf32> to vector<4x256xf32>
    %375 = vector.broadcast %8 : vector<4x1xf32> to vector<4x256xf32>
    %376 = arith.mulf %374, %375 : vector<4x256xf32>
    %377 = arith.addf %373, %376 : vector<4x256xf32>
    %378 = vector.extract_strided_slice %364 {offsets = [0, 2], sizes = [4, 256], strides = [1, 1]} : vector<4x290xf32> to vector<4x256xf32>
    %cst_83 = arith.constant 0.000000e+00 : f32
    %379 = vector.shape_cast %36 : vector<1x256xi1> to vector<1x256xi1>
    %380 = vector.broadcast %379 : vector<1x256xi1> to vector<4x256xi1>
    %381 = vector.broadcast %cst_83 : f32 to vector<4x256xf32>
    %382 = arith.select %380, %378, %381 : vector<4x256xi1>, vector<4x256xf32>
    %383 = vector.broadcast %9 : vector<4x1xf32> to vector<4x256xf32>
    %384 = arith.mulf %382, %383 : vector<4x256xf32>
    %385 = arith.addf %377, %384 : vector<4x256xf32>
    %386 = vector.extract_strided_slice %364 {offsets = [0, 16], sizes = [4, 256], strides = [1, 1]} : vector<4x290xf32> to vector<4x256xf32>
    %cst_84 = arith.constant 0.000000e+00 : f32
    %387 = vector.shape_cast %34 : vector<1x256xi1> to vector<1x256xi1>
    %388 = vector.broadcast %387 : vector<1x256xi1> to vector<4x256xi1>
    %389 = vector.broadcast %cst_84 : f32 to vector<4x256xf32>
    %390 = arith.select %388, %386, %389 : vector<4x256xi1>, vector<4x256xf32>
    %391 = vector.broadcast %10 : vector<4x1xf32> to vector<4x256xf32>
    %392 = arith.mulf %390, %391 : vector<4x256xf32>
    %393 = arith.addf %385, %392 : vector<4x256xf32>
    %394 = vector.extract_strided_slice %364 {offsets = [0, 17], sizes = [4, 256], strides = [1, 1]} : vector<4x290xf32> to vector<4x256xf32>
    %395 = vector.broadcast %11 : vector<4x1xf32> to vector<4x256xf32>
    %396 = arith.mulf %394, %395 : vector<4x256xf32>
    %397 = arith.addf %393, %396 : vector<4x256xf32>
    %398 = vector.extract_strided_slice %364 {offsets = [0, 18], sizes = [4, 256], strides = [1, 1]} : vector<4x290xf32> to vector<4x256xf32>
    %cst_85 = arith.constant 0.000000e+00 : f32
    %399 = vector.shape_cast %36 : vector<1x256xi1> to vector<1x256xi1>
    %400 = vector.broadcast %399 : vector<1x256xi1> to vector<4x256xi1>
    %401 = vector.broadcast %cst_85 : f32 to vector<4x256xf32>
    %402 = arith.select %400, %398, %401 : vector<4x256xi1>, vector<4x256xf32>
    %403 = vector.broadcast %12 : vector<4x1xf32> to vector<4x256xf32>
    %404 = arith.mulf %402, %403 : vector<4x256xf32>
    %405 = arith.addf %397, %404 : vector<4x256xf32>
    %406 = vector.extract_strided_slice %364 {offsets = [0, 32], sizes = [4, 256], strides = [1, 1]} : vector<4x290xf32> to vector<4x256xf32>
    %cst_86 = arith.constant 0.000000e+00 : f32
    %407 = vector.shape_cast %34 : vector<1x256xi1> to vector<1x256xi1>
    %408 = vector.broadcast %407 : vector<1x256xi1> to vector<4x256xi1>
    %409 = vector.broadcast %cst_86 : f32 to vector<4x256xf32>
    %410 = arith.select %408, %406, %409 : vector<4x256xi1>, vector<4x256xf32>
    %411 = vector.broadcast %13 : vector<4x1xf32> to vector<4x256xf32>
    %412 = arith.mulf %410, %411 : vector<4x256xf32>
    %413 = arith.addf %405, %412 : vector<4x256xf32>
    %414 = vector.extract_strided_slice %364 {offsets = [0, 33], sizes = [4, 256], strides = [1, 1]} : vector<4x290xf32> to vector<4x256xf32>
    %415 = vector.broadcast %14 : vector<4x1xf32> to vector<4x256xf32>
    %416 = arith.mulf %414, %415 : vector<4x256xf32>
    %417 = arith.addf %413, %416 : vector<4x256xf32>
    %418 = vector.extract_strided_slice %364 {offsets = [0, 34], sizes = [4, 256], strides = [1, 1]} : vector<4x290xf32> to vector<4x256xf32>
    %cst_87 = arith.constant 0.000000e+00 : f32
    %419 = vector.shape_cast %36 : vector<1x256xi1> to vector<1x256xi1>
    %420 = vector.broadcast %419 : vector<1x256xi1> to vector<4x256xi1>
    %421 = vector.broadcast %cst_87 : f32 to vector<4x256xf32>
    %422 = arith.select %420, %418, %421 : vector<4x256xi1>, vector<4x256xf32>
    %423 = vector.broadcast %15 : vector<4x1xf32> to vector<4x256xf32>
    %424 = arith.mulf %422, %423 : vector<4x256xf32>
    %425 = arith.addf %417, %424 : vector<4x256xf32>
    %426 = arith.subf %425, %44 : vector<4x256xf32>
    %cst_88 = arith.constant dense<0.000000e+00> : vector<64x256xf32>
    %427 = tpu.matmul %1, %426, %cst_88 {dimension_numbers = #tpu.dot_dimension_numbers<[1], [0], [0], [1], [0, 0, 1, 1], [], []>} : vector<64x4xf32>, vector<4x256xf32>, vector<64x256xf32> -> vector<64x256xf32>
    %428 = vector.broadcast %4 : vector<64x1xf32> to vector<64x256xf32>
    %429 = arith.mulf %427, %428 : vector<64x256xf32>
    %430 = vector.broadcast %5 : vector<64x1xf32> to vector<64x256xf32>
    %431 = arith.addf %429, %430 : vector<64x256xf32>
    %c4_89 = arith.constant 4 : index
    %c0_90 = arith.constant 0 : index
    %c0_91 = arith.constant 0 : index
    %432 = vector.load %arg9[%c4_89, %c0_90, %c0_91] : memref<8x64x256xf32, #tpu.memory_space<vmem>>, vector<1x64x256xf32>
    %433 = vector.shape_cast %432 : vector<1x64x256xf32> to vector<64x256xf32>
    %434 = vector.shape_cast %431 : vector<64x256xf32> to vector<1x64x256xf32>
    tpu.vector_store %arg9[%c4_89, %c0_90, %c0_91], %434 {strides = array<i32>} : memref<8x64x256xf32, #tpu.memory_space<vmem>>, vector<1x64x256xf32>,
    %c5 = arith.constant 5 : index
    %c0_92 = arith.constant 0 : index
    %c0_93 = arith.constant 0 : index
    %435 = vector.load %arg1[%c5, %c0_92, %c0_93] : memref<8x64x256xf32, #tpu.memory_space<vmem>>, vector<1x64x256xf32>
    %436 = vector.shape_cast %435 : vector<1x64x256xf32> to vector<64x256xf32>
    %cst_94 = arith.constant dense<0.000000e+00> : vector<4x256xf32>
    %437 = tpu.matmul %0, %436, %cst_94 {dimension_numbers = #tpu.dot_dimension_numbers<[1], [0], [0], [1], [0, 0, 1, 1], [], []>} : vector<4x64xf32>, vector<64x256xf32>, vector<4x256xf32> -> vector<4x256xf32>
    %438 = vector.broadcast %2 : vector<4x1xf32> to vector<4x256xf32>
    %439 = arith.mulf %437, %438 : vector<4x256xf32>
    %440 = vector.broadcast %3 : vector<4x1xf32> to vector<4x256xf32>
    %441 = arith.addf %439, %440 : vector<4x256xf32>
    %442 = tpu.concatenate %37, %441, %37 in 1 : vector<4x17xf32>, vector<4x256xf32>, vector<4x17xf32> -> vector<4x290xf32>
    %cst_95 = arith.constant 0.000000e+00 : f32
    %443 = vector.broadcast %cst_95 : f32 to vector<4x256xf32>
    %444 = vector.extract_strided_slice %442 {offsets = [0, 0], sizes = [4, 256], strides = [1, 1]} : vector<4x290xf32> to vector<4x256xf32>
    %cst_96 = arith.constant 0.000000e+00 : f32
    %445 = vector.shape_cast %34 : vector<1x256xi1> to vector<1x256xi1>
    %446 = vector.broadcast %445 : vector<1x256xi1> to vector<4x256xi1>
    %447 = vector.broadcast %cst_96 : f32 to vector<4x256xf32>
    %448 = arith.select %446, %444, %447 : vector<4x256xi1>, vector<4x256xf32>
    %449 = vector.broadcast %7 : vector<4x1xf32> to vector<4x256xf32>
    %450 = arith.mulf %448, %449 : vector<4x256xf32>
    %451 = arith.addf %443, %450 : vector<4x256xf32>
    %452 = vector.extract_strided_slice %442 {offsets = [0, 1], sizes = [4, 256], strides = [1, 1]} : vector<4x290xf32> to vector<4x256xf32>
    %453 = vector.broadcast %8 : vector<4x1xf32> to vector<4x256xf32>
    %454 = arith.mulf %452, %453 : vector<4x256xf32>
    %455 = arith.addf %451, %454 : vector<4x256xf32>
    %456 = vector.extract_strided_slice %442 {offsets = [0, 2], sizes = [4, 256], strides = [1, 1]} : vector<4x290xf32> to vector<4x256xf32>
    %cst_97 = arith.constant 0.000000e+00 : f32
    %457 = vector.shape_cast %36 : vector<1x256xi1> to vector<1x256xi1>
    %458 = vector.broadcast %457 : vector<1x256xi1> to vector<4x256xi1>
    %459 = vector.broadcast %cst_97 : f32 to vector<4x256xf32>
    %460 = arith.select %458, %456, %459 : vector<4x256xi1>, vector<4x256xf32>
    %461 = vector.broadcast %9 : vector<4x1xf32> to vector<4x256xf32>
    %462 = arith.mulf %460, %461 : vector<4x256xf32>
    %463 = arith.addf %455, %462 : vector<4x256xf32>
    %464 = vector.extract_strided_slice %442 {offsets = [0, 16], sizes = [4, 256], strides = [1, 1]} : vector<4x290xf32> to vector<4x256xf32>
    %cst_98 = arith.constant 0.000000e+00 : f32
    %465 = vector.shape_cast %34 : vector<1x256xi1> to vector<1x256xi1>
    %466 = vector.broadcast %465 : vector<1x256xi1> to vector<4x256xi1>
    %467 = vector.broadcast %cst_98 : f32 to vector<4x256xf32>
    %468 = arith.select %466, %464, %467 : vector<4x256xi1>, vector<4x256xf32>
    %469 = vector.broadcast %10 : vector<4x1xf32> to vector<4x256xf32>
    %470 = arith.mulf %468, %469 : vector<4x256xf32>
    %471 = arith.addf %463, %470 : vector<4x256xf32>
    %472 = vector.extract_strided_slice %442 {offsets = [0, 17], sizes = [4, 256], strides = [1, 1]} : vector<4x290xf32> to vector<4x256xf32>
    %473 = vector.broadcast %11 : vector<4x1xf32> to vector<4x256xf32>
    %474 = arith.mulf %472, %473 : vector<4x256xf32>
    %475 = arith.addf %471, %474 : vector<4x256xf32>
    %476 = vector.extract_strided_slice %442 {offsets = [0, 18], sizes = [4, 256], strides = [1, 1]} : vector<4x290xf32> to vector<4x256xf32>
    %cst_99 = arith.constant 0.000000e+00 : f32
    %477 = vector.shape_cast %36 : vector<1x256xi1> to vector<1x256xi1>
    %478 = vector.broadcast %477 : vector<1x256xi1> to vector<4x256xi1>
    %479 = vector.broadcast %cst_99 : f32 to vector<4x256xf32>
    %480 = arith.select %478, %476, %479 : vector<4x256xi1>, vector<4x256xf32>
    %481 = vector.broadcast %12 : vector<4x1xf32> to vector<4x256xf32>
    %482 = arith.mulf %480, %481 : vector<4x256xf32>
    %483 = arith.addf %475, %482 : vector<4x256xf32>
    %484 = vector.extract_strided_slice %442 {offsets = [0, 32], sizes = [4, 256], strides = [1, 1]} : vector<4x290xf32> to vector<4x256xf32>
    %cst_100 = arith.constant 0.000000e+00 : f32
    %485 = vector.shape_cast %34 : vector<1x256xi1> to vector<1x256xi1>
    %486 = vector.broadcast %485 : vector<1x256xi1> to vector<4x256xi1>
    %487 = vector.broadcast %cst_100 : f32 to vector<4x256xf32>
    %488 = arith.select %486, %484, %487 : vector<4x256xi1>, vector<4x256xf32>
    %489 = vector.broadcast %13 : vector<4x1xf32> to vector<4x256xf32>
    %490 = arith.mulf %488, %489 : vector<4x256xf32>
    %491 = arith.addf %483, %490 : vector<4x256xf32>
    %492 = vector.extract_strided_slice %442 {offsets = [0, 33], sizes = [4, 256], strides = [1, 1]} : vector<4x290xf32> to vector<4x256xf32>
    %493 = vector.broadcast %14 : vector<4x1xf32> to vector<4x256xf32>
    %494 = arith.mulf %492, %493 : vector<4x256xf32>
    %495 = arith.addf %491, %494 : vector<4x256xf32>
    %496 = vector.extract_strided_slice %442 {offsets = [0, 34], sizes = [4, 256], strides = [1, 1]} : vector<4x290xf32> to vector<4x256xf32>
    %cst_101 = arith.constant 0.000000e+00 : f32
    %497 = vector.shape_cast %36 : vector<1x256xi1> to vector<1x256xi1>
    %498 = vector.broadcast %497 : vector<1x256xi1> to vector<4x256xi1>
    %499 = vector.broadcast %cst_101 : f32 to vector<4x256xf32>
    %500 = arith.select %498, %496, %499 : vector<4x256xi1>, vector<4x256xf32>
    %501 = vector.broadcast %15 : vector<4x1xf32> to vector<4x256xf32>
    %502 = arith.mulf %500, %501 : vector<4x256xf32>
    %503 = arith.addf %495, %502 : vector<4x256xf32>
    %504 = arith.subf %503, %44 : vector<4x256xf32>
    %cst_102 = arith.constant dense<0.000000e+00> : vector<64x256xf32>
    %505 = tpu.matmul %1, %504, %cst_102 {dimension_numbers = #tpu.dot_dimension_numbers<[1], [0], [0], [1], [0, 0, 1, 1], [], []>} : vector<64x4xf32>, vector<4x256xf32>, vector<64x256xf32> -> vector<64x256xf32>
    %506 = vector.broadcast %4 : vector<64x1xf32> to vector<64x256xf32>
    %507 = arith.mulf %505, %506 : vector<64x256xf32>
    %508 = vector.broadcast %5 : vector<64x1xf32> to vector<64x256xf32>
    %509 = arith.addf %507, %508 : vector<64x256xf32>
    %c5_103 = arith.constant 5 : index
    %c0_104 = arith.constant 0 : index
    %c0_105 = arith.constant 0 : index
    %510 = vector.load %arg9[%c5_103, %c0_104, %c0_105] : memref<8x64x256xf32, #tpu.memory_space<vmem>>, vector<1x64x256xf32>
    %511 = vector.shape_cast %510 : vector<1x64x256xf32> to vector<64x256xf32>
    %512 = vector.shape_cast %509 : vector<64x256xf32> to vector<1x64x256xf32>
    tpu.vector_store %arg9[%c5_103, %c0_104, %c0_105], %512 {strides = array<i32>} : memref<8x64x256xf32, #tpu.memory_space<vmem>>, vector<1x64x256xf32>,
    %c6 = arith.constant 6 : index
    %c0_106 = arith.constant 0 : index
    %c0_107 = arith.constant 0 : index
    %513 = vector.load %arg1[%c6, %c0_106, %c0_107] : memref<8x64x256xf32, #tpu.memory_space<vmem>>, vector<1x64x256xf32>
    %514 = vector.shape_cast %513 : vector<1x64x256xf32> to vector<64x256xf32>
    %cst_108 = arith.constant dense<0.000000e+00> : vector<4x256xf32>
    %515 = tpu.matmul %0, %514, %cst_108 {dimension_numbers = #tpu.dot_dimension_numbers<[1], [0], [0], [1], [0, 0, 1, 1], [], []>} : vector<4x64xf32>, vector<64x256xf32>, vector<4x256xf32> -> vector<4x256xf32>
    %516 = vector.broadcast %2 : vector<4x1xf32> to vector<4x256xf32>
    %517 = arith.mulf %515, %516 : vector<4x256xf32>
    %518 = vector.broadcast %3 : vector<4x1xf32> to vector<4x256xf32>
    %519 = arith.addf %517, %518 : vector<4x256xf32>
    %520 = tpu.concatenate %37, %519, %37 in 1 : vector<4x17xf32>, vector<4x256xf32>, vector<4x17xf32> -> vector<4x290xf32>
    %cst_109 = arith.constant 0.000000e+00 : f32
    %521 = vector.broadcast %cst_109 : f32 to vector<4x256xf32>
    %522 = vector.extract_strided_slice %520 {offsets = [0, 0], sizes = [4, 256], strides = [1, 1]} : vector<4x290xf32> to vector<4x256xf32>
    %cst_110 = arith.constant 0.000000e+00 : f32
    %523 = vector.shape_cast %34 : vector<1x256xi1> to vector<1x256xi1>
    %524 = vector.broadcast %523 : vector<1x256xi1> to vector<4x256xi1>
    %525 = vector.broadcast %cst_110 : f32 to vector<4x256xf32>
    %526 = arith.select %524, %522, %525 : vector<4x256xi1>, vector<4x256xf32>
    %527 = vector.broadcast %7 : vector<4x1xf32> to vector<4x256xf32>
    %528 = arith.mulf %526, %527 : vector<4x256xf32>
    %529 = arith.addf %521, %528 : vector<4x256xf32>
    %530 = vector.extract_strided_slice %520 {offsets = [0, 1], sizes = [4, 256], strides = [1, 1]} : vector<4x290xf32> to vector<4x256xf32>
    %531 = vector.broadcast %8 : vector<4x1xf32> to vector<4x256xf32>
    %532 = arith.mulf %530, %531 : vector<4x256xf32>
    %533 = arith.addf %529, %532 : vector<4x256xf32>
    %534 = vector.extract_strided_slice %520 {offsets = [0, 2], sizes = [4, 256], strides = [1, 1]} : vector<4x290xf32> to vector<4x256xf32>
    %cst_111 = arith.constant 0.000000e+00 : f32
    %535 = vector.shape_cast %36 : vector<1x256xi1> to vector<1x256xi1>
    %536 = vector.broadcast %535 : vector<1x256xi1> to vector<4x256xi1>
    %537 = vector.broadcast %cst_111 : f32 to vector<4x256xf32>
    %538 = arith.select %536, %534, %537 : vector<4x256xi1>, vector<4x256xf32>
    %539 = vector.broadcast %9 : vector<4x1xf32> to vector<4x256xf32>
    %540 = arith.mulf %538, %539 : vector<4x256xf32>
    %541 = arith.addf %533, %540 : vector<4x256xf32>
    %542 = vector.extract_strided_slice %520 {offsets = [0, 16], sizes = [4, 256], strides = [1, 1]} : vector<4x290xf32> to vector<4x256xf32>
    %cst_112 = arith.constant 0.000000e+00 : f32
    %543 = vector.shape_cast %34 : vector<1x256xi1> to vector<1x256xi1>
    %544 = vector.broadcast %543 : vector<1x256xi1> to vector<4x256xi1>
    %545 = vector.broadcast %cst_112 : f32 to vector<4x256xf32>
    %546 = arith.select %544, %542, %545 : vector<4x256xi1>, vector<4x256xf32>
    %547 = vector.broadcast %10 : vector<4x1xf32> to vector<4x256xf32>
    %548 = arith.mulf %546, %547 : vector<4x256xf32>
    %549 = arith.addf %541, %548 : vector<4x256xf32>
    %550 = vector.extract_strided_slice %520 {offsets = [0, 17], sizes = [4, 256], strides = [1, 1]} : vector<4x290xf32> to vector<4x256xf32>
    %551 = vector.broadcast %11 : vector<4x1xf32> to vector<4x256xf32>
    %552 = arith.mulf %550, %551 : vector<4x256xf32>
    %553 = arith.addf %549, %552 : vector<4x256xf32>
    %554 = vector.extract_strided_slice %520 {offsets = [0, 18], sizes = [4, 256], strides = [1, 1]} : vector<4x290xf32> to vector<4x256xf32>
    %cst_113 = arith.constant 0.000000e+00 : f32
    %555 = vector.shape_cast %36 : vector<1x256xi1> to vector<1x256xi1>
    %556 = vector.broadcast %555 : vector<1x256xi1> to vector<4x256xi1>
    %557 = vector.broadcast %cst_113 : f32 to vector<4x256xf32>
    %558 = arith.select %556, %554, %557 : vector<4x256xi1>, vector<4x256xf32>
    %559 = vector.broadcast %12 : vector<4x1xf32> to vector<4x256xf32>
    %560 = arith.mulf %558, %559 : vector<4x256xf32>
    %561 = arith.addf %553, %560 : vector<4x256xf32>
    %562 = vector.extract_strided_slice %520 {offsets = [0, 32], sizes = [4, 256], strides = [1, 1]} : vector<4x290xf32> to vector<4x256xf32>
    %cst_114 = arith.constant 0.000000e+00 : f32
    %563 = vector.shape_cast %34 : vector<1x256xi1> to vector<1x256xi1>
    %564 = vector.broadcast %563 : vector<1x256xi1> to vector<4x256xi1>
    %565 = vector.broadcast %cst_114 : f32 to vector<4x256xf32>
    %566 = arith.select %564, %562, %565 : vector<4x256xi1>, vector<4x256xf32>
    %567 = vector.broadcast %13 : vector<4x1xf32> to vector<4x256xf32>
    %568 = arith.mulf %566, %567 : vector<4x256xf32>
    %569 = arith.addf %561, %568 : vector<4x256xf32>
    %570 = vector.extract_strided_slice %520 {offsets = [0, 33], sizes = [4, 256], strides = [1, 1]} : vector<4x290xf32> to vector<4x256xf32>
    %571 = vector.broadcast %14 : vector<4x1xf32> to vector<4x256xf32>
    %572 = arith.mulf %570, %571 : vector<4x256xf32>
    %573 = arith.addf %569, %572 : vector<4x256xf32>
    %574 = vector.extract_strided_slice %520 {offsets = [0, 34], sizes = [4, 256], strides = [1, 1]} : vector<4x290xf32> to vector<4x256xf32>
    %cst_115 = arith.constant 0.000000e+00 : f32
    %575 = vector.shape_cast %36 : vector<1x256xi1> to vector<1x256xi1>
    %576 = vector.broadcast %575 : vector<1x256xi1> to vector<4x256xi1>
    %577 = vector.broadcast %cst_115 : f32 to vector<4x256xf32>
    %578 = arith.select %576, %574, %577 : vector<4x256xi1>, vector<4x256xf32>
    %579 = vector.broadcast %15 : vector<4x1xf32> to vector<4x256xf32>
    %580 = arith.mulf %578, %579 : vector<4x256xf32>
    %581 = arith.addf %573, %580 : vector<4x256xf32>
    %582 = arith.subf %581, %44 : vector<4x256xf32>
    %cst_116 = arith.constant dense<0.000000e+00> : vector<64x256xf32>
    %583 = tpu.matmul %1, %582, %cst_116 {dimension_numbers = #tpu.dot_dimension_numbers<[1], [0], [0], [1], [0, 0, 1, 1], [], []>} : vector<64x4xf32>, vector<4x256xf32>, vector<64x256xf32> -> vector<64x256xf32>
    %584 = vector.broadcast %4 : vector<64x1xf32> to vector<64x256xf32>
    %585 = arith.mulf %583, %584 : vector<64x256xf32>
    %586 = vector.broadcast %5 : vector<64x1xf32> to vector<64x256xf32>
    %587 = arith.addf %585, %586 : vector<64x256xf32>
    %c6_117 = arith.constant 6 : index
    %c0_118 = arith.constant 0 : index
    %c0_119 = arith.constant 0 : index
    %588 = vector.load %arg9[%c6_117, %c0_118, %c0_119] : memref<8x64x256xf32, #tpu.memory_space<vmem>>, vector<1x64x256xf32>
    %589 = vector.shape_cast %588 : vector<1x64x256xf32> to vector<64x256xf32>
    %590 = vector.shape_cast %587 : vector<64x256xf32> to vector<1x64x256xf32>
    tpu.vector_store %arg9[%c6_117, %c0_118, %c0_119], %590 {strides = array<i32>} : memref<8x64x256xf32, #tpu.memory_space<vmem>>, vector<1x64x256xf32>,
    %c7 = arith.constant 7 : index
    %c0_120 = arith.constant 0 : index
    %c0_121 = arith.constant 0 : index
    %591 = vector.load %arg1[%c7, %c0_120, %c0_121] : memref<8x64x256xf32, #tpu.memory_space<vmem>>, vector<1x64x256xf32>
    %592 = vector.shape_cast %591 : vector<1x64x256xf32> to vector<64x256xf32>
    %cst_122 = arith.constant dense<0.000000e+00> : vector<4x256xf32>
    %593 = tpu.matmul %0, %592, %cst_122 {dimension_numbers = #tpu.dot_dimension_numbers<[1], [0], [0], [1], [0, 0, 1, 1], [], []>} : vector<4x64xf32>, vector<64x256xf32>, vector<4x256xf32> -> vector<4x256xf32>
    %594 = vector.broadcast %2 : vector<4x1xf32> to vector<4x256xf32>
    %595 = arith.mulf %593, %594 : vector<4x256xf32>
    %596 = vector.broadcast %3 : vector<4x1xf32> to vector<4x256xf32>
    %597 = arith.addf %595, %596 : vector<4x256xf32>
    %598 = tpu.concatenate %37, %597, %37 in 1 : vector<4x17xf32>, vector<4x256xf32>, vector<4x17xf32> -> vector<4x290xf32>
    %cst_123 = arith.constant 0.000000e+00 : f32
    %599 = vector.broadcast %cst_123 : f32 to vector<4x256xf32>
    %600 = vector.extract_strided_slice %598 {offsets = [0, 0], sizes = [4, 256], strides = [1, 1]} : vector<4x290xf32> to vector<4x256xf32>
    %cst_124 = arith.constant 0.000000e+00 : f32
    %601 = vector.shape_cast %34 : vector<1x256xi1> to vector<1x256xi1>
    %602 = vector.broadcast %601 : vector<1x256xi1> to vector<4x256xi1>
    %603 = vector.broadcast %cst_124 : f32 to vector<4x256xf32>
    %604 = arith.select %602, %600, %603 : vector<4x256xi1>, vector<4x256xf32>
    %605 = vector.broadcast %7 : vector<4x1xf32> to vector<4x256xf32>
    %606 = arith.mulf %604, %605 : vector<4x256xf32>
    %607 = arith.addf %599, %606 : vector<4x256xf32>
    %608 = vector.extract_strided_slice %598 {offsets = [0, 1], sizes = [4, 256], strides = [1, 1]} : vector<4x290xf32> to vector<4x256xf32>
    %609 = vector.broadcast %8 : vector<4x1xf32> to vector<4x256xf32>
    %610 = arith.mulf %608, %609 : vector<4x256xf32>
    %611 = arith.addf %607, %610 : vector<4x256xf32>
    %612 = vector.extract_strided_slice %598 {offsets = [0, 2], sizes = [4, 256], strides = [1, 1]} : vector<4x290xf32> to vector<4x256xf32>
    %cst_125 = arith.constant 0.000000e+00 : f32
    %613 = vector.shape_cast %36 : vector<1x256xi1> to vector<1x256xi1>
    %614 = vector.broadcast %613 : vector<1x256xi1> to vector<4x256xi1>
    %615 = vector.broadcast %cst_125 : f32 to vector<4x256xf32>
    %616 = arith.select %614, %612, %615 : vector<4x256xi1>, vector<4x256xf32>
    %617 = vector.broadcast %9 : vector<4x1xf32> to vector<4x256xf32>
    %618 = arith.mulf %616, %617 : vector<4x256xf32>
    %619 = arith.addf %611, %618 : vector<4x256xf32>
    %620 = vector.extract_strided_slice %598 {offsets = [0, 16], sizes = [4, 256], strides = [1, 1]} : vector<4x290xf32> to vector<4x256xf32>
    %cst_126 = arith.constant 0.000000e+00 : f32
    %621 = vector.shape_cast %34 : vector<1x256xi1> to vector<1x256xi1>
    %622 = vector.broadcast %621 : vector<1x256xi1> to vector<4x256xi1>
    %623 = vector.broadcast %cst_126 : f32 to vector<4x256xf32>
    %624 = arith.select %622, %620, %623 : vector<4x256xi1>, vector<4x256xf32>
    %625 = vector.broadcast %10 : vector<4x1xf32> to vector<4x256xf32>
    %626 = arith.mulf %624, %625 : vector<4x256xf32>
    %627 = arith.addf %619, %626 : vector<4x256xf32>
    %628 = vector.extract_strided_slice %598 {offsets = [0, 17], sizes = [4, 256], strides = [1, 1]} : vector<4x290xf32> to vector<4x256xf32>
    %629 = vector.broadcast %11 : vector<4x1xf32> to vector<4x256xf32>
    %630 = arith.mulf %628, %629 : vector<4x256xf32>
    %631 = arith.addf %627, %630 : vector<4x256xf32>
    %632 = vector.extract_strided_slice %598 {offsets = [0, 18], sizes = [4, 256], strides = [1, 1]} : vector<4x290xf32> to vector<4x256xf32>
    %cst_127 = arith.constant 0.000000e+00 : f32
    %633 = vector.shape_cast %36 : vector<1x256xi1> to vector<1x256xi1>
    %634 = vector.broadcast %633 : vector<1x256xi1> to vector<4x256xi1>
    %635 = vector.broadcast %cst_127 : f32 to vector<4x256xf32>
    %636 = arith.select %634, %632, %635 : vector<4x256xi1>, vector<4x256xf32>
    %637 = vector.broadcast %12 : vector<4x1xf32> to vector<4x256xf32>
    %638 = arith.mulf %636, %637 : vector<4x256xf32>
    %639 = arith.addf %631, %638 : vector<4x256xf32>
    %640 = vector.extract_strided_slice %598 {offsets = [0, 32], sizes = [4, 256], strides = [1, 1]} : vector<4x290xf32> to vector<4x256xf32>
    %cst_128 = arith.constant 0.000000e+00 : f32
    %641 = vector.shape_cast %34 : vector<1x256xi1> to vector<1x256xi1>
    %642 = vector.broadcast %641 : vector<1x256xi1> to vector<4x256xi1>
    %643 = vector.broadcast %cst_128 : f32 to vector<4x256xf32>
    %644 = arith.select %642, %640, %643 : vector<4x256xi1>, vector<4x256xf32>
    %645 = vector.broadcast %13 : vector<4x1xf32> to vector<4x256xf32>
    %646 = arith.mulf %644, %645 : vector<4x256xf32>
    %647 = arith.addf %639, %646 : vector<4x256xf32>
    %648 = vector.extract_strided_slice %598 {offsets = [0, 33], sizes = [4, 256], strides = [1, 1]} : vector<4x290xf32> to vector<4x256xf32>
    %649 = vector.broadcast %14 : vector<4x1xf32> to vector<4x256xf32>
    %650 = arith.mulf %648, %649 : vector<4x256xf32>
    %651 = arith.addf %647, %650 : vector<4x256xf32>
    %652 = vector.extract_strided_slice %598 {offsets = [0, 34], sizes = [4, 256], strides = [1, 1]} : vector<4x290xf32> to vector<4x256xf32>
    %cst_129 = arith.constant 0.000000e+00 : f32
    %653 = vector.shape_cast %36 : vector<1x256xi1> to vector<1x256xi1>
    %654 = vector.broadcast %653 : vector<1x256xi1> to vector<4x256xi1>
    %655 = vector.broadcast %cst_129 : f32 to vector<4x256xf32>
    %656 = arith.select %654, %652, %655 : vector<4x256xi1>, vector<4x256xf32>
    %657 = vector.broadcast %15 : vector<4x1xf32> to vector<4x256xf32>
    %658 = arith.mulf %656, %657 : vector<4x256xf32>
    %659 = arith.addf %651, %658 : vector<4x256xf32>
    %660 = arith.subf %659, %44 : vector<4x256xf32>
    %cst_130 = arith.constant dense<0.000000e+00> : vector<64x256xf32>
    %661 = tpu.matmul %1, %660, %cst_130 {dimension_numbers = #tpu.dot_dimension_numbers<[1], [0], [0], [1], [0, 0, 1, 1], [], []>} : vector<64x4xf32>, vector<4x256xf32>, vector<64x256xf32> -> vector<64x256xf32>
    %662 = vector.broadcast %4 : vector<64x1xf32> to vector<64x256xf32>
    %663 = arith.mulf %661, %662 : vector<64x256xf32>
    %664 = vector.broadcast %5 : vector<64x1xf32> to vector<64x256xf32>
    %665 = arith.addf %663, %664 : vector<64x256xf32>
    %c7_131 = arith.constant 7 : index
    %c0_132 = arith.constant 0 : index
    %c0_133 = arith.constant 0 : index
    %666 = vector.load %arg9[%c7_131, %c0_132, %c0_133] : memref<8x64x256xf32, #tpu.memory_space<vmem>>, vector<1x64x256xf32>
    %667 = vector.shape_cast %666 : vector<1x64x256xf32> to vector<64x256xf32>
    %668 = vector.shape_cast %665 : vector<64x256xf32> to vector<1x64x256xf32>
    tpu.vector_store %arg9[%c7_131, %c0_132, %c0_133], %668 {strides = array<i32>} : memref<8x64x256xf32, #tpu.memory_space<vmem>>, vector<1x64x256xf32>,
    return
  }
  func.func @transform_0(%arg0: i32) -> (i32, i32, i32) {
    %c0_i32 = arith.constant 0 : i32
    %c0_i32_0 = arith.constant 0 : i32
    %c0_i32_1 = arith.constant 0 : i32
    return %arg0, %c0_i32, %c0_i32_0 : i32, i32, i32
  }
  func.func @transform_1(%arg0: i32) -> (i32, i32) {
    %c0_i32 = arith.constant 0 : i32
    %c0_i32_0 = arith.constant 0 : i32
    %c0_i32_1 = arith.constant 0 : i32
    return %c0_i32, %c0_i32_0 : i32, i32
  }
  func.func @transform_2(%arg0: i32) -> (i32, i32) {
    %c0_i32 = arith.constant 0 : i32
    %c0_i32_0 = arith.constant 0 : i32
    %c0_i32_1 = arith.constant 0 : i32
    return %c0_i32, %c0_i32_0 : i32, i32
  }
  func.func @transform_3(%arg0: i32) -> (i32, i32) {
    %c0_i32 = arith.constant 0 : i32
    %c0_i32_0 = arith.constant 0 : i32
    %c0_i32_1 = arith.constant 0 : i32
    return %c0_i32, %c0_i32_0 : i32, i32
  }
  func.func @transform_4(%arg0: i32) -> (i32, i32) {
    %c0_i32 = arith.constant 0 : i32
    %c0_i32_0 = arith.constant 0 : i32
    %c0_i32_1 = arith.constant 0 : i32
    return %c0_i32, %c0_i32_0 : i32, i32
  }
  func.func @transform_5(%arg0: i32) -> (i32, i32) {
    %c0_i32 = arith.constant 0 : i32
    %c0_i32_0 = arith.constant 0 : i32
    %c0_i32_1 = arith.constant 0 : i32
    return %c0_i32, %c0_i32_0 : i32, i32
  }
  func.func @transform_6(%arg0: i32) -> (i32, i32) {
    %c0_i32 = arith.constant 0 : i32
    %c0_i32_0 = arith.constant 0 : i32
    %c0_i32_1 = arith.constant 0 : i32
    return %c0_i32, %c0_i32_0 : i32, i32
  }
  func.func @transform_7(%arg0: i32) -> (i32, i32) {
    %c0_i32 = arith.constant 0 : i32
    %c0_i32_0 = arith.constant 0 : i32
    %c0_i32_1 = arith.constant 0 : i32
    return %c0_i32, %c0_i32_0 : i32, i32
  }
  func.func @transform_8(%arg0: i32) -> (i32, i32, i32) {
    %c0_i32 = arith.constant 0 : i32
    %c0_i32_0 = arith.constant 0 : i32
    %c0_i32_1 = arith.constant 0 : i32
    return %arg0, %c0_i32, %c0_i32_0 : i32, i32, i32
  }
}

</mosaic_0001>

<bundles_post_ra>
// kernel: me_module_forward.1
= control target key start
LH: loop header
LB: loop body
LE: loop exit
PB: predicated region body
PF: predicated region fallthrough
CT: control target
= control target key end

     0   :  { %s4637_s27 = smov 0   ;;  %s7208_s0 = inlined_call_operand.vmem [shape: f32[32,64,256], index: 0, kind: input, shape index: {}]   ;;  %s7209_s1 = inlined_call_operand.vmem [shape: f32[4,64], index: 1, kind: input, shape index: {}]   ;;  %s7210_s2 = inlined_call_operand.vmem [shape: f32[4,1], index: 2, kind: input, shape index: {}]   ;;  %s7211_s3 = inlined_call_operand.vmem [shape: f32[4,1], index: 3, kind: input, shape index: {}]   ;;  %s7212_s4 = inlined_call_operand.vmem [shape: f32[4,9], index: 4, kind: input, shape index: {}]   ;;  %s7213_s5 = inlined_call_operand.vmem [shape: f32[64,4], index: 5, kind: input, shape index: {}]   ;;  %s7214_s6 = inlined_call_operand.vmem [shape: f32[64,1], index: 6, kind: input, shape index: {}]   ;;  %s7215_s7 = inlined_call_operand.vmem [shape: f32[64,1], index: 7, kind: input, shape index: {}]   ;;  %s7216_s8 = inlined_call_operand.vmem [shape: f32[32,64,256], index: 8, kind: output, shape index: {}]  }
   0x1 LB: > { %s4022_s28 = sadd.s32 4294967295, %s4571_s27   ;;  %p4026_p0 = scmp.ge.s32.totalorder %s4571_s27, 1  ;;  %s4571_s27 = sphi %s4637_s27, %s18_s27  }
   0x2   : > { %p264_p1 = scmp.lt.s32.totalorder %s4571_s27, 5 }
   0x4   : > { %p265_p2 = pnand %p4026_p0, %p264_p1 }
   0x6   : > { %268 = sbr.rel (%p265_p2) target bundleno = 2434 (0x982), region = 52 }
   0xd   : > { %s4027_s29 = sshll.u32 %s4022_s28, 3  ;;  %v7217_v0 = vmov 0.0   ;;  %v323_v1 = vld [vmem:[%s7210_s2] sm:$0xf]  ;;  %v4574_v2 = vmov 0   ;;  %v4575_v3 = vmov 1  }
   0xe   : > { %p301_p3 = scmp.lt.s32.totalorder %s4027_s29, 31  ;;  %458 = vmatprep.mubr.f32.mxu0 %v7217_v0  ;;  %559 = vmatprep.mubr.f32.mxu1 %v7217_v0  ;;  %v4654_v4 = vld [vmem:[%s7212_s4] sm:$0xf]  ;;  %v4576_v9 = vmov 4   ;;  %v4577_v32 = vmov 2   ;;  %v4578_v42 = vmov 7  }
   0xf   : > { %4539 = vset.pattern.permute.xlu0 %v4574_v2  ;;  %4540 = vset.pattern.permute.xlu1 %v4575_v3  ;;  %v324_v5 = vld [vmem:[%s7211_s3] sm:$0xf]  ;;  %v4579_v57 = vmov 3   ;;  %v4580_v63 = vmov 6   ;;  %vm390_vm0 = vcmask 523264   ;;  %s4583_s20 = smov 17  }
  0x10   : > { %s7451_s29 = smov (!%p301_p3, %s4027_s29), 31  ;;  %467 = vperm.xlu0 %4539, %v323_v1   ;;  %599 = vperm.xlu1 %4540, %v4654_v4   ;;  %vm576_vm1 = vcmask 138240   ;;  %s4584_s21 = smov 112   ;;  %vm633_vm3 = vcmask 1031168   ;;  %vm654_vm5 = vcmask 916480   ;;  %vm698_vm8 = vcmask 900096  }
  0x11   : > { %s4364_s14 = sshll.u32 %s7451_s29, 7  ;;  %s4585_s22 = smov 126   ;;  %vm614_vm9 = vcmask 1039360   ;;  %vm719_vm10 = vcmask 785408   ;;  %vm685_vm11 = vcmask 908288   ;;  %vm763_vm12 = vcmask 769024  }
  0x12   : > { %s4668_s17 = scalar_lea.vmem %s7208_s0, %s4364_s14  ;;  %s4586_s23 = smov 96   ;;  %vm750_vm13 = vcmask 777216   ;;  %vm805_vm14 = vcmask 1043456   ;;  %vm780_vm15 = vcmask 31744  }
  0x13   : > { %v4034_v6 = vld [vmem:[%s4668_s17 + $0x208] sm:$0xff]  ;;  %v4036_v7 = vld [vmem:[%s4668_s17 + $0x218] sm:$0xff]  ;;  %v4033_v12 = vld [vmem:[%s4668_s17 + $0x200] sm:$0xff]  ;;  %s4587_s24 = smov 110   ;;  %s4588_s25 = smov 94  }
  0x14   : > { %v480_v8 = vld [vmem:[%s4668_s17 + $0x8] sm:$0xff]  ;;  %474 = vperm.xlu0 %4539, %v324_v5   ;;  %4541 = vset.pattern.permute.xlu1 %v4576_v9  ;;  %v4366_v10 = vpack.c.bf16 %v4036_v7, %v4034_v6  ;;  %v482_v11 = vld [vmem:[%s4668_s17 + $0x18] sm:$0xff]  ;;  %v4035_v13 = vld [vmem:[%s4668_s17 + $0x210] sm:$0xff]  ;;  %v4581_v6 = vmov 5   ;;  %s4589_s26 = smov 127   ;;  %s4590_s28 = smov 95  }
  0x15   : > { %670 = vperm.xlu1 %4541, %v4654_v4   ;;  %v4382_v14 = vpack.c.bf16 %v482_v11, %v480_v8  ;;  %v4368_v15 = vpack.c.bf16 %v4035_v13, %v4033_v12  ;;  %v479_v16 = vld [vmem:[%s4668_s17] sm:$0xff]  ;;  %v481_v17 = vld [vmem:[%s4668_s17 + $0x10] sm:$0xff]  ;;  %v4038_v18 = vld [vmem:[%s4668_s17 + $0x228] sm:$0xff]  ;;  %s4591_s30 = smov 111  }
  0x16   : > { %4367 = vmatprep.subr.bf16.mxu0 %v4366_v10  ;;  %v4384_v19 = vpack.c.bf16 %v481_v17, %v479_v16  ;;  %v4040_v20 = vld [vmem:[%s4668_s17 + $0x238] sm:$0xff]  ;;  %v484_v21 = vld [vmem:[%s4668_s17 + $0x28] sm:$0xff]  ;;  %v4037_v25 = vld [vmem:[%s4668_s17 + $0x220] sm:$0xff]  ;;  %v4582_v17 = vmov 8  }
  0x17   : > { %v486_v22 = vld [vmem:[%s4668_s17 + $0x38] sm:$0xff]  ;;  %4383 = vmatprep.subr.bf16.mxu1 %v4382_v14  ;;  %4369 = vmatpush1.bf16.msra.mxu0 %v4368_v15  ;;  %v4370_v23 = vpack.c.bf16 %v4040_v20, %v4038_v18  ;;  %v4039_v26 = vld [vmem:[%s4668_s17 + $0x230] sm:$0xff]  ;;  %v483_v27 = vld [vmem:[%s4668_s17 + $0x20] sm:$0xff] }
  0x18   : > { %v4386_v24 = vpack.c.bf16 %v486_v22, %v484_v21  ;;  %4385 = vmatpush1.bf16.msra.mxu1 %v4384_v19  ;;  %v4372_v28 = vpack.c.bf16 %v4039_v26, %v4037_v25  ;;  %v485_v29 = vld [vmem:[%s4668_s17 + $0x30] sm:$0xff]  ;;  %v4042_v30 = vld [vmem:[%s4668_s17 + $0x248] sm:$0xff]  ;;  %v4044_v31 = vld [vmem:[%s4668_s17 + $0x258] sm:$0xff]  ;;  %4542 = vset.pattern.permute.xlu0 %v4578_v42 }
  0x19   : > { %4543 = vset.pattern.permute.xlu1 %v4577_v32  ;;  %4371 = vmatprep.subr.bf16.mxu0 %v4370_v23  ;;  %v4388_v33 = vpack.c.bf16 %v485_v29, %v483_v27  ;;  %v4374_v34 = vpack.c.bf16 %v4044_v31, %v4042_v30  ;;  %v488_v35 = vld [vmem:[%s4668_s17 + $0x48] sm:$0xff]  ;;  %v490_v36 = vld [vmem:[%s4668_s17 + $0x58] sm:$0xff]  ;;  %v4041_v37 = vld [vmem:[%s4668_s17 + $0x240] sm:$0xff] }
  0x1a   : > { %4387 = vmatprep.subr.bf16.mxu1 %v4386_v24  ;;  %v4390_v38 = vpack.c.bf16 %v490_v36, %v488_v35  ;;  %v4043_v39 = vld [vmem:[%s4668_s17 + $0x250] sm:$0xff]  ;;  %v487_v40 = vld [vmem:[%s4668_s17 + $0x40] sm:$0xff]  ;;  %641 = vperm.xlu1 %4543, %v4654_v4   ;;  %v4046_v44 = vld [vmem:[%s4668_s17 + $0x268] sm:$0xff] }
  0x1b   : > { %v489_v41 = vld [vmem:[%s4668_s17 + $0x50] sm:$0xff]  ;;  %4373 = vmatpush1.bf16.msra.mxu0 %v4372_v28  ;;  %v4376_v43 = vpack.c.bf16 %v4043_v39, %v4041_v37  ;;  %v4048_v45 = vld [vmem:[%s4668_s17 + $0x278] sm:$0xff]  ;;  %v492_v46 = vld [vmem:[%s4668_s17 + $0x68] sm:$0xff]  ;;  %735 = vperm.xlu0 %4542, %v4654_v4  }
  0x1c   : > { %4389 = vmatpush1.bf16.msra.mxu1 %v4388_v33  ;;  %4375 = vmatprep.subr.bf16.mxu0 %v4374_v34  ;;  %v4392_v47 = vpack.c.bf16 %v489_v41, %v487_v40  ;;  %v4378_v48 = vpack.c.bf16 %v4048_v45, %v4046_v44  ;;  %v494_v49 = vld [vmem:[%s4668_s17 + $0x78] sm:$0xff]  ;;  %v4045_v50 = vld [vmem:[%s4668_s17 + $0x260] sm:$0xff]  ;;  %v4047_v51 = vld [vmem:[%s4668_s17 + $0x270] sm:$0xff] }
  0x1d   : > { %4391 = vmatprep.subr.bf16.mxu1 %v4390_v38  ;;  %v4394_v52 = vpack.c.bf16 %v494_v49, %v492_v46  ;;  %v491_v53 = vld [vmem:[%s4668_s17 + $0x60] sm:$0xff]  ;;  %v493_v54 = vld [vmem:[%s4668_s17 + $0x70] sm:$0xff]  ;;  %v4062_v55 = vld [vmem:[%s4668_s17 + $0x88] sm:$0xff]  ;;  %v4380_v58 = vpack.c.bf16 %v4047_v51, %v4045_v50 }
  0x1e   : > { %v4064_v56 = vld [vmem:[%s4668_s17 + $0x98] sm:$0xff]  ;;  %4544 = vset.pattern.permute.xlu1 %v4579_v57  ;;  %v4396_v59 = vpack.c.bf16 %v493_v54, %v491_v53  ;;  %v4061_v61 = vld [vmem:[%s4668_s17 + $0x80] sm:$0xff]  ;;  %v4063_v62 = vld [vmem:[%s4668_s17 + $0x90] sm:$0xff] }
  0x1f   : > { %4377 = vmatpush1.bf16.msra.mxu0 %v4376_v43  ;;  %662 = vperm.xlu1 %4544, %v4654_v4   ;;  %v4398_v60 = vpack.c.bf16 %v4064_v56, %v4062_v55  ;;  %v4066_v1 = vld [vmem:[%s4668_s17 + $0xa8] sm:$0xff]  ;;  %v4068_v3 = vld [vmem:[%s4668_s17 + $0xb8] sm:$0xff]  ;;  %v4716_v5 = vld [vmem:[%s7209_s1] sm:$0xf]  ;;  %v4400_v7 = vpack.c.bf16 %v4063_v62, %v4061_v61 }
  0x20   : > { %4393 = vmatpush1.bf16.msra.mxu1 %v4392_v47  ;;  %4379 = vmatprep.subr.bf16.mxu0 %v4378_v48  ;;  %v4402_v8 = vpack.c.bf16 %v4068_v3, %v4066_v1  ;;  %v4065_v9 = vld [vmem:[%s4668_s17 + $0xa0] sm:$0xff]  ;;  %v4067_v10 = vld [vmem:[%s4668_s17 + $0xb0] sm:$0xff]  ;;  %v4070_v11 = vld [vmem:[%s4668_s17 + $0xc8] sm:$0xff] }
  0x21   : > { %4395 = vmatprep.subr.bf16.mxu1 %v4394_v52  ;;  %4546 = vset.pattern.permute.xlu0 %v4580_v63  ;;  %v4072_v12 = vld [vmem:[%s4668_s17 + $0xd8] sm:$0xff]  ;;  %v4404_v13 = vpack.c.bf16 %v4067_v10, %v4065_v9  ;;  %v4069_v15 = vld [vmem:[%s4668_s17 + $0xc0] sm:$0xff]  ;;  %v4071_v16 = vld [vmem:[%s4668_s17 + $0xd0] sm:$0xff] }
  0x22   : > { %727 = vperm.xlu0 %4546, %v4654_v4   ;;  %v4406_v14 = vpack.c.bf16 %v4072_v12, %v4070_v11  ;;  %v4074_v18 = vld [vmem:[%s4668_s17 + $0xe8] sm:$0xff]  ;;  %v4076_v19 = vld [vmem:[%s4668_s17 + $0xf8] sm:$0xff]  ;;  %v4408_v20 = vpack.c.bf16 %v4071_v16, %v4069_v15  ;;  %v4073_v22 = vld [vmem:[%s4668_s17 + $0xe0] sm:$0xff] }
  0x23   : > { %4381 = vmatpush1.bf16.msra.mxu0 %v4380_v58  ;;  %4545 = vset.pattern.permute.xlu1 %v4581_v6  ;;  %v4410_v21 = vpack.c.bf16 %v4076_v19, %v4074_v18  ;;  %v4075_v23 = vld [vmem:[%s4668_s17 + $0xf0] sm:$0xff] }
  0x24   : > { %4397 = vmatpush1.bf16.msra.mxu1 %v4396_v59  ;;  %706 = vperm.xlu1 %4545, %v4654_v4   ;;  %v4412_v24 = vpack.c.bf16 %v4075_v23, %v4073_v22 }
  0x25   : > { %4399 = vmatprep.subr.bf16.mxu1 %v4398_v60 }
  0x26   : > { %4049 = vmatmul.mubr.msk.f32.vlgmr.msra.gmra.mrb[0].mxu0 %vm390_vm0, %v4716_v5  ;;  %4547 = vset.pattern.permute.xlu0 %v4574_v2 }
  0x27   : > { %4050 = vmatmul.mubr.msk.f32.vlgmr.msra.gmra.mrb[0].mxu1 %vm390_vm0, %v4716_v5  ;;  %591 = vperm.xlu0 %4547, %v4654_v4  }
  0x28   : > { %4401 = vmatpush1.bf16.msra.mxu1 %v4400_v7  ;;  %1134 = vmatprep.mubr.f32.mxu1 %v7217_v0 }
  0x29   : > { %4403 = vmatprep.subr.bf16.mxu1 %v4402_v8  ;;  %4548 = vset.pattern.permute.xlu1 %v4582_v17 }
  0x2a   : > { %771 = vperm.xlu1 %4548, %v4654_v4   ;;  %876 = vmatprep.mubr.f32.mxu0 %v7217_v0 }
  0x2c   : > { %4405 = vmatpush1.bf16.msra.mxu1 %v4404_v13 }
  0x2d   : > { %4407 = vmatprep.subr.bf16.mxu1 %v4406_v14 }
  0x2e   : > { %4549 = vset.pattern.permute.xlu1 %v4574_v2 }
  0x30   : > { %4409 = vmatpush1.bf16.msra.mxu1 %v4408_v20 }
  0x31   : > { %4411 = vmatprep.subr.bf16.mxu1 %v4410_v21 }
  0x34   : > { %4413 = vmatpush1.bf16.msra.mxu1 %v4412_v24  ;;  %v342_v24 = vlaneseq }
  0x37   : > { %4077 = vmatmul.mubr.msk.f32.vlgmr.msra.gmra.mrb[2].mxu1 %vm390_vm0, %v4716_v5 }
  0x38   : > { %1371 = vmatprep.mubr.f32.mxu1 %v7217_v0 }
  0x8f   : > { %v4742_v4 = vpop.permute.xlu0 %467  ;;  %v4762_v39 = vpop.permute.xlu1 %599 }
  0x93   : > { %v4749_v2 = vpop.permute.xlu0 %474 }
  0x94   : > { %v4764_v40 = vpop.permute.xlu1 %670 }
  0x99   : > { %v4766_v41 = vpop.permute.xlu1 %641 }
  0x9a   : > { %v4770_v43 = vpop.permute.xlu0 %735 }
  0x9e   : > { %v4768_v42 = vpop.permute.xlu1 %662 }
  0xa1   : > { %v4774_v45 = vpop.permute.xlu0 %727 }
  0xa3   : > { %v4772_v44 = vpop.permute.xlu1 %706 }
  0xa6   : > { %v4778_v47 = vpop.permute.xlu0 %591 }
  0xa9   : > { %v4776_v46 = vpop.permute.xlu1 %771 }
  0xf9   : > { %v4744_v25 = vpop.f32.mrb[0].mxu0 }
  0xfa   : > { %v561_v26 = vpop.f32.mrb[0].mxu1  ;;  %v4746_v27 = vpop.f32.mrb[1].mxu0 }
  0xfb   : > { %v566_v28 = vmul.f32 %v561_v26, %v4742_v4  ;;  %v563_v29 = vpop.f32.mrb[1].mxu1 }
  0xfc   : > { %v567_v30 = vmul.f32 %v563_v29, %v4742_v4  ;;  %v343_v29 = vand.u32 127, %v342_v24 }
  0xfd   : > { %v568_v31 = vadd.f32 %v566_v28, %v4749_v2 }
  0xfe   : > { %v569_v32 = vadd.f32 %v567_v30, %v4749_v2 }
  0xff   : > { %572 = vrot.lane.b32.xlu1 %v568_v31, %s4583_s20 }
 0x100   : > { %574 = vrot.lane.b32.xlu0 %v569_v32, %s4583_s20  ;;  %v344_v32 = vadd.s32 128, %v343_v29 }
 0x10a   : > { %v1136_v33 = vpop.f32.mrb[2].mxu1 }
 0x10b   : > { %v1141_v34 = vmul.f32 %v1136_v33, %v4742_v4  ;;  %v1138_v35 = vpop.f32.mrb[3].mxu1 }
 0x10c   : > { %v1142_v37 = vmul.f32 %v1138_v35, %v4742_v4  ;;  %v349_v35 = vand.u32 15, %v343_v29 }
 0x10d   : > { %v1143_v36 = vadd.f32 %v1141_v34, %v4749_v2 }
 0x10e   : > { %v1144_v38 = vadd.f32 %v1142_v37, %v4749_v2  ;;  %vm4894_vm2 = vcmp.ge.s32.totalorder %v349_v35, 1  ;;  %vm4902_vm6 = vcmp.le.s32.totalorder %v349_v35, 14 }
 0x10f   : > { %1147 = vrot.lane.b32.xlu1 %v1143_v36, %s4583_s20  ;;  %v356_v36 = vand.u32 15, %v344_v32 }
 0x111   : > { %vm4898_vm4 = vcmp.ge.s32.totalorder %v356_v36, 1  ;;  %vm4906_vm7 = vcmp.le.s32.totalorder %v356_v36, 14 }
 0x113   : > { %1149 = vrot.lane.b32.xlu1 %v1144_v38, %s4583_s20 }
 0x171   : > { %v573_v48 = vpop.permute.xlu1 %572 }
 0x172   : > { %v4781_v49 = vsel %vm576_vm1, 0.0, %v573_v48  ;;  %v575_v50 = vpop.permute.xlu0 %574 }
 0x173   : > { %648 = vrot.lane.b32.xlu1 %v4781_v49, %s4584_s21  ;;  %627 = vrot.lane.b32.xlu0 %v4781_v49, %s4585_s22  ;;  %v582_v51 = vsel %vm576_vm1, %v575_v50, 0.0  ;;  %v4796_v52 = vsel %vm576_vm1, %v573_v48, %v575_v50  ;;  %v602_v53 = vmul.f32 %v4762_v39, %v4781_v49  ;;  %v738_v54 = vmul.f32 %v4770_v43, %v4781_v49 }
 0x174   : > { %v673_v55 = vmul.f32 %v4764_v40, %v4781_v49  ;;  %v604_v56 = vmul.f32 %v4762_v39, %v582_v51  ;;  %v603_v57 = vmul.f32 %v4762_v39, %v4796_v52  ;;  %v675_v58 = vmul.f32 %v4764_v40, %v582_v51 }
 0x175   : > { %v674_v59 = vmul.f32 %v4764_v40, %v4796_v52  ;;  %v740_v60 = vmul.f32 %v4770_v43, %v582_v51  ;;  %v739_v61 = vmul.f32 %v4770_v43, %v4796_v52 }
 0x177   : > { %713 = vrot.lane.b32.xlu1 %v4781_v49, %s4586_s23  ;;  %692 = vrot.lane.b32.xlu0 %v4781_v49, %s4587_s24 }
 0x17b   : > { %757 = vrot.lane.b32.xlu0 %v4781_v49, %s4588_s25  ;;  %631 = vrot.lane.b32.xlu1 %v582_v51, %s4585_s22 }
 0x17f   : > { %650 = vrot.lane.b32.xlu1 %v4796_v52, %s4584_s21  ;;  %629 = vrot.lane.b32.xlu0 %v4796_v52, %s4585_s22 }
 0x181   : > { %v1148_v62 = vpop.permute.xlu1 %1147 }
 0x182   : > { %v4837_v63 = vsel %vm576_vm1, 0.0, %v1148_v62 }
 0x183   : > { %694 = vrot.lane.b32.xlu1 %v4796_v52, %s4587_s24  ;;  %652 = vrot.lane.b32.xlu0 %v582_v51, %s4584_s21  ;;  %v1163_v7 = vmul.f32 %v4837_v63, %v4762_v39  ;;  %v1215_v9 = vmul.f32 %v4837_v63, %v4764_v40  ;;  %v1265_v15 = vmul.f32 %v4837_v63, %v4770_v43 }
 0x185   : > { %v1150_v1 = vpop.permute.xlu1 %1149 }
 0x186   : > { %v4848_v3 = vsel %vm576_vm1, %v1148_v62, %v1150_v1  ;;  %v1156_v6 = vsel %vm576_vm1, %v1150_v1, 0.0 }
 0x187   : > { %696 = vrot.lane.b32.xlu1 %v582_v51, %s4587_s24  ;;  %717 = vrot.lane.b32.xlu0 %v582_v51, %s4586_s23  ;;  %v1165_v8 = vmul.f32 %v1156_v6, %v4762_v39  ;;  %v1164_v10 = vmul.f32 %v4848_v3, %v4762_v39  ;;  %v1216_v11 = vmul.f32 %v4848_v3, %v4764_v40 }
 0x188   : > { %v1217_v12 = vmul.f32 %v1156_v6, %v4764_v40  ;;  %v1267_v13 = vmul.f32 %v1156_v6, %v4770_v43  ;;  %v1266_v14 = vmul.f32 %v4848_v3, %v4770_v43 }
 0x18b   : > { %715 = vrot.lane.b32.xlu1 %v4796_v52, %s4586_s23  ;;  %759 = vrot.lane.b32.xlu0 %v4796_v52, %s4588_s25 }
 0x18f   : > { %761 = vrot.lane.b32.xlu1 %v582_v51, %s4588_s25  ;;  %608 = vrot.lane.b32.xlu0 %v602_v53, %s4589_s26 }
 0x193   : > { %744 = vrot.lane.b32.xlu1 %v738_v54, %s4590_s28  ;;  %679 = vrot.lane.b32.xlu0 %v673_v55, %s4591_s30 }
 0x197   : > { %612 = vrot.lane.b32.xlu1 %v604_v56, %s4589_s26  ;;  %610 = vrot.lane.b32.xlu0 %v603_v57, %s4589_s26 }
 0x19b   : > { %683 = vrot.lane.b32.xlu1 %v675_v58, %s4591_s30  ;;  %681 = vrot.lane.b32.xlu0 %v674_v59, %s4591_s30  ;;  %v587_v58 = vsel %vm4894_vm2, %v4781_v49, 0.0  ;;  %v588_v59 = vsel %vm4898_vm4, %v4796_v52, 0.0 }
 0x19c   : > { %v595_v49 = vmul.f32 %v4778_v47, %v588_v59 }
 0x19f   : > { %748 = vrot.lane.b32.xlu1 %v740_v60, %s4590_s28  ;;  %746 = vrot.lane.b32.xlu0 %v739_v61, %s4590_s28 }
 0x1a3   : > { %1233 = vrot.lane.b32.xlu1 %v4837_v63, %s4587_s24  ;;  %1183 = vrot.lane.b32.xlu0 %v4837_v63, %s4585_s22 }
 0x1a7   : > { %1249 = vrot.lane.b32.xlu1 %v4837_v63, %s4586_s23  ;;  %1199 = vrot.lane.b32.xlu0 %v4837_v63, %s4584_s21 }
 0x1ab   : > { %1187 = vrot.lane.b32.xlu1 %v1156_v6, %s4585_s22  ;;  %1185 = vrot.lane.b32.xlu0 %v4848_v3, %s4585_s22 }
 0x1af   : > { %1203 = vrot.lane.b32.xlu1 %v1156_v6, %s4584_s21  ;;  %1201 = vrot.lane.b32.xlu0 %v4848_v3, %s4584_s21 }
 0x1b3   : > { %1235 = vrot.lane.b32.xlu1 %v4848_v3, %s4587_s24  ;;  %1237 = vrot.lane.b32.xlu0 %v1156_v6, %s4587_s24 }
 0x1b7   : > { %1251 = vrot.lane.b32.xlu1 %v4848_v3, %s4586_s23  ;;  %1253 = vrot.lane.b32.xlu0 %v1156_v6, %s4586_s23 }
 0x1bb   : > { %1169 = vrot.lane.b32.xlu1 %v1163_v7, %s4589_s26  ;;  %1285 = vrot.lane.b32.xlu0 %v4848_v3, %s4588_s25 }
 0x1bf   : > { %1173 = vrot.lane.b32.xlu1 %v1165_v8, %s4589_s26  ;;  %1221 = vrot.lane.b32.xlu0 %v1215_v9, %s4591_s30 }
 0x1c3   : > { %1287 = vrot.lane.b32.xlu1 %v1156_v6, %s4588_s25  ;;  %1171 = vrot.lane.b32.xlu0 %v1164_v10, %s4589_s26  ;;  %v594_v6 = vmul.f32 %v4778_v47, %v587_v58 }
 0x1c7   : > { %1223 = vrot.lane.b32.xlu1 %v1216_v11, %s4591_s30  ;;  %1225 = vrot.lane.b32.xlu0 %v1217_v12, %s4591_s30 }
 0x1cb   : > { %1275 = vrot.lane.b32.xlu1 %v1267_v13, %s4590_s28  ;;  %1273 = vrot.lane.b32.xlu0 %v1266_v14, %s4590_s28 }
 0x1cf   : > { %1271 = vrot.lane.b32.xlu1 %v1265_v15, %s4590_s28  ;;  %1283 = vrot.lane.b32.xlu0 %v4837_v63, %s4588_s25 }
 0x1e5   : > { %v649_v16 = vpop.permute.xlu1 %648  ;;  %v628_v17 = vpop.permute.xlu0 %627 }
 0x1e9   : > { %v714_v18 = vpop.permute.xlu1 %713  ;;  %v693_v19 = vpop.permute.xlu0 %692 }
 0x1ed   : > { %v632_v20 = vpop.permute.xlu1 %631  ;;  %v4892_v21 = vpop.permute.xlu0 %757 }
 0x1f1   : > { %v651_v22 = vpop.permute.xlu1 %650  ;;  %v630_v23 = vpop.permute.xlu0 %629 }
 0x1f2   : > { %v634_v54 = vsel %vm633_vm3, %v628_v17, %v630_v23  ;;  %v635_v55 = vsel %vm633_vm3, %v630_v23, %v632_v20  ;;  %v655_v60 = vsel %vm654_vm5, %v649_v16, %v651_v22 }
 0x1f3   : > { %v638_v62 = vsel %vm4902_vm6, %v634_v54, 0.0  ;;  %v639_v1 = vsel %vm4906_vm7, %v635_v55, 0.0  ;;  %v659_v7 = vsel %vm4894_vm2, %v655_v60, 0.0 }
 0x1f4   : > { %v644_v14 = vmul.f32 %v4766_v41, %v638_v62  ;;  %v645_v15 = vmul.f32 %v4766_v41, %v639_v1 }
 0x1f5   : > { %v695_v26 = vpop.permute.xlu1 %694  ;;  %v653_v28 = vpop.permute.xlu0 %652 }
 0x1f6   : > { %v656_v61 = vsel %vm654_vm5, %v651_v22, %v653_v28  ;;  %v699_v52 = vsel %vm698_vm8, %v693_v19, %v695_v26  ;;  %v665_v19 = vmul.f32 %v4768_v42, %v659_v7 }
 0x1f7   : > { %v660_v8 = vsel %vm4898_vm4, %v656_v61, 0.0  ;;  %v703_v20 = vsel %vm4902_vm6, %v699_v52, 0.0 }
 0x1f8   : > { %v666_v22 = vmul.f32 %v4768_v42, %v660_v8  ;;  %v709_v35 = vmul.f32 %v4772_v44, %v703_v20 }
 0x1f9   : > { %v697_v30 = vpop.permute.xlu1 %696  ;;  %v718_v31 = vpop.permute.xlu0 %717 }
 0x1fa   : > { %v700_v9 = vsel %vm698_vm8, %v695_v26, %v697_v30 }
 0x1fb   : > { %v704_v23 = vsel %vm4906_vm7, %v700_v9, 0.0 }
 0x1fc   : > { %v710_v36 = vmul.f32 %v4772_v44, %v704_v23 }
 0x1fd   : > { %v716_v33 = vpop.permute.xlu1 %715  ;;  %v760_v34 = vpop.permute.xlu0 %759 }
 0x1fe   : > { %v720_v24 = vsel %vm719_vm10, %v714_v18, %v716_v33  ;;  %v721_v26 = vsel %vm719_vm10, %v716_v33, %v718_v31  ;;  %v764_v33 = vsel %vm763_vm12, %v4892_v21, %v760_v34 }
 0x1ff   : > { %v724_v55 = vsel %vm4894_vm2, %v720_v24, 0.0  ;;  %v725_v58 = vsel %vm4898_vm4, %v721_v26, 0.0  ;;  %v4104_v26 = vld [vmem:[%s4668_s17 + $0x100] sm:$0xff] }
 0x201   : > { %v762_v37 = vpop.permute.xlu1 %761  ;;  %v609_v38 = vpop.permute.xlu0 %608 }
 0x202   : > { %v765_v59 = vsel %vm763_vm12, %v760_v34, %v762_v37  ;;  %v470_v34 = vmul.f32 %v4742_v4, %v4744_v25  ;;  %v471_v37 = vmul.f32 %v4742_v4, %v4746_v27 }
 0x203   : > { %v769_v21 = vsel %vm4906_vm7, %v765_v59, 0.0  ;;  %v4113_v59 = vld [vmem:[%s4668_s17 + $0x148] sm:$0xff] }
 0x204   : > { %v775_v25 = vmul.f32 %v4776_v46, %v769_v21  ;;  %v4982_v20 = vadd.f32 %v4749_v2, %v471_v37  ;;  %v4119_v21 = vld [vmem:[%s4668_s17 + $0x178] sm:$0xff] }
 0x205   : > { %v4912_v56 = vpop.permute.xlu1 %744  ;;  %v680_v57 = vpop.permute.xlu0 %679 }
 0x209   : > { %v613_v10 = vpop.permute.xlu1 %612  ;;  %v611_v11 = vpop.permute.xlu0 %610 }
 0x20a   : > { %v615_v12 = vsel %vm614_vm9, %v609_v38, %v611_v11  ;;  %v616_v13 = vsel %vm614_vm9, %v611_v11, %v613_v10 }
 0x20b   : > { %v619_v16 = vadd.f32 %v615_v12, %v594_v6  ;;  %v620_v17 = vadd.f32 %v616_v13, %v595_v49  ;;  %v730_v6 = vmul.f32 %v4774_v45, %v724_v55  ;;  %v731_v49 = vmul.f32 %v4774_v45, %v725_v58 }
 0x20d   : > { %v646_v28 = vadd.f32 %v644_v14, %v619_v16  ;;  %v647_v29 = vadd.f32 %v645_v15, %v620_v17  ;;  %v684_v30 = vpop.permute.xlu1 %683  ;;  %v682_v32 = vpop.permute.xlu0 %681  ;;  %v4105_v16 = vld [vmem:[%s4668_s17 + $0x108] sm:$0xff]  ;;  %v4107_v17 = vld [vmem:[%s4668_s17 + $0x118] sm:$0xff] }
 0x20e   : > { %v686_v18 = vsel %vm685_vm11, %v680_v57, %v682_v32  ;;  %v687_v31 = vsel %vm685_vm11, %v682_v32, %v684_v30  ;;  %v768_v57 = vsel %vm4902_vm6, %v764_v33, 0.0  ;;  %v4111_v30 = vld [vmem:[%s4668_s17 + $0x138] sm:$0xff]  ;;  %v4110_v33 = vld [vmem:[%s4668_s17 + $0x130] sm:$0xff] }
 0x20f   : > { %v667_v38 = vadd.f32 %v665_v19, %v646_v28  ;;  %v668_v54 = vadd.f32 %v666_v22, %v647_v29  ;;  %v774_v14 = vmul.f32 %v4776_v46, %v768_v57  ;;  %v4979_v19 = vadd.f32 %v4749_v2, %v470_v34  ;;  %v4106_v28 = vld [vmem:[%s4668_s17 + $0x110] sm:$0xff]  ;;  %v4109_v29 = vld [vmem:[%s4668_s17 + $0x128] sm:$0xff] }
 0x210   : > { %v4117_v57 = vld [vmem:[%s4668_s17 + $0x168] sm:$0xff]  ;;  %v5023_v34 = vld [vmem:[%s7213_s5 + $0x10] sm:$0xff] }
 0x211   : > { %v690_v60 = vadd.f32 %v686_v18, %v667_v38  ;;  %v691_v61 = vadd.f32 %v687_v31, %v668_v54  ;;  %v749_v62 = vpop.permute.xlu1 %748  ;;  %v747_v1 = vpop.permute.xlu0 %746  ;;  %v4997_v38 = vld [vmem:[%s7213_s5] sm:$0xff]  ;;  %v4416_v54 = vpack.c.bf16 %v4106_v28, %v4104_v26  ;;  %v4418_v18 = vpack.c.bf16 %v4111_v30, %v4109_v29  ;;  %v5053_v28 = vld [vmem:[%s7213_s5 + $0x28] sm:$0xff] }
 0x212   : > { %v751_v12 = vsel %vm750_vm13, %v4912_v56, %v747_v1  ;;  %v752_v13 = vsel %vm750_vm13, %v747_v1, %v749_v62  ;;  %v4108_v31 = vld [vmem:[%s4668_s17 + $0x120] sm:$0xff] }
 0x213   : > { %v711_v7 = vadd.f32 %v709_v35, %v690_v60  ;;  %v712_v52 = vadd.f32 %v710_v36, %v691_v61  ;;  %v4414_v36 = vpack.c.bf16 %v4107_v17, %v4105_v16  ;;  %v4115_v60 = vld [vmem:[%s4668_s17 + $0x158] sm:$0xff]  ;;  %v5011_v61 = vld [vmem:[%s7213_s5 + $0x8] sm:$0xff]  ;;  %v4420_v62 = vpack.c.bf16 %v4110_v33, %v4108_v31  ;;  %v5041_v17 = vld [vmem:[%s7213_s5 + $0x20] sm:$0xff] }
 0x215   : > { %v732_v8 = vadd.f32 %v730_v6, %v711_v7  ;;  %v733_v9 = vadd.f32 %v731_v49, %v712_v52  ;;  %v4967_v10 = vpop.permute.xlu1 %1233  ;;  %v4969_v11 = vpop.permute.xlu0 %1183  ;;  %v4422_v49 = vpack.c.bf16 %v4115_v60, %v4113_v59  ;;  %v4112_v7 = vld [vmem:[%s4668_s17 + $0x140] sm:$0xff]  ;;  %v4114_v52 = vld [vmem:[%s4668_s17 + $0x150] sm:$0xff] }
 0x216   : > { %v4424_v37 = vpack.c.bf16 %v4114_v52, %v4112_v7 }
 0x217   : > { %v755_v27 = vadd.f32 %v751_v12, %v732_v8  ;;  %v756_v15 = vadd.f32 %v752_v13, %v733_v9  ;;  %v4426_v12 = vpack.c.bf16 %v4119_v21, %v4117_v57  ;;  %v4116_v13 = vld [vmem:[%s4668_s17 + $0x160] sm:$0xff] }
 0x219   : > { %v776_v22 = vadd.f32 %v774_v14, %v755_v27  ;;  %v777_v56 = vadd.f32 %v775_v25, %v756_v15  ;;  %v4984_v23 = vpop.permute.xlu1 %1249  ;;  %v4986_v24 = vpop.permute.xlu0 %1199  ;;  %v4118_v14 = vld [vmem:[%s4668_s17 + $0x170] sm:$0xff]  ;;  %v5033_v25 = vld [vmem:[%s7213_s5 + $0x18] sm:$0xff] }
 0x21a   : > { %v4428_v27 = vpack.c.bf16 %v4118_v14, %v4116_v13 }
 0x21b   : > { %v778_v32 = vsub.f32 %v776_v22, %v4979_v19  ;;  %v779_v35 = vsub.f32 %v777_v56, %v4982_v20 }
 0x21d   : > { %v1188_v55 = vpop.permute.xlu1 %1187  ;;  %v1186_v58 = vpop.permute.xlu0 %1185  ;;  %4051 = vmatprep.subr.msk.mxu0 %vm805_vm14, %v779_v35  ;;  %v1157_v35 = vsel %vm4894_vm2, %v4837_v63, 0.0 }
 0x21e   : > { %4052 = vmatpush1.msk.msra.mxu0 %vm805_vm14, %v778_v32  ;;  %v1189_v26 = vsel %vm633_vm3, %v4969_v11, %v1186_v58  ;;  %v1190_v29 = vsel %vm633_vm3, %v1186_v58, %v1188_v55  ;;  %v1159_v63 = vmul.f32 %v1157_v35, %v4778_v47 }
 0x21f   : > { %4053 = vmatmul.mubr.msk.f32.vlgmr.msra.gmra.mrb[2].mxu0 %vm780_vm15, %v4997_v38  ;;  %4415 = vmatprep.subr.bf16.mxu0 %v4414_v36  ;;  %v1194_v55 = vsel %vm4906_vm7, %v1190_v29, 0.0 }
 0x220   : > { %882 = vmatprep.mubr.f32.mxu0 %v7217_v0  ;;  %4417 = vmatpush1.bf16.msra.mxu0 %v4416_v54  ;;  %v1158_v54 = vsel %vm4898_vm4, %v4848_v3, 0.0 }
 0x221   : > { %v1204_v1 = vpop.permute.xlu1 %1203  ;;  %v1202_v6 = vpop.permute.xlu0 %1201  ;;  %4419 = vmatprep.subr.bf16.mxu0 %v4418_v18  ;;  %v1193_v18 = vsel %vm4902_vm6, %v1189_v26, 0.0  ;;  %v1160_v59 = vmul.f32 %v1158_v54, %v4778_v47 }
 0x222   : > { %v1205_v36 = vsel %vm654_vm5, %v4986_v24, %v1202_v6  ;;  %v1206_v11 = vsel %vm654_vm5, %v1202_v6, %v1204_v1  ;;  %v5076_v24 = vld [vmem:[%s7213_s5 + $0x30] sm:$0xff] }
 0x223   : > { %4054 = vmatmul.mubr.msk.f32.gmra.mrb[4].mxu0 %vm780_vm15, %v5011_v61  ;;  %v1209_v3 = vsel %vm4894_vm2, %v1205_v36, 0.0  ;;  %v1210_v58 = vsel %vm4898_vm4, %v1206_v11, 0.0 }
 0x224   : > { %888 = vmatprep.mubr.f32.mxu0 %v7217_v0  ;;  %4421 = vmatpush1.bf16.msra.mxu0 %v4420_v62  ;;  %v1195_v62 = vmul.f32 %v1193_v18, %v4766_v41  ;;  %v1212_v21 = vmul.f32 %v1210_v58, %v4768_v42 }
 0x225   : > { %v1236_v8 = vpop.permute.xlu1 %1235  ;;  %v1238_v9 = vpop.permute.xlu0 %1237  ;;  %4423 = vmatprep.subr.bf16.mxu0 %v4422_v49  ;;  %v1196_v49 = vmul.f32 %v1194_v55, %v4766_v41 }
 0x226   : > { %v1239_v31 = vsel %vm698_vm8, %v4967_v10, %v1236_v8  ;;  %v1240_v7 = vsel %vm698_vm8, %v1236_v8, %v1238_v9  ;;  %v1211_v10 = vmul.f32 %v1209_v3, %v4768_v42 }
 0x227   : > { %4055 = vmatmul.mubr.msk.f32.gmra.mrb[6].mxu0 %vm780_vm15, %v5023_v34  ;;  %v1244_v26 = vsel %vm4906_vm7, %v1240_v7, 0.0 }
 0x228   : > { %894 = vmatprep.mubr.f32.mxu0 %v7217_v0  ;;  %4425 = vmatpush1.bf16.msra.mxu0 %v4424_v37  ;;  %v1243_v37 = vsel %vm4902_vm6, %v1239_v31, 0.0  ;;  %v1246_v11 = vmul.f32 %v1244_v26, %v4772_v44 }
 0x229   : > { %v1252_v15 = vpop.permute.xlu1 %1251  ;;  %v1254_v16 = vpop.permute.xlu0 %1253  ;;  %4427 = vmatprep.subr.bf16.mxu0 %v4426_v12  ;;  %v5100_v12 = vld [vmem:[%s7213_s5 + $0x38] sm:$0xff]  ;;  %v1245_v29 = vmul.f32 %v1243_v37, %v4772_v44 }
 0x22a   : > { %v1255_v8 = vsel %vm719_vm10, %v4984_v23, %v1252_v15  ;;  %v1256_v9 = vsel %vm719_vm10, %v1252_v15, %v1254_v16 }
 0x22b   : > { %4056 = vmatmul.mubr.msk.f32.gmra.mrb[8].mxu0 %vm780_vm15, %v5033_v25  ;;  %v1259_v36 = vsel %vm4894_vm2, %v1255_v8, 0.0  ;;  %v1260_v23 = vsel %vm4898_vm4, %v1256_v9, 0.0  ;;  %v4148_v9 = vld [vmem:[%s4668_s17 + $0x188] sm:$0xff] }
 0x22c   : > { %900 = vmatprep.mubr.f32.mxu0 %v7217_v0  ;;  %4429 = vmatpush1.bf16.msra.mxu0 %v4428_v27  ;;  %v1261_v58 = vmul.f32 %v1259_v36, %v4774_v45  ;;  %v1262_v31 = vmul.f32 %v1260_v23, %v4774_v45 }
 0x22d   : > { %v1170_v22 = vpop.permute.xlu1 %1169  ;;  %v5043_v56 = vpop.permute.xlu0 %1285 }
 0x22f   : > { %4057 = vmatmul.mubr.msk.f32.gmra.mrb[10].mxu0 %vm780_vm15, %v5041_v17 }
 0x230   : > { %906 = vmatprep.mubr.f32.mxu0 %v7217_v0 }
 0x231   : > { %v1174_v30 = vpop.permute.xlu1 %1173  ;;  %v1222_v32 = vpop.permute.xlu0 %1221 }
 0x233   : > { %4058 = vmatmul.mubr.msk.f32.gmra.mrb[12].mxu0 %vm780_vm15, %v5053_v28 }
 0x234   : > { %912 = vmatprep.mubr.f32.mxu0 %v7217_v0 }
 0x235   : > { %v1288_v33 = vpop.permute.xlu1 %1287  ;;  %v1172_v60 = vpop.permute.xlu0 %1171 }
 0x236   : > { %v1175_v1 = vsel %vm614_vm9, %v1170_v22, %v1172_v60  ;;  %v1176_v6 = vsel %vm614_vm9, %v1172_v60, %v1174_v30  ;;  %v1290_v54 = vsel %vm763_vm12, %v5043_v56, %v1288_v33 }
 0x237   : > { %v1179_v52 = vadd.f32 %v1175_v1, %v1159_v63  ;;  %v1180_v57 = vadd.f32 %v1176_v6, %v1160_v59  ;;  %4059 = vmatmul.mubr.msk.f32.gmra.mrb[14].mxu0 %vm780_vm15, %v5076_v24 }
 0x238   : > { %918 = vmatprep.mubr.f32.mxu0 %v7217_v0 }
 0x239   : > { %v1197_v13 = vadd.f32 %v1195_v62, %v1179_v52  ;;  %v1198_v14 = vadd.f32 %v1196_v49, %v1180_v57  ;;  %v1224_v27 = vpop.permute.xlu1 %1223  ;;  %v1226_v22 = vpop.permute.xlu0 %1225 }
 0x23a   : > { %v1227_v15 = vsel %vm685_vm11, %v1222_v32, %v1224_v27  ;;  %v1228_v16 = vsel %vm685_vm11, %v1224_v27, %v1226_v22  ;;  %v1294_v32 = vsel %vm4906_vm7, %v1290_v54, 0.0  ;;  %v4147_v27 = vld [vmem:[%s4668_s17 + $0x180] sm:$0xff]  ;;  %v4149_v22 = vld [vmem:[%s4668_s17 + $0x190] sm:$0xff]  ;;  %v4156_v54 = vld [vmem:[%s4668_s17 + $0x1c8] sm:$0xff] }
 0x23b   : > { %v1213_v30 = vadd.f32 %v1211_v10, %v1197_v13  ;;  %v1214_v35 = vadd.f32 %v1212_v21, %v1198_v14  ;;  %4060 = vmatmul.mubr.msk.f32.gmra.mrb[16].mxu0 %vm780_vm15, %v5100_v12  ;;  %v1296_v57 = vmul.f32 %v1294_v32, %v4776_v46  ;;  %v4150_v13 = vld [vmem:[%s4668_s17 + $0x198] sm:$0xff]  ;;  %v4432_v23 = vpack.c.bf16 %v4149_v22, %v4147_v27 }
 0x23c   : > { %1550 = vmatprep.mubr.f32.mxu0 %v7217_v0 }
 0x23d   : > { %v1231_v18 = vadd.f32 %v1227_v15, %v1213_v30  ;;  %v1232_v55 = vadd.f32 %v1228_v16, %v1214_v35  ;;  %v1276_v63 = vpop.permute.xlu1 %1275  ;;  %v1274_v3 = vpop.permute.xlu0 %1273  ;;  %v4430_v35 = vpack.c.bf16 %v4150_v13, %v4148_v9  ;;  %v4151_v16 = vld [vmem:[%s4668_s17 + $0x1a0] sm:$0xff] }
 0x23e   : > { %v1278_v49 = vsel %vm750_vm13, %v1274_v3, %v1276_v63 }
 0x23f   : > { %v1247_v59 = vadd.f32 %v1245_v29, %v1231_v18  ;;  %v1248_v60 = vadd.f32 %v1246_v11, %v1232_v55  ;;  %4120 = vmatmul.mubr.msk.f32.vlgmr.msra.gmra.mrb[18].mxu0 %vm390_vm0, %v4716_v5  ;;  %v4154_v29 = vld [vmem:[%s4668_s17 + $0x1b8] sm:$0xff]  ;;  %v4153_v11 = vld [vmem:[%s4668_s17 + $0x1b0] sm:$0xff] }
 0x240   : > { %1787 = vmatprep.mubr.f32.mxu0 %v7217_v0  ;;  %v4158_v18 = vld [vmem:[%s4668_s17 + $0x1d8] sm:$0xff]  ;;  %v4436_v55 = vpack.c.bf16 %v4153_v11, %v4151_v16 }
 0x241   : > { %v1264_v33 = vadd.f32 %v1262_v31, %v1248_v60  ;;  %v1272_v62 = vpop.permute.xlu1 %1271  ;;  %v1263_v1 = vadd.f32 %v1261_v58, %v1247_v59  ;;  %v1284_v6 = vpop.permute.xlu0 %1283  ;;  %v4438_v63 = vpack.c.bf16 %v4158_v18, %v4156_v54  ;;  %v4157_v58 = vld [vmem:[%s4668_s17 + $0x1d0] sm:$0xff]  ;;  %v4160_v31 = vld [vmem:[%s4668_s17 + $0x1e8] sm:$0xff]  ;;  %v4162_v59 = vld [vmem:[%s4668_s17 + $0x1f8] sm:$0xff] }
 0x242   : > { %v1277_v7 = vsel %vm750_vm13, %v1272_v62, %v1274_v3  ;;  %v1289_v52 = vsel %vm763_vm12, %v1284_v6, %v5043_v56  ;;  %v4152_v56 = vld [vmem:[%s4668_s17 + $0x1a8] sm:$0xff]  ;;  %v4155_v3 = vld [vmem:[%s4668_s17 + $0x1c0] sm:$0xff]  ;;  %v4442_v32 = vpack.c.bf16 %v4162_v59, %v4160_v31  ;;  %v4161_v62 = vld [vmem:[%s4668_s17 + $0x1f0] sm:$0xff] }
 0x243   : > { %v1282_v10 = vadd.f32 %v1278_v49, %v1264_v33  ;;  %v1281_v21 = vadd.f32 %v1277_v7, %v1263_v1  ;;  %v1293_v37 = vsel %vm4902_vm6, %v1289_v52, 0.0  ;;  %v4434_v15 = vpack.c.bf16 %v4154_v29, %v4152_v56  ;;  %v4159_v33 = vld [vmem:[%s4668_s17 + $0x1e0] sm:$0xff] }
 0x244   : > { %v1295_v8 = vmul.f32 %v1293_v37, %v4776_v46  ;;  %v4440_v60 = vpack.c.bf16 %v4157_v58, %v4155_v3  ;;  %v4444_v1 = vpack.c.bf16 %v4161_v62, %v4159_v33 }
 0x245   : > { %v1298_v14 = vadd.f32 %v1296_v57, %v1282_v10 }
 0x246   : > { %v1297_v26 = vadd.f32 %v1295_v8, %v1281_v21 }
 0x247   : > { %v1300_v30 = vsub.f32 %v1298_v14, %v4982_v20 }
 0x248   : > { %v1299_v36 = vsub.f32 %v1297_v26, %v4979_v19 }
 0x249   : > { %4078 = vmatprep.subr.msk.mxu1 %vm805_vm14, %v1300_v30 }
 0x24a   : > { %4079 = vmatpush1.msk.msra.mxu1 %vm805_vm14, %v1299_v36 }
 0x24b   : > { %4080 = vmatmul.mubr.msk.f32.vlgmr.msra.gmra.mrb[4].mxu1 %vm780_vm15, %v4997_v38  ;;  %4431 = vmatprep.subr.bf16.mxu1 %v4430_v35 }
 0x24c   : > { %1377 = vmatprep.mubr.f32.mxu1 %v7217_v0  ;;  %4433 = vmatpush1.bf16.msra.mxu1 %v4432_v23 }
 0x24d   : > { %4435 = vmatprep.subr.bf16.mxu1 %v4434_v15 }
 0x24f   : > { %4081 = vmatmul.mubr.msk.f32.gmra.mrb[6].mxu1 %vm780_vm15, %v5011_v61 }
 0x250   : > { %1383 = vmatprep.mubr.f32.mxu1 %v7217_v0  ;;  %4437 = vmatpush1.bf16.msra.mxu1 %v4436_v55 }
 0x251   : > { %4439 = vmatprep.subr.bf16.mxu1 %v4438_v63 }
 0x253   : > { %4082 = vmatmul.mubr.msk.f32.gmra.mrb[8].mxu1 %vm780_vm15, %v5023_v34 }
 0x254   : > { %1389 = vmatprep.mubr.f32.mxu1 %v7217_v0  ;;  %4441 = vmatpush1.bf16.msra.mxu1 %v4440_v60 }
 0x255   : > { %4443 = vmatprep.subr.bf16.mxu1 %v4442_v32 }
 0x257   : > { %4083 = vmatmul.mubr.msk.f32.gmra.mrb[10].mxu1 %vm780_vm15, %v5033_v25 }
 0x258   : > { %1395 = vmatprep.mubr.f32.mxu1 %v7217_v0  ;;  %4445 = vmatpush1.bf16.msra.mxu1 %v4444_v1 }
 0x25b   : > { %4084 = vmatmul.mubr.msk.f32.gmra.mrb[12].mxu1 %vm780_vm15, %v5041_v17 }
 0x25c   : > { %1401 = vmatprep.mubr.f32.mxu1 %v7217_v0 }
 0x25f   : > { %4085 = vmatmul.mubr.msk.f32.gmra.mrb[14].mxu1 %vm780_vm15, %v5053_v28 }
 0x260   : > { %1407 = vmatprep.mubr.f32.mxu1 %v7217_v0 }
 0x263   : > { %4086 = vmatmul.mubr.msk.f32.gmra.mrb[16].mxu1 %vm780_vm15, %v5076_v24 }
 0x264   : > { %1413 = vmatprep.mubr.f32.mxu1 %v7217_v0 }
 0x267   : > { %4087 = vmatmul.mubr.msk.f32.gmra.mrb[18].mxu1 %vm780_vm15, %v5100_v12 }
 0x268   : > { %1966 = vmatprep.mubr.f32.mxu1 %v7217_v0 }
 0x26b   : > { %4163 = vmatmul.mubr.msk.f32.vlgmr.msra.gmra.mrb[20].mxu1 %vm390_vm0, %v4716_v5 }
 0x26c   : > { %2203 = vmatprep.mubr.f32.mxu1 %v7217_v0 }
 0x2f2   : > { %v5182_v6 = vpop.f32.mrb[2].mxu0 }
 0x2f3   : > { %v5184_v49 = vpop.f32.mrb[3].mxu0 }
 0x2f6   : > { %v5186_v7 = vpop.f32.mrb[4].mxu0 }
 0x2f7   : > { %7241 = vst [vmem:[#allocation2_spill] sm:$0xff] %v5186_v7  ;;  %v5188_v52 = vpop.f32.mrb[5].mxu0 }
 0x2f8   : > { %7242 = vst [vmem:[#allocation3_spill] sm:$0xff] %v5188_v52 }
 0x2fa   : > { %v5190_v57 = vpop.f32.mrb[6].mxu0 }
 0x2fb   : > { %7243 = vst [vmem:[#allocation4_spill] sm:$0xff] %v5190_v57  ;;  %v5192_v10 = vpop.f32.mrb[7].mxu0 }
 0x2fc   : > { %7244 = vst [vmem:[#allocation5_spill] sm:$0xff] %v5192_v10 }
 0x2fe   : > { %v5194_v21 = vpop.f32.mrb[8].mxu0 }
 0x2ff   : > { %7245 = vst [vmem:[#allocation6_spill] sm:$0xff] %v5194_v21  ;;  %v5196_v37 = vpop.f32.mrb[9].mxu0 }
 0x300   : > { %7246 = vst [vmem:[#allocation7_spill] sm:$0xff] %v5196_v37 }
 0x302   : > { %v5198_v8 = vpop.f32.mrb[10].mxu0 }
 0x303   : > { %7247 = vst [vmem:[#allocation8_spill] sm:$0xff] %v5198_v8  ;;  %v5200_v5 = vpop.f32.mrb[11].mxu0 }
 0x304   : > { %7248 = vst [vmem:[#allocation9_spill] sm:$0xff] %v5200_v5 }
 0x306   : > { %v5202_v9 = vpop.f32.mrb[12].mxu0 }
 0x307   : > { %7249 = vst [vmem:[#allocation10_spill] sm:$0xff] %v5202_v9  ;;  %v5204_v13 = vpop.f32.mrb[13].mxu0 }
 0x308   : > { %7250 = vst [vmem:[#allocation11_spill] sm:$0xff] %v5204_v13 }
 0x30a   : > { %v5206_v14 = vpop.f32.mrb[14].mxu0 }
 0x30b   : > { %7251 = vst [vmem:[#allocation12_spill] sm:$0xff] %v5206_v14  ;;  %v5208_v27 = vpop.f32.mrb[15].mxu0 }
 0x30c   : > { %7252 = vst [vmem:[#allocation13_spill] sm:$0xff] %v5208_v27 }
 0x30e   : > { %v5210_v22 = vpop.f32.mrb[16].mxu0 }
 0x30f   : > { %7253 = vst [vmem:[#allocation14_spill] sm:$0xff] %v5210_v22  ;;  %v5212_v26 = vpop.f32.mrb[17].mxu0 }
 0x310   : > { %7254 = vst [vmem:[#allocation15_spill] sm:$0xff] %v5212_v26 }
 0x312   : > { %v1552_v56 = vpop.f32.mrb[18].mxu0 }
 0x313   : > { %v1557_v29 = vmul.f32 %v1552_v56, %v4742_v4  ;;  %v1554_v30 = vpop.f32.mrb[19].mxu0 }
 0x314   : > { %v1558_v35 = vmul.f32 %v1554_v30, %v4742_v4 }
 0x315   : > { %v1559_v36 = vadd.f32 %v1557_v29, %v4749_v2 }
 0x316   : > { %v1560_v23 = vadd.f32 %v1558_v35, %v4749_v2 }
 0x317   : > { %1563 = vrot.lane.b32.xlu0 %v1559_v36, %s4583_s20 }
 0x318   : > { %1565 = vrot.lane.b32.xlu1 %v1560_v23, %s4583_s20 }
 0x31e   : > { %v5220_v15 = vpop.f32.mrb[4].mxu1 }
 0x31f   : > { %v5222_v16 = vpop.f32.mrb[5].mxu1 }
 0x322   : > { %v5224_v11 = vpop.f32.mrb[6].mxu1 }
 0x323   : > { %7255 = vst [vmem:[#allocation16_spill] sm:$0xff] %v5224_v11  ;;  %v5226_v54 = vpop.f32.mrb[7].mxu1 }
 0x324   : > { %7256 = vst [vmem:[#allocation17_spill] sm:$0xff] %v5226_v54 }
 0x326   : > { %v5228_v18 = vpop.f32.mrb[8].mxu1 }
 0x327   : > { %7257 = vst [vmem:[#allocation18_spill] sm:$0xff] %v5228_v18  ;;  %v5230_v55 = vpop.f32.mrb[9].mxu1 }
 0x328   : > { %7258 = vst [vmem:[#allocation19_spill] sm:$0xff] %v5230_v55 }
 0x32a   : > { %v5232_v63 = vpop.f32.mrb[10].mxu1 }
 0x32b   : > { %7259 = vst [vmem:[#allocation20_spill] sm:$0xff] %v5232_v63  ;;  %v5234_v3 = vpop.f32.mrb[11].mxu1 }
 0x32c   : > { %7260 = vst [vmem:[#allocation21_spill] sm:$0xff] %v5234_v3 }
 0x32e   : > { %v5236_v58 = vpop.f32.mrb[12].mxu1 }
 0x32f   : > { %7261 = vst [vmem:[#allocation22_spill] sm:$0xff] %v5236_v58  ;;  %v5238_v31 = vpop.f32.mrb[13].mxu1 }
 0x330   : > { %7262 = vst [vmem:[#allocation23_spill] sm:$0xff] %v5238_v31 }
 0x332   : > { %v5240_v59 = vpop.f32.mrb[14].mxu1 }
 0x333   : > { %7263 = vst [vmem:[#allocation24_spill] sm:$0xff] %v5240_v59  ;;  %v5242_v60 = vpop.f32.mrb[15].mxu1 }
 0x334   : > { %7264 = vst [vmem:[#allocation25_spill] sm:$0xff] %v5242_v60 }
 0x336   : > { %v5244_v32 = vpop.f32.mrb[16].mxu1 }
 0x337   : > { %7265 = vst [vmem:[#allocation26_spill] sm:$0xff] %v5244_v32  ;;  %v5246_v33 = vpop.f32.mrb[17].mxu1 }
 0x338   : > { %7266 = vst [vmem:[#allocation27_spill] sm:$0xff] %v5246_v33 }
 0x33a   : > { %v5248_v62 = vpop.f32.mrb[18].mxu1 }
 0x33b   : > { %7267 = vst [vmem:[#allocation28_spill] sm:$0xff] %v5248_v62  ;;  %v5250_v1 = vpop.f32.mrb[19].mxu1 }
 0x33c   : > { %7268 = vst [vmem:[#allocation29_spill] sm:$0xff] %v5250_v1 }
 0x33e   : > { %v1968_v56 = vpop.f32.mrb[20].mxu1 }
 0x33f   : > { %v1973_v29 = vmul.f32 %v1968_v56, %v4742_v4  ;;  %v1970_v30 = vpop.f32.mrb[21].mxu1 }
 0x340   : > { %v1974_v35 = vmul.f32 %v1970_v30, %v4742_v4 }
 0x341   : > { %v1975_v36 = vadd.f32 %v1973_v29, %v4749_v2 }
 0x342   : > { %v1976_v23 = vadd.f32 %v1974_v35, %v4749_v2 }
 0x343   : > { %1979 = vrot.lane.b32.xlu0 %v1975_v36, %s4583_s20 }
 0x344   : > { %1981 = vrot.lane.b32.xlu1 %v1976_v23, %s4583_s20 }
 0x389   : > { %v1564_v0 = vpop.permute.xlu0 %1563 }
 0x38a   : > { %v5259_v33 = vsel %vm576_vm1, 0.0, %v1564_v0  ;;  %v1566_v56 = vpop.permute.xlu1 %1565 }
 0x38b   : > { %1599 = vrot.lane.b32.xlu0 %v5259_v33, %s4585_s22  ;;  %1649 = vrot.lane.b32.xlu1 %v5259_v33, %s4587_s24  ;;  %v1572_v29 = vsel %vm576_vm1, %v1566_v56, 0.0  ;;  %v5274_v30 = vsel %vm576_vm1, %v1564_v0, %v1566_v56  ;;  %v1579_v0 = vmul.f32 %v5259_v33, %v4762_v39  ;;  %v1681_v35 = vmul.f32 %v5259_v33, %v4770_v43 }
 0x38c   : > { %v1631_v36 = vmul.f32 %v5259_v33, %v4764_v40  ;;  %v1581_v23 = vmul.f32 %v1572_v29, %v4762_v39  ;;  %v1580_v56 = vmul.f32 %v5274_v30, %v4762_v39  ;;  %v1633_v32 = vmul.f32 %v1572_v29, %v4764_v40 }
 0x38d   : > { %v1573_v18 = vsel %vm4894_vm2, %v5259_v33, 0.0  ;;  %v1574_v3 = vsel %vm4898_vm4, %v5274_v30, 0.0 }
 0x38f   : > { %1615 = vrot.lane.b32.xlu0 %v5259_v33, %s4584_s21  ;;  %1665 = vrot.lane.b32.xlu1 %v5259_v33, %s4586_s23 }
 0x393   : > { %1699 = vrot.lane.b32.xlu0 %v5259_v33, %s4588_s25  ;;  %1603 = vrot.lane.b32.xlu1 %v1572_v29, %s4585_s22 }
 0x397   : > { %1619 = vrot.lane.b32.xlu1 %v1572_v29, %s4584_s21  ;;  %1601 = vrot.lane.b32.xlu0 %v5274_v30, %s4585_s22 }
 0x39b   : > { %1651 = vrot.lane.b32.xlu1 %v5274_v30, %s4587_s24  ;;  %1617 = vrot.lane.b32.xlu0 %v5274_v30, %s4584_s21 }
 0x39f   : > { %1667 = vrot.lane.b32.xlu1 %v5274_v30, %s4586_s23  ;;  %1653 = vrot.lane.b32.xlu0 %v1572_v29, %s4587_s24 }
 0x3a3   : > { %1703 = vrot.lane.b32.xlu1 %v1572_v29, %s4588_s25  ;;  %1669 = vrot.lane.b32.xlu0 %v1572_v29, %s4586_s23 }
 0x3a7   : > { %1585 = vrot.lane.b32.xlu1 %v1579_v0, %s4589_s26  ;;  %1701 = vrot.lane.b32.xlu0 %v5274_v30, %s4588_s25  ;;  %v1632_v0 = vmul.f32 %v5274_v30, %v4764_v40 }
 0x3ab   : > { %1687 = vrot.lane.b32.xlu1 %v1681_v35, %s4590_s28  ;;  %1637 = vrot.lane.b32.xlu0 %v1631_v36, %s4591_s30  ;;  %v1683_v35 = vmul.f32 %v1572_v29, %v4770_v43  ;;  %v1682_v36 = vmul.f32 %v5274_v30, %v4770_v43 }
 0x3af   : > { %1589 = vrot.lane.b32.xlu1 %v1581_v23, %s4589_s26  ;;  %1587 = vrot.lane.b32.xlu0 %v1580_v56, %s4589_s26 }
 0x3b3   : > { %1639 = vrot.lane.b32.xlu1 %v1632_v0, %s4591_s30  ;;  %1641 = vrot.lane.b32.xlu0 %v1633_v32, %s4591_s30 }
 0x3b5   : > { %v1980_v27 = vpop.permute.xlu0 %1979 }
 0x3b6   : > { %v5315_v23 = vsel %vm576_vm1, 0.0, %v1980_v27  ;;  %v1982_v32 = vpop.permute.xlu1 %1981 }
 0x3b7   : > { %1691 = vrot.lane.b32.xlu1 %v1683_v35, %s4590_s28  ;;  %1689 = vrot.lane.b32.xlu0 %v1682_v36, %s4590_s28  ;;  %v5326_v29 = vsel %vm576_vm1, %v1980_v27, %v1982_v32  ;;  %v1988_v56 = vsel %vm576_vm1, %v1982_v32, 0.0  ;;  %v1995_v27 = vmul.f32 %v5315_v23, %v4762_v39  ;;  %v2047_v35 = vmul.f32 %v5315_v23, %v4764_v40 }
 0x3b8   : > { %v1997_v0 = vmul.f32 %v1988_v56, %v4762_v39  ;;  %v1996_v36 = vmul.f32 %v5326_v29, %v4762_v39  ;;  %v2048_v32 = vmul.f32 %v5326_v29, %v4764_v40 }
 0x3bb   : > { %2065 = vrot.lane.b32.xlu1 %v5315_v23, %s4587_s24  ;;  %2015 = vrot.lane.b32.xlu0 %v5315_v23, %s4585_s22 }
 0x3bf   : > { %2081 = vrot.lane.b32.xlu1 %v5315_v23, %s4586_s23  ;;  %2031 = vrot.lane.b32.xlu0 %v5315_v23, %s4584_s21 }
 0x3c3   : > { %2019 = vrot.lane.b32.xlu1 %v1988_v56, %s4585_s22  ;;  %2017 = vrot.lane.b32.xlu0 %v5326_v29, %s4585_s22 }
 0x3c7   : > { %2035 = vrot.lane.b32.xlu1 %v1988_v56, %s4584_s21  ;;  %2033 = vrot.lane.b32.xlu0 %v5326_v29, %s4584_s21 }
 0x3cb   : > { %2067 = vrot.lane.b32.xlu1 %v5326_v29, %s4587_s24  ;;  %2069 = vrot.lane.b32.xlu0 %v1988_v56, %s4587_s24 }
 0x3cf   : > { %2083 = vrot.lane.b32.xlu1 %v5326_v29, %s4586_s23  ;;  %2085 = vrot.lane.b32.xlu0 %v1988_v56, %s4586_s23 }
 0x3d3   : > { %2001 = vrot.lane.b32.xlu1 %v1995_v27, %s4589_s26  ;;  %2117 = vrot.lane.b32.xlu0 %v5326_v29, %s4588_s25  ;;  %v2049_v27 = vmul.f32 %v1988_v56, %v4764_v40 }
 0x3d7   : > { %2005 = vrot.lane.b32.xlu1 %v1997_v0, %s4589_s26  ;;  %2053 = vrot.lane.b32.xlu0 %v2047_v35, %s4591_s30  ;;  %v2099_v0 = vmul.f32 %v1988_v56, %v4770_v43  ;;  %v2098_v35 = vmul.f32 %v5326_v29, %v4770_v43 }
 0x3db   : > { %2119 = vrot.lane.b32.xlu1 %v1988_v56, %s4588_s25  ;;  %2003 = vrot.lane.b32.xlu0 %v1996_v36, %s4589_s26  ;;  %v2097_v36 = vmul.f32 %v5315_v23, %v4770_v43 }
 0x3df   : > { %2055 = vrot.lane.b32.xlu1 %v2048_v32, %s4591_s30  ;;  %2057 = vrot.lane.b32.xlu0 %v2049_v27, %s4591_s30 }
 0x3e3   : > { %2107 = vrot.lane.b32.xlu1 %v2099_v0, %s4590_s28  ;;  %2105 = vrot.lane.b32.xlu0 %v2098_v35, %s4590_s28 }
 0x3e7   : > { %2103 = vrot.lane.b32.xlu1 %v2097_v36, %s4590_s28  ;;  %2115 = vrot.lane.b32.xlu0 %v5315_v23, %s4588_s25 }
 0x3fd   : > { %v1600_v32 = vpop.permute.xlu0 %1599  ;;  %v1650_v14 = vpop.permute.xlu1 %1649 }
 0x401   : > { %v1616_v27 = vpop.permute.xlu0 %1615  ;;  %v1666_v1 = vpop.permute.xlu1 %1665 }
 0x405   : > { %v1700_v56 = vpop.permute.xlu0 %1699  ;;  %v1604_v62 = vpop.permute.xlu1 %1603 }
 0x409   : > { %v1602_v26 = vpop.permute.xlu0 %1601  ;;  %v1620_v22 = vpop.permute.xlu1 %1619 }
 0x40a   : > { %v1605_v36 = vsel %vm633_vm3, %v1600_v32, %v1602_v26  ;;  %v1606_v13 = vsel %vm633_vm3, %v1602_v26, %v1604_v62  ;;  %v1575_v62 = vmul.f32 %v1573_v18, %v4778_v47 }
 0x40b   : > { %v1609_v63 = vsel %vm4902_vm6, %v1605_v36, 0.0  ;;  %v1610_v26 = vsel %vm4906_vm7, %v1606_v13, 0.0 }
 0x40c   : > { %v1611_v18 = vmul.f32 %v1609_v63, %v4766_v41  ;;  %v1612_v21 = vmul.f32 %v1610_v26, %v4766_v41 }
 0x40d   : > { %v1618_v31 = vpop.permute.xlu0 %1617  ;;  %v1652_v0 = vpop.permute.xlu1 %1651 }
 0x40e   : > { %v1621_v10 = vsel %vm654_vm5, %v1616_v27, %v1618_v31  ;;  %v1622_v57 = vsel %vm654_vm5, %v1618_v31, %v1620_v22  ;;  %v1655_v22 = vsel %vm698_vm8, %v1650_v14, %v1652_v0  ;;  %v1576_v27 = vmul.f32 %v1574_v3, %v4778_v47 }
 0x40f   : > { %v1625_v32 = vsel %vm4894_vm2, %v1621_v10, 0.0  ;;  %v1626_v33 = vsel %vm4898_vm4, %v1622_v57, 0.0  ;;  %v1659_v3 = vsel %vm4902_vm6, %v1655_v22, 0.0 }
 0x410   : > { %v1627_v57 = vmul.f32 %v1625_v32, %v4768_v42  ;;  %v1628_v14 = vmul.f32 %v1626_v33, %v4768_v42 }
 0x411   : > { %v1654_v58 = vpop.permute.xlu0 %1653  ;;  %v1668_v35 = vpop.permute.xlu1 %1667 }
 0x412   : > { %v1656_v37 = vsel %vm698_vm8, %v1652_v0, %v1654_v58  ;;  %v1671_v11 = vsel %vm719_vm10, %v1666_v1, %v1668_v35 }
 0x413   : > { %v1660_v58 = vsel %vm4906_vm7, %v1656_v37, 0.0  ;;  %v1675_v32 = vsel %vm4894_vm2, %v1671_v11, 0.0 }
 0x414   : > { %v1662_v22 = vmul.f32 %v1660_v58, %v4772_v44  ;;  %v1677_v11 = vmul.f32 %v1675_v32, %v4774_v45  ;;  %v4193_v32 = vld [vmem:[%s4668_s17 + $0x218] sm:$0xff] }
 0x415   : > { %v1670_v5 = vpop.permute.xlu0 %1669  ;;  %v1704_v8 = vpop.permute.xlu1 %1703 }
 0x419   : > { %v1702_v60 = vpop.permute.xlu0 %1701  ;;  %v1586_v59 = vpop.permute.xlu1 %1585 }
 0x41d   : > { %v1638_v9 = vpop.permute.xlu0 %1637  ;;  %v1688_v55 = vpop.permute.xlu1 %1687 }
 0x421   : > { %v1588_v31 = vpop.permute.xlu0 %1587  ;;  %v1590_v30 = vpop.permute.xlu1 %1589 }
 0x422   : > { %v1591_v36 = vsel %vm614_vm9, %v1586_v59, %v1588_v31  ;;  %v1592_v13 = vsel %vm614_vm9, %v1588_v31, %v1590_v30  ;;  %v1672_v59 = vsel %vm719_vm10, %v1668_v35, %v1670_v5 }
 0x423   : > { %v1595_v10 = vadd.f32 %v1591_v36, %v1575_v62  ;;  %v1596_v54 = vadd.f32 %v1592_v13, %v1576_v27  ;;  %v1661_v62 = vmul.f32 %v1659_v3, %v4772_v44  ;;  %v1676_v1 = vsel %vm4898_vm4, %v1672_v59, 0.0 }
 0x425   : > { %v1613_v0 = vadd.f32 %v1611_v18, %v1595_v10  ;;  %v1614_v63 = vadd.f32 %v1612_v21, %v1596_v54  ;;  %v1642_v31 = vpop.permute.xlu0 %1641  ;;  %v1640_v26 = vpop.permute.xlu1 %1639  ;;  %v1705_v21 = vsel %vm763_vm12, %v1700_v56, %v1702_v60  ;;  %v1706_v54 = vsel %vm763_vm12, %v1702_v60, %v1704_v8 }
 0x426   : > { %v1643_v37 = vsel %vm685_vm11, %v1638_v9, %v1640_v26  ;;  %v1644_v5 = vsel %vm685_vm11, %v1640_v26, %v1642_v31  ;;  %v1678_v18 = vmul.f32 %v1676_v1, %v4774_v45  ;;  %v1709_v9 = vsel %vm4902_vm6, %v1705_v21, 0.0  ;;  %v4197_v21 = vld [vmem:[%s4668_s17 + $0x238] sm:$0xff] }
 0x427   : > { %v1629_v33 = vadd.f32 %v1627_v57, %v1613_v0  ;;  %v1630_v27 = vadd.f32 %v1628_v14, %v1614_v63  ;;  %v1710_v56 = vsel %vm4906_vm7, %v1706_v54, 0.0  ;;  %v1711_v0 = vmul.f32 %v1709_v9, %v4776_v46  ;;  %v4199_v9 = vld [vmem:[%s4668_s17 + $0x248] sm:$0xff] }
 0x428   : > { %v1712_v63 = vmul.f32 %v1710_v56, %v4776_v46  ;;  %v4201_v56 = vld [vmem:[%s4668_s17 + $0x258] sm:$0xff] }
 0x429   : > { %v1647_v35 = vadd.f32 %v1643_v37, %v1629_v33  ;;  %v1648_v30 = vadd.f32 %v1644_v5, %v1630_v27  ;;  %v1690_v36 = vpop.permute.xlu0 %1689  ;;  %v1692_v13 = vpop.permute.xlu1 %1691  ;;  %v4190_v37 = vld [vmem:[%s4668_s17 + $0x200] sm:$0xff]  ;;  %v4195_v5 = vld [vmem:[%s4668_s17 + $0x228] sm:$0xff] }
 0x42a   : > { %v1693_v58 = vsel %vm750_vm13, %v1688_v55, %v1690_v36  ;;  %v1694_v59 = vsel %vm750_vm13, %v1690_v36, %v1692_v13  ;;  %v4192_v55 = vld [vmem:[%s4668_s17 + $0x210] sm:$0xff] }
 0x42b   : > { %v1663_v10 = vadd.f32 %v1661_v62, %v1647_v35  ;;  %v1664_v57 = vadd.f32 %v1662_v22, %v1648_v30  ;;  %v4191_v62 = vld [vmem:[%s4668_s17 + $0x208] sm:$0xff]  ;;  %v4448_v36 = vpack.c.bf16 %v4192_v55, %v4190_v37  ;;  %v4202_v37 = vld [vmem:[%s4668_s17 + $0x260] sm:$0xff]  ;;  %v4204_v55 = vld [vmem:[%s4668_s17 + $0x270] sm:$0xff] }
 0x42c   : > { %v4446_v30 = vpack.c.bf16 %v4193_v32, %v4191_v62  ;;  %v4205_v62 = vld [vmem:[%s4668_s17 + $0x278] sm:$0xff] }
 0x42d   : > { %v1679_v14 = vadd.f32 %v1677_v11, %v1663_v10  ;;  %v1680_v8 = vadd.f32 %v1678_v18, %v1664_v57  ;;  %v5420_v60 = vpop.permute.xlu0 %2015  ;;  %v5422_v3 = vpop.permute.xlu1 %2065  ;;  %v4450_v18 = vpack.c.bf16 %v4197_v21, %v4195_v5  ;;  %v4194_v10 = vld [vmem:[%s4668_s17 + $0x220] sm:$0xff]  ;;  %v4196_v57 = vld [vmem:[%s4668_s17 + $0x230] sm:$0xff]  ;;  %v4460_v5 = vpack.c.bf16 %v4204_v55, %v4202_v37 }
 0x42f   : > { %v1697_v31 = vadd.f32 %v1693_v58, %v1679_v14  ;;  %v1698_v26 = vadd.f32 %v1694_v59, %v1680_v8  ;;  %v7269_v14 = vmov 0.0   ;;  %v4452_v8 = vpack.c.bf16 %v4196_v57, %v4194_v10 }
 0x431   : > { %v1713_v33 = vadd.f32 %v1711_v0, %v1697_v31  ;;  %v1714_v27 = vadd.f32 %v1712_v63, %v1698_v26  ;;  %v2032_v22 = vpop.permute.xlu0 %2031  ;;  %v5430_v1 = vpop.permute.xlu1 %2081  ;;  %v4454_v0 = vpack.c.bf16 %v4201_v56, %v4199_v9  ;;  %v4198_v63 = vld [vmem:[%s4668_s17 + $0x240] sm:$0xff]  ;;  %v4200_v31 = vld [vmem:[%s4668_s17 + $0x250] sm:$0xff]  ;;  %v4203_v26 = vld [vmem:[%s4668_s17 + $0x268] sm:$0xff] }
 0x433   : > { %v1715_v54 = vsub.f32 %v1713_v33, %v4979_v19  ;;  %v1716_v35 = vsub.f32 %v1714_v27, %v4982_v20  ;;  %v4458_v27 = vpack.c.bf16 %v4205_v62, %v4203_v26 }
 0x435   : > { %v2018_v13 = vpop.permute.xlu0 %2017  ;;  %4121 = vmatprep.subr.msk.mxu0 %vm805_vm14, %v1716_v35  ;;  %v2020_v11 = vpop.permute.xlu1 %2019 }
 0x436   : > { %4122 = vmatpush1.msk.msra.mxu0 %vm805_vm14, %v1715_v54 }
 0x437   : > { %4123 = vmatmul.mubr.msk.f32.vlgmr.msra.gmra.mrb[20].mxu0 %vm780_vm15, %v4997_v38  ;;  %4447 = vmatprep.subr.bf16.mxu0 %v4446_v30  ;;  %v4456_v38 = vpack.c.bf16 %v4200_v31, %v4198_v63  ;;  %v2022_v30 = vsel %vm633_vm3, %v2018_v13, %v2020_v11 }
 0x438   : > { %1793 = vmatprep.mubr.f32.mxu0 %v7269_v14  ;;  %4449 = vmatpush1.bf16.msra.mxu0 %v4448_v36 }
 0x439   : > { %v2034_v58 = vpop.permute.xlu0 %2033  ;;  %v2036_v59 = vpop.permute.xlu1 %2035  ;;  %4451 = vmatprep.subr.bf16.mxu0 %v4450_v18 }
 0x43a   : > { %v2037_v10 = vsel %vm654_vm5, %v2032_v22, %v2034_v58  ;;  %v2038_v57 = vsel %vm654_vm5, %v2034_v58, %v2036_v59 }
 0x43b   : > { %4124 = vmatmul.mubr.msk.f32.gmra.mrb[22].mxu0 %vm780_vm15, %v5011_v61  ;;  %v2042_v22 = vsel %vm4898_vm4, %v2038_v57, 0.0 }
 0x43c   : > { %1799 = vmatprep.mubr.f32.mxu0 %v7269_v14  ;;  %4453 = vmatpush1.bf16.msra.mxu0 %v4452_v8  ;;  %v2044_v62 = vmul.f32 %v2042_v22, %v4768_v42 }
 0x43d   : > { %v2070_v32 = vpop.permute.xlu0 %2069  ;;  %v2068_v33 = vpop.permute.xlu1 %2067  ;;  %4455 = vmatprep.subr.bf16.mxu0 %v4454_v0 }
 0x43e   : > { %v2072_v63 = vsel %vm698_vm8, %v2068_v33, %v2070_v32 }
 0x43f   : > { %4125 = vmatmul.mubr.msk.f32.gmra.mrb[24].mxu0 %vm780_vm15, %v5023_v34  ;;  %v2021_v34 = vsel %vm633_vm3, %v5420_v60, %v2018_v13  ;;  %v2026_v13 = vsel %vm4906_vm7, %v2022_v30, 0.0 }
 0x440   : > { %1805 = vmatprep.mubr.f32.mxu0 %v7269_v14  ;;  %4457 = vmatpush1.bf16.msra.mxu0 %v4456_v38  ;;  %v2025_v60 = vsel %vm4902_vm6, %v2021_v34, 0.0  ;;  %v2028_v0 = vmul.f32 %v2026_v13, %v4766_v41 }
 0x441   : > { %v2086_v21 = vpop.permute.xlu0 %2085  ;;  %v2084_v54 = vpop.permute.xlu1 %2083  ;;  %4459 = vmatprep.subr.bf16.mxu0 %v4458_v27  ;;  %v2027_v8 = vmul.f32 %v2025_v60, %v4766_v41 }
 0x442   : > { %v2087_v27 = vsel %vm719_vm10, %v5430_v1, %v2084_v54  ;;  %v2088_v37 = vsel %vm719_vm10, %v2084_v54, %v2086_v21 }
 0x443   : > { %4126 = vmatmul.mubr.msk.f32.gmra.mrb[26].mxu0 %vm780_vm15, %v5033_v25  ;;  %v1989_v25 = vsel %vm4894_vm2, %v5315_v23, 0.0  ;;  %v2041_v23 = vsel %vm4894_vm2, %v2037_v10, 0.0  ;;  %v2092_v1 = vsel %vm4898_vm4, %v2088_v37, 0.0  ;;  %v4234_v37 = vld [vmem:[%s4668_s17 + $0x288] sm:$0xff] }
 0x444   : > { %1811 = vmatprep.mubr.f32.mxu0 %v7269_v14  ;;  %4461 = vmatpush1.bf16.msra.mxu0 %v4460_v5  ;;  %v1991_v11 = vmul.f32 %v1989_v25, %v4778_v47  ;;  %v2091_v25 = vsel %vm4894_vm2, %v2087_v27, 0.0  ;;  %v2094_v22 = vmul.f32 %v2092_v1, %v4774_v45 }
 0x445   : > { %v5462_v61 = vpop.permute.xlu0 %2117  ;;  %v2002_v35 = vpop.permute.xlu1 %2001 }
 0x447   : > { %4127 = vmatmul.mubr.msk.f32.gmra.mrb[28].mxu0 %vm780_vm15, %v5041_v17  ;;  %v1990_v17 = vsel %vm4898_vm4, %v5326_v29, 0.0  ;;  %v2071_v29 = vsel %vm698_vm8, %v5422_v3, %v2068_v33  ;;  %v2043_v3 = vmul.f32 %v2041_v23, %v4768_v42  ;;  %v2093_v23 = vmul.f32 %v2091_v25, %v4774_v45 }
 0x448   : > { %1817 = vmatprep.mubr.f32.mxu0 %v7269_v14  ;;  %v1992_v56 = vmul.f32 %v1990_v17, %v4778_v47  ;;  %v2075_v38 = vsel %vm4902_vm6, %v2071_v29, 0.0 }
 0x449   : > { %v2054_v36 = vpop.permute.xlu0 %2053  ;;  %v2006_v18 = vpop.permute.xlu1 %2005  ;;  %v2077_v34 = vmul.f32 %v2075_v38, %v4772_v44 }
 0x44b   : > { %4128 = vmatmul.mubr.msk.f32.gmra.mrb[30].mxu0 %vm780_vm15, %v5053_v28 }
 0x44c   : > { %1823 = vmatprep.mubr.f32.mxu0 %v7269_v14 }
 0x44d   : > { %v2004_v9 = vpop.permute.xlu0 %2003  ;;  %v2120_v28 = vpop.permute.xlu1 %2119 }
 0x44e   : > { %v2007_v58 = vsel %vm614_vm9, %v2002_v35, %v2004_v9  ;;  %v2008_v59 = vsel %vm614_vm9, %v2004_v9, %v2006_v18  ;;  %v2076_v35 = vsel %vm4906_vm7, %v2072_v63, 0.0  ;;  %v2122_v57 = vsel %vm763_vm12, %v5462_v61, %v2120_v28 }
 0x44f   : > { %v2011_v31 = vadd.f32 %v2007_v58, %v1991_v11  ;;  %v2012_v26 = vadd.f32 %v2008_v59, %v1992_v56  ;;  %4129 = vmatmul.mubr.msk.f32.gmra.mrb[32].mxu0 %vm780_vm15, %v5076_v24  ;;  %v2078_v10 = vmul.f32 %v2076_v35, %v4772_v44  ;;  %v2126_v56 = vsel %vm4906_vm7, %v2122_v57, 0.0  ;;  %v4238_v35 = vld [vmem:[%s4668_s17 + $0x2a8] sm:$0xff] }
 0x450   : > { %1829 = vmatprep.mubr.f32.mxu0 %v7269_v14  ;;  %v4242_v57 = vld [vmem:[%s4668_s17 + $0x2c8] sm:$0xff] }
 0x451   : > { %v2029_v32 = vadd.f32 %v2027_v8, %v2011_v31  ;;  %v2030_v33 = vadd.f32 %v2028_v0, %v2012_v26  ;;  %v2058_v55 = vpop.permute.xlu0 %2057  ;;  %v2056_v5 = vpop.permute.xlu1 %2055  ;;  %v2128_v26 = vmul.f32 %v2126_v56, %v4776_v46  ;;  %v5572_v56 = vld [vmem:[%s7213_s5 + $0x8] sm:$0xff] }
 0x452   : > { %v2059_v21 = vsel %vm685_vm11, %v2054_v36, %v2056_v5  ;;  %v2060_v54 = vsel %vm685_vm11, %v2056_v5, %v2058_v55  ;;  %v5528_v36 = vld [vmem:[%s7209_s1] sm:$0xf] }
 0x453   : > { %v2045_v30 = vadd.f32 %v2043_v3, %v2029_v32  ;;  %v2046_v18 = vadd.f32 %v2044_v62, %v2030_v33  ;;  %4130 = vmatmul.mubr.msk.f32.gmra.mrb[34].mxu0 %vm780_vm15, %v5100_v12  ;;  %v4236_v32 = vld [vmem:[%s4668_s17 + $0x298] sm:$0xff]  ;;  %v4233_v55 = vld [vmem:[%s4668_s17 + $0x280] sm:$0xff] }
 0x454   : > { %2381 = vmatprep.mubr.f32.mxu0 %v7269_v14 }
 0x455   : > { %v2063_v17 = vadd.f32 %v2059_v21, %v2045_v30  ;;  %v2064_v60 = vadd.f32 %v2060_v54, %v2046_v18  ;;  %v2106_v13 = vpop.permute.xlu0 %2105  ;;  %v2108_v11 = vpop.permute.xlu1 %2107  ;;  %v4462_v18 = vpack.c.bf16 %v4236_v32, %v4234_v37  ;;  %v4237_v54 = vld [vmem:[%s4668_s17 + $0x2a0] sm:$0xff] }
 0x456   : > { %v2110_v0 = vsel %vm750_vm13, %v2106_v13, %v2108_v11 }
 0x457   : > { %v2079_v29 = vadd.f32 %v2077_v34, %v2063_v17  ;;  %v2080_v9 = vadd.f32 %v2078_v10, %v2064_v60  ;;  %4206 = vmatmul.mubr.msk.f32.vlgmr.msra.gmra.mrb[36].mxu0 %vm390_vm0, %v5528_v36  ;;  %v4240_v34 = vld [vmem:[%s4668_s17 + $0x2b8] sm:$0xff]  ;;  %v4239_v10 = vld [vmem:[%s4668_s17 + $0x2b0] sm:$0xff]  ;;  %v5560_v60 = vld [vmem:[%s7213_s5] sm:$0xff] }
 0x458   : > { %2618 = vmatprep.mubr.f32.mxu0 %v7269_v14  ;;  %v4466_v21 = vpack.c.bf16 %v4240_v34, %v4238_v35  ;;  %v4244_v17 = vld [vmem:[%s4668_s17 + $0x2d8] sm:$0xff] }
 0x459   : > { %v2096_v28 = vadd.f32 %v2094_v22, %v2080_v9  ;;  %v2116_v8 = vpop.permute.xlu0 %2115  ;;  %v2095_v58 = vadd.f32 %v2093_v23, %v2079_v29  ;;  %v2104_v59 = vpop.permute.xlu1 %2103  ;;  %v4470_v11 = vpack.c.bf16 %v4244_v17, %v4242_v57  ;;  %v4241_v23 = vld [vmem:[%s4668_s17 + $0x2c0] sm:$0xff]  ;;  %v4243_v22 = vld [vmem:[%s4668_s17 + $0x2d0] sm:$0xff]  ;;  %v4246_v29 = vld [vmem:[%s4668_s17 + $0x2e8] sm:$0xff] }
 0x45a   : > { %v2121_v63 = vsel %vm763_vm12, %v2116_v8, %v5462_v61  ;;  %v2109_v31 = vsel %vm750_vm13, %v2104_v59, %v2106_v13  ;;  %v4235_v61 = vld [vmem:[%s4668_s17 + $0x290] sm:$0xff]  ;;  %v4468_v13 = vpack.c.bf16 %v4239_v10, %v4237_v54  ;;  %v4248_v9 = vld [vmem:[%s4668_s17 + $0x2f8] sm:$0xff] }
 0x45b   : > { %v2114_v3 = vadd.f32 %v2110_v0, %v2096_v28  ;;  %v2125_v62 = vsel %vm4902_vm6, %v2121_v63, 0.0  ;;  %v2113_v38 = vadd.f32 %v2109_v31, %v2095_v58  ;;  %v4464_v1 = vpack.c.bf16 %v4235_v61, %v4233_v55  ;;  %v4245_v58 = vld [vmem:[%s4668_s17 + $0x2e0] sm:$0xff]  ;;  %v4247_v59 = vld [vmem:[%s4668_s17 + $0x2f0] sm:$0xff]  ;;  %v5590_v31 = vld [vmem:[%s7213_s5 + $0x18] sm:$0xff] }
 0x45c   : > { %v2127_v27 = vmul.f32 %v2125_v62, %v4776_v46  ;;  %v4472_v28 = vpack.c.bf16 %v4243_v22, %v4241_v23  ;;  %v4474_v8 = vpack.c.bf16 %v4248_v9, %v4246_v29  ;;  %v5582_v0 = vld [vmem:[%s7213_s5 + $0x10] sm:$0xff]  ;;  %v4476_v63 = vpack.c.bf16 %v4247_v59, %v4245_v58 }
 0x45d   : > { %v2130_v33 = vadd.f32 %v2128_v26, %v2114_v3  ;;  %v5598_v26 = vld [vmem:[%s7213_s5 + $0x20] sm:$0xff]  ;;  %v5606_v3 = vld [vmem:[%s7213_s5 + $0x28] sm:$0xff] }
 0x45e   : > { %v2129_v5 = vadd.f32 %v2127_v27, %v2113_v38 }
 0x45f   : > { %v2132_v30 = vsub.f32 %v2130_v33, %v4982_v20 }
 0x460   : > { %v2131_v25 = vsub.f32 %v2129_v5, %v4979_v19 }
 0x461   : > { %4164 = vmatprep.subr.msk.mxu1 %vm805_vm14, %v2132_v30 }
 0x462   : > { %4165 = vmatpush1.msk.msra.mxu1 %vm805_vm14, %v2131_v25 }
 0x463   : > { %4166 = vmatmul.mubr.msk.f32.vlgmr.msra.gmra.mrb[22].mxu1 %vm780_vm15, %v5560_v60  ;;  %4463 = vmatprep.subr.bf16.mxu1 %v4462_v18 }
 0x464   : > { %2209 = vmatprep.mubr.f32.mxu1 %v7269_v14  ;;  %4465 = vmatpush1.bf16.msra.mxu1 %v4464_v1 }
 0x465   : > { %4467 = vmatprep.subr.bf16.mxu1 %v4466_v21 }
 0x467   : > { %4167 = vmatmul.mubr.msk.f32.gmra.mrb[24].mxu1 %vm780_vm15, %v5572_v56 }
 0x468   : > { %2215 = vmatprep.mubr.f32.mxu1 %v7269_v14  ;;  %4469 = vmatpush1.bf16.msra.mxu1 %v4468_v13 }
 0x469   : > { %4471 = vmatprep.subr.bf16.mxu1 %v4470_v11 }
 0x46b   : > { %4168 = vmatmul.mubr.msk.f32.gmra.mrb[26].mxu1 %vm780_vm15, %v5582_v0 }
 0x46c   : > { %2221 = vmatprep.mubr.f32.mxu1 %v7269_v14  ;;  %4473 = vmatpush1.bf16.msra.mxu1 %v4472_v28 }
 0x46d   : > { %4475 = vmatprep.subr.bf16.mxu1 %v4474_v8 }
 0x46f   : > { %4169 = vmatmul.mubr.msk.f32.gmra.mrb[28].mxu1 %vm780_vm15, %v5590_v31 }
 0x470   : > { %2227 = vmatprep.mubr.f32.mxu1 %v7269_v14  ;;  %4477 = vmatpush1.bf16.msra.mxu1 %v4476_v63 }
 0x473   : > { %4170 = vmatmul.mubr.msk.f32.gmra.mrb[30].mxu1 %vm780_vm15, %v5598_v26 }
 0x474   : > { %2233 = vmatprep.mubr.f32.mxu1 %v7269_v14 }
 0x477   : > { %4171 = vmatmul.mubr.msk.f32.gmra.mrb[32].mxu1 %vm780_vm15, %v5606_v3 }
 0x478   : > { %2239 = vmatprep.mubr.f32.mxu1 %v7269_v14 }
 0x47b   : > { %4172 = vmatmul.mubr.msk.f32.gmra.mrb[34].mxu1 %vm780_vm15, %v5076_v24 }
 0x47c   : > { %2245 = vmatprep.mubr.f32.mxu1 %v7269_v14 }
 0x47f   : > { %4173 = vmatmul.mubr.msk.f32.gmra.mrb[36].mxu1 %vm780_vm15, %v5100_v12 }
 0x480   : > { %2797 = vmatprep.mubr.f32.mxu1 %v7269_v14 }
 0x483   : > { %4249 = vmatmul.mubr.msk.f32.vlgmr.msra.gmra.mrb[38].mxu1 %vm390_vm0, %v5528_v36 }
 0x484   : > { %3034 = vmatprep.mubr.f32.mxu1 %v7269_v14 }
 0x50a   : > { %v5620_v62 = vpop.f32.mrb[20].mxu0 }
 0x50b   : > { %v5622_v38 = vpop.f32.mrb[21].mxu0 }
 0x50e   : > { %v5624_v27 = vpop.f32.mrb[22].mxu0 }
 0x50f   : > { %7270 = vst [vmem:[#allocation30_spill] sm:$0xff] %v5624_v27  ;;  %v5626_v37 = vpop.f32.mrb[23].mxu0 }
 0x510   : > { %7271 = vst [vmem:[#allocation31_spill] sm:$0xff] %v5626_v37 }
 0x512   : > { %v5628_v24 = vpop.f32.mrb[24].mxu0 }
 0x513   : > { %7272 = vst [vmem:[#allocation32_spill] sm:$0xff] %v5628_v24  ;;  %v5630_v32 = vpop.f32.mrb[25].mxu0 }
 0x514   : > { %7273 = vst [vmem:[#allocation33_spill] sm:$0xff] %v5630_v32 }
 0x516   : > { %v5632_v12 = vpop.f32.mrb[26].mxu0 }
 0x517   : > { %7274 = vst [vmem:[#allocation34_spill] sm:$0xff] %v5632_v12  ;;  %v5634_v33 = vpop.f32.mrb[27].mxu0 }
 0x518   : > { %7275 = vst [vmem:[#allocation35_spill] sm:$0xff] %v5634_v33 }
 0x51a   : > { %v5636_v55 = vpop.f32.mrb[28].mxu0 }
 0x51b   : > { %7276 = vst [vmem:[#allocation36_spill] sm:$0xff] %v5636_v55  ;;  %v5638_v61 = vpop.f32.mrb[29].mxu0 }
 0x51c   : > { %7277 = vst [vmem:[#allocation37_spill] sm:$0xff] %v5638_v61 }
 0x51e   : > { %v5640_v5 = vpop.f32.mrb[30].mxu0 }
 0x51f   : > { %7278 = vst [vmem:[#allocation38_spill] sm:$0xff] %v5640_v5  ;;  %v5642_v35 = vpop.f32.mrb[31].mxu0 }
 0x520   : > { %7279 = vst [vmem:[#allocation39_spill] sm:$0xff] %v5642_v35 }
 0x522   : > { %v5644_v34 = vpop.f32.mrb[32].mxu0 }
 0x523   : > { %7280 = vst [vmem:[#allocation40_spill] sm:$0xff] %v5644_v34  ;;  %v5646_v30 = vpop.f32.mrb[33].mxu0 }
 0x524   : > { %7281 = vst [vmem:[#allocation41_spill] sm:$0xff] %v5646_v30 }
 0x526   : > { %v5648_v18 = vpop.f32.mrb[34].mxu0 }
 0x527   : > { %7282 = vst [vmem:[#allocation42_spill] sm:$0xff] %v5648_v18  ;;  %v5650_v25 = vpop.f32.mrb[35].mxu0 }
 0x528   : > { %7283 = vst [vmem:[#allocation43_spill] sm:$0xff] %v5650_v25 }
 0x52a   : > { %v2383_v1 = vpop.f32.mrb[36].mxu0 }
 0x52b   : > { %v2388_v21 = vmul.f32 %v2383_v1, %v4742_v4  ;;  %v2385_v54 = vpop.f32.mrb[37].mxu0 }
 0x52c   : > { %v2389_v10 = vmul.f32 %v2385_v54, %v4742_v4 }
 0x52d   : > { %v2390_v57 = vadd.f32 %v2388_v21, %v4749_v2 }
 0x52e   : > { %v2391_v17 = vadd.f32 %v2389_v10, %v4749_v2 }
 0x52f   : > { %2394 = vrot.lane.b32.xlu0 %v2390_v57, %s4583_s20 }
 0x530   : > { %2396 = vrot.lane.b32.xlu1 %v2391_v17, %s4583_s20 }
 0x536   : > { %v5658_v13 = vpop.f32.mrb[22].mxu1 }
 0x537   : > { %7284 = vst [vmem:[#allocation44_spill] sm:$0xff] %v5658_v13  ;;  %v5660_v11 = vpop.f32.mrb[23].mxu1 }
 0x538   : > { %7285 = vst [vmem:[#allocation45_spill] sm:$0xff] %v5660_v11 }
 0x53a   : > { %v5662_v23 = vpop.f32.mrb[24].mxu1 }
 0x53b   : > { %7286 = vst [vmem:[#allocation46_spill] sm:$0xff] %v5662_v23  ;;  %v5664_v22 = vpop.f32.mrb[25].mxu1 }
 0x53c   : > { %7287 = vst [vmem:[#allocation47_spill] sm:$0xff] %v5664_v22 }
 0x53e   : > { %v5666_v29 = vpop.f32.mrb[26].mxu1 }
 0x53f   : > { %7288 = vst [vmem:[#allocation48_spill] sm:$0xff] %v5666_v29  ;;  %v5668_v9 = vpop.f32.mrb[27].mxu1 }
 0x540   : > { %7289 = vst [vmem:[#allocation49_spill] sm:$0xff] %v5668_v9 }
 0x542   : > { %v5670_v28 = vpop.f32.mrb[28].mxu1 }
 0x543   : > { %7290 = vst [vmem:[#allocation50_spill] sm:$0xff] %v5670_v28  ;;  %v5672_v8 = vpop.f32.mrb[29].mxu1 }
 0x544   : > { %7291 = vst [vmem:[#allocation51_spill] sm:$0xff] %v5672_v8 }
 0x546   : > { %v5674_v58 = vpop.f32.mrb[30].mxu1 }
 0x547   : > { %7292 = vst [vmem:[#allocation52_spill] sm:$0xff] %v5674_v58  ;;  %v5676_v59 = vpop.f32.mrb[31].mxu1 }
 0x548   : > { %7293 = vst [vmem:[#allocation53_spill] sm:$0xff] %v5676_v59 }
 0x54a   : > { %v5678_v63 = vpop.f32.mrb[32].mxu1 }
 0x54b   : > { %7294 = vst [vmem:[#allocation54_spill] sm:$0xff] %v5678_v63  ;;  %v5680_v1 = vpop.f32.mrb[33].mxu1 }
 0x54c   : > { %7295 = vst [vmem:[#allocation55_spill] sm:$0xff] %v5680_v1 }
 0x54e   : > { %v5682_v21 = vpop.f32.mrb[34].mxu1 }
 0x54f   : > { %7296 = vst [vmem:[#allocation56_spill] sm:$0xff] %v5682_v21  ;;  %v5684_v54 = vpop.f32.mrb[35].mxu1 }
 0x550   : > { %7297 = vst [vmem:[#allocation57_spill] sm:$0xff] %v5684_v54 }
 0x552   : > { %v5686_v10 = vpop.f32.mrb[36].mxu1 }
 0x553   : > { %7298 = vst [vmem:[#allocation58_spill] sm:$0xff] %v5686_v10  ;;  %v5688_v57 = vpop.f32.mrb[37].mxu1 }
 0x554   : > { %7299 = vst [vmem:[#allocation59_spill] sm:$0xff] %v5688_v57 }
 0x556   : > { %v2799_v17 = vpop.f32.mrb[38].mxu1 }
 0x557   : > { %v2804_v30 = vmul.f32 %v2799_v17, %v4742_v4  ;;  %v2801_v34 = vpop.f32.mrb[39].mxu1 }
 0x558   : > { %v2805_v25 = vmul.f32 %v2801_v34, %v4742_v4 }
 0x559   : > { %v2806_v18 = vadd.f32 %v2804_v30, %v4749_v2 }
 0x55a   : > { %v2807_v59 = vadd.f32 %v2805_v25, %v4749_v2 }
 0x55b   : > { %2810 = vrot.lane.b32.xlu0 %v2806_v18, %s4583_s20 }
 0x55c   : > { %2812 = vrot.lane.b32.xlu1 %v2807_v59, %s4583_s20 }
 0x5a1   : > { %v2395_v21 = vpop.permute.xlu0 %2394 }
 0x5a2   : > { %v5697_v54 = vsel %vm576_vm1, 0.0, %v2395_v21  ;;  %v2397_v17 = vpop.permute.xlu1 %2396 }
 0x5a3   : > { %2430 = vrot.lane.b32.xlu0 %v5697_v54, %s4585_s22  ;;  %2480 = vrot.lane.b32.xlu1 %v5697_v54, %s4587_s24  ;;  %v2403_v34 = vsel %vm576_vm1, %v2397_v17, 0.0  ;;  %v5712_v30 = vsel %vm576_vm1, %v2395_v21, %v2397_v17  ;;  %v2410_v18 = vmul.f32 %v5697_v54, %v4762_v39  ;;  %v2512_v25 = vmul.f32 %v5697_v54, %v4770_v43 }
 0x5a4   : > { %v2462_v59 = vmul.f32 %v5697_v54, %v4764_v40  ;;  %v2412_v21 = vmul.f32 %v2403_v34, %v4762_v39  ;;  %v2411_v17 = vmul.f32 %v5712_v30, %v4762_v39  ;;  %v2464_v57 = vmul.f32 %v2403_v34, %v4764_v40 }
 0x5a5   : > { %v2404_v12 = vsel %vm4894_vm2, %v5697_v54, 0.0  ;;  %v2405_v37 = vsel %vm4898_vm4, %v5712_v30, 0.0 }
 0x5a7   : > { %2446 = vrot.lane.b32.xlu0 %v5697_v54, %s4584_s21  ;;  %2496 = vrot.lane.b32.xlu1 %v5697_v54, %s4586_s23 }
 0x5ab   : > { %2530 = vrot.lane.b32.xlu0 %v5697_v54, %s4588_s25  ;;  %2434 = vrot.lane.b32.xlu1 %v2403_v34, %s4585_s22 }
 0x5af   : > { %2450 = vrot.lane.b32.xlu1 %v2403_v34, %s4584_s21  ;;  %2432 = vrot.lane.b32.xlu0 %v5712_v30, %s4585_s22 }
 0x5b3   : > { %2482 = vrot.lane.b32.xlu1 %v5712_v30, %s4587_s24  ;;  %2448 = vrot.lane.b32.xlu0 %v5712_v30, %s4584_s21 }
 0x5b7   : > { %2498 = vrot.lane.b32.xlu1 %v5712_v30, %s4586_s23  ;;  %2484 = vrot.lane.b32.xlu0 %v2403_v34, %s4587_s24 }
 0x5bb   : > { %2534 = vrot.lane.b32.xlu1 %v2403_v34, %s4588_s25  ;;  %2500 = vrot.lane.b32.xlu0 %v2403_v34, %s4586_s23 }
 0x5bf   : > { %2416 = vrot.lane.b32.xlu1 %v2410_v18, %s4589_s26  ;;  %2532 = vrot.lane.b32.xlu0 %v5712_v30, %s4588_s25  ;;  %v2463_v18 = vmul.f32 %v5712_v30, %v4764_v40 }
 0x5c3   : > { %2518 = vrot.lane.b32.xlu1 %v2512_v25, %s4590_s28  ;;  %2468 = vrot.lane.b32.xlu0 %v2462_v59, %s4591_s30  ;;  %v2514_v25 = vmul.f32 %v2403_v34, %v4770_v43  ;;  %v2513_v59 = vmul.f32 %v5712_v30, %v4770_v43 }
 0x5c7   : > { %2420 = vrot.lane.b32.xlu1 %v2412_v21, %s4589_s26  ;;  %2418 = vrot.lane.b32.xlu0 %v2411_v17, %s4589_s26 }
 0x5cb   : > { %2470 = vrot.lane.b32.xlu1 %v2463_v18, %s4591_s30  ;;  %2472 = vrot.lane.b32.xlu0 %v2464_v57, %s4591_s30 }
 0x5cd   : > { %v2811_v10 = vpop.permute.xlu0 %2810 }
 0x5ce   : > { %v5753_v21 = vsel %vm576_vm1, 0.0, %v2811_v10  ;;  %v2813_v57 = vpop.permute.xlu1 %2812 }
 0x5cf   : > { %2522 = vrot.lane.b32.xlu1 %v2514_v25, %s4590_s28  ;;  %2520 = vrot.lane.b32.xlu0 %v2513_v59, %s4590_s28  ;;  %v5764_v34 = vsel %vm576_vm1, %v2811_v10, %v2813_v57  ;;  %v2819_v17 = vsel %vm576_vm1, %v2813_v57, 0.0  ;;  %v2826_v10 = vmul.f32 %v5753_v21, %v4762_v39  ;;  %v2878_v25 = vmul.f32 %v5753_v21, %v4764_v40 }
 0x5d0   : > { %v2828_v18 = vmul.f32 %v2819_v17, %v4762_v39  ;;  %v2827_v59 = vmul.f32 %v5764_v34, %v4762_v39  ;;  %v2879_v57 = vmul.f32 %v5764_v34, %v4764_v40 }
 0x5d3   : > { %2896 = vrot.lane.b32.xlu1 %v5753_v21, %s4587_s24  ;;  %2846 = vrot.lane.b32.xlu0 %v5753_v21, %s4585_s22 }
 0x5d7   : > { %2912 = vrot.lane.b32.xlu1 %v5753_v21, %s4586_s23  ;;  %2862 = vrot.lane.b32.xlu0 %v5753_v21, %s4584_s21 }
 0x5db   : > { %2850 = vrot.lane.b32.xlu1 %v2819_v17, %s4585_s22  ;;  %2848 = vrot.lane.b32.xlu0 %v5764_v34, %s4585_s22 }
 0x5df   : > { %2866 = vrot.lane.b32.xlu1 %v2819_v17, %s4584_s21  ;;  %2864 = vrot.lane.b32.xlu0 %v5764_v34, %s4584_s21 }
 0x5e3   : > { %2898 = vrot.lane.b32.xlu1 %v5764_v34, %s4587_s24  ;;  %2900 = vrot.lane.b32.xlu0 %v2819_v17, %s4587_s24 }
 0x5e7   : > { %2914 = vrot.lane.b32.xlu1 %v5764_v34, %s4586_s23  ;;  %2916 = vrot.lane.b32.xlu0 %v2819_v17, %s4586_s23 }
 0x5eb   : > { %2832 = vrot.lane.b32.xlu1 %v2826_v10, %s4589_s26  ;;  %2948 = vrot.lane.b32.xlu0 %v5764_v34, %s4588_s25  ;;  %v2880_v10 = vmul.f32 %v2819_v17, %v4764_v40 }
 0x5ef   : > { %2836 = vrot.lane.b32.xlu1 %v2828_v18, %s4589_s26  ;;  %2884 = vrot.lane.b32.xlu0 %v2878_v25, %s4591_s30  ;;  %v2930_v18 = vmul.f32 %v2819_v17, %v4770_v43  ;;  %v2929_v25 = vmul.f32 %v5764_v34, %v4770_v43 }
 0x5f3   : > { %2950 = vrot.lane.b32.xlu1 %v2819_v17, %s4588_s25  ;;  %2834 = vrot.lane.b32.xlu0 %v2827_v59, %s4589_s26  ;;  %v2928_v59 = vmul.f32 %v5753_v21, %v4770_v43 }
 0x5f7   : > { %2886 = vrot.lane.b32.xlu1 %v2879_v57, %s4591_s30  ;;  %2888 = vrot.lane.b32.xlu0 %v2880_v10, %s4591_s30 }
 0x5fb   : > { %2938 = vrot.lane.b32.xlu1 %v2930_v18, %s4590_s28  ;;  %2936 = vrot.lane.b32.xlu0 %v2929_v25, %s4590_s28 }
 0x5ff   : > { %2934 = vrot.lane.b32.xlu1 %v2928_v59, %s4590_s28  ;;  %2946 = vrot.lane.b32.xlu0 %v5753_v21, %s4588_s25 }
 0x615   : > { %v2431_v57 = vpop.permute.xlu0 %2430  ;;  %v2481_v58 = vpop.permute.xlu1 %2480 }
 0x619   : > { %v2447_v10 = vpop.permute.xlu0 %2446  ;;  %v2497_v61 = vpop.permute.xlu1 %2496 }
 0x61d   : > { %v2531_v17 = vpop.permute.xlu0 %2530  ;;  %v2435_v55 = vpop.permute.xlu1 %2434 }
 0x621   : > { %v2433_v1 = vpop.permute.xlu0 %2432  ;;  %v2451_v63 = vpop.permute.xlu1 %2450 }
 0x622   : > { %v2436_v59 = vsel %vm633_vm3, %v2431_v57, %v2433_v1  ;;  %v2437_v8 = vsel %vm633_vm3, %v2433_v1, %v2435_v55  ;;  %v2406_v1 = vmul.f32 %v2404_v12, %v4778_v47 }
 0x623   : > { %v2440_v27 = vsel %vm4902_vm6, %v2436_v59, 0.0  ;;  %v2441_v55 = vsel %vm4906_vm7, %v2437_v8, 0.0 }
 0x624   : > { %v2442_v12 = vmul.f32 %v2440_v27, %v4766_v41  ;;  %v2443_v7 = vmul.f32 %v2441_v55, %v4766_v41 }
 0x625   : > { %v2449_v35 = vpop.permute.xlu0 %2448  ;;  %v2483_v18 = vpop.permute.xlu1 %2482 }
 0x626   : > { %v2452_v22 = vsel %vm654_vm5, %v2447_v10, %v2449_v35  ;;  %v2453_v23 = vsel %vm654_vm5, %v2449_v35, %v2451_v63  ;;  %v2486_v35 = vsel %vm698_vm8, %v2481_v58, %v2483_v18  ;;  %v2407_v10 = vmul.f32 %v2405_v37, %v4778_v47 }
 0x627   : > { %v2456_v57 = vsel %vm4894_vm2, %v2452_v22, 0.0  ;;  %v2457_v54 = vsel %vm4898_vm4, %v2453_v23, 0.0  ;;  %v2490_v37 = vsel %vm4902_vm6, %v2486_v35, 0.0 }
 0x628   : > { %v2458_v23 = vmul.f32 %v2456_v57, %v4768_v42  ;;  %v2459_v58 = vmul.f32 %v2457_v54, %v4768_v42 }
 0x629   : > { %v2485_v5 = vpop.permute.xlu0 %2484  ;;  %v2499_v25 = vpop.permute.xlu1 %2498 }
 0x62a   : > { %v2487_v52 = vsel %vm698_vm8, %v2483_v18, %v2485_v5  ;;  %v2502_v13 = vsel %vm719_vm10, %v2497_v61, %v2499_v25 }
 0x62b   : > { %v2506_v57 = vsel %vm4894_vm2, %v2502_v13, 0.0 }
 0x62c   : > { %v2508_v13 = vmul.f32 %v2506_v57, %v4774_v45  ;;  %v4279_v57 = vld [vmem:[%s4668_s17 + $0x318] sm:$0xff] }
 0x62d   : > { %v2501_v9 = vpop.permute.xlu0 %2500  ;;  %v2535_v29 = vpop.permute.xlu1 %2534 }
 0x62e   : > { %v2503_v5 = vsel %vm719_vm10, %v2499_v25, %v2501_v9 }
 0x62f   : > { %v2507_v61 = vsel %vm4898_vm4, %v2503_v5, 0.0 }
 0x631   : > { %v2533_v32 = vpop.permute.xlu0 %2532  ;;  %v2417_v24 = vpop.permute.xlu1 %2416 }
 0x635   : > { %v2469_v28 = vpop.permute.xlu0 %2468  ;;  %v2519_v33 = vpop.permute.xlu1 %2518 }
 0x639   : > { %v2419_v63 = vpop.permute.xlu0 %2418  ;;  %v2421_v30 = vpop.permute.xlu1 %2420 }
 0x63a   : > { %v2422_v59 = vsel %vm614_vm9, %v2417_v24, %v2419_v63  ;;  %v2423_v8 = vsel %vm614_vm9, %v2419_v63, %v2421_v30  ;;  %v2491_v24 = vsel %vm4906_vm7, %v2487_v52, 0.0 }
 0x63b   : > { %v2426_v22 = vadd.f32 %v2422_v59, %v2406_v1  ;;  %v2427_v11 = vadd.f32 %v2423_v8, %v2407_v10  ;;  %v2492_v1 = vmul.f32 %v2490_v37, %v4772_v44  ;;  %v2493_v35 = vmul.f32 %v2491_v24, %v4772_v44 }
 0x63d   : > { %v2444_v18 = vadd.f32 %v2442_v12, %v2426_v22  ;;  %v2445_v27 = vadd.f32 %v2443_v7, %v2427_v11  ;;  %v2473_v63 = vpop.permute.xlu0 %2472  ;;  %v2471_v55 = vpop.permute.xlu1 %2470  ;;  %v2536_v7 = vsel %vm763_vm12, %v2531_v17, %v2533_v32  ;;  %v2537_v11 = vsel %vm763_vm12, %v2533_v32, %v2535_v29 }
 0x63e   : > { %v2474_v52 = vsel %vm685_vm11, %v2469_v28, %v2471_v55  ;;  %v2475_v9 = vsel %vm685_vm11, %v2471_v55, %v2473_v63  ;;  %v2509_v12 = vmul.f32 %v2507_v61, %v4774_v45  ;;  %v2540_v28 = vsel %vm4902_vm6, %v2536_v7, 0.0  ;;  %v4283_v7 = vld [vmem:[%s4668_s17 + $0x338] sm:$0xff] }
 0x63f   : > { %v2460_v54 = vadd.f32 %v2458_v23, %v2444_v18  ;;  %v2461_v10 = vadd.f32 %v2459_v58, %v2445_v27  ;;  %v2541_v17 = vsel %vm4906_vm7, %v2537_v11, 0.0  ;;  %v2542_v18 = vmul.f32 %v2540_v28, %v4776_v46  ;;  %v4285_v28 = vld [vmem:[%s4668_s17 + $0x348] sm:$0xff] }
 0x640   : > { %v2543_v27 = vmul.f32 %v2541_v17, %v4776_v46  ;;  %v4287_v17 = vld [vmem:[%s4668_s17 + $0x358] sm:$0xff] }
 0x641   : > { %v2478_v25 = vadd.f32 %v2474_v52, %v2460_v54  ;;  %v2479_v30 = vadd.f32 %v2475_v9, %v2461_v10  ;;  %v2521_v59 = vpop.permute.xlu0 %2520  ;;  %v2523_v8 = vpop.permute.xlu1 %2522  ;;  %v4276_v52 = vld [vmem:[%s4668_s17 + $0x300] sm:$0xff]  ;;  %v4281_v9 = vld [vmem:[%s4668_s17 + $0x328] sm:$0xff] }
 0x642   : > { %v2524_v24 = vsel %vm750_vm13, %v2519_v33, %v2521_v59  ;;  %v2525_v5 = vsel %vm750_vm13, %v2521_v59, %v2523_v8  ;;  %v4278_v33 = vld [vmem:[%s4668_s17 + $0x310] sm:$0xff] }
 0x643   : > { %v2494_v22 = vadd.f32 %v2492_v1, %v2478_v25  ;;  %v2495_v23 = vadd.f32 %v2493_v35, %v2479_v30  ;;  %v4277_v1 = vld [vmem:[%s4668_s17 + $0x308] sm:$0xff]  ;;  %v4480_v59 = vpack.c.bf16 %v4278_v33, %v4276_v52  ;;  %v4288_v52 = vld [vmem:[%s4668_s17 + $0x360] sm:$0xff]  ;;  %v4290_v33 = vld [vmem:[%s4668_s17 + $0x370] sm:$0xff] }
 0x644   : > { %v4478_v30 = vpack.c.bf16 %v4279_v57, %v4277_v1 }
 0x645   : > { %v2510_v58 = vadd.f32 %v2508_v13, %v2494_v22  ;;  %v2511_v32 = vadd.f32 %v2509_v12, %v2495_v23  ;;  %v5858_v29 = vpop.permute.xlu0 %2846  ;;  %v5860_v37 = vpop.permute.xlu1 %2896  ;;  %v4482_v12 = vpack.c.bf16 %v4283_v7, %v4281_v9  ;;  %v4280_v22 = vld [vmem:[%s4668_s17 + $0x320] sm:$0xff]  ;;  %v4282_v23 = vld [vmem:[%s4668_s17 + $0x330] sm:$0xff]  ;;  %v4492_v9 = vpack.c.bf16 %v4290_v33, %v4288_v52 }
 0x647   : > { %v2528_v63 = vadd.f32 %v2524_v24, %v2510_v58  ;;  %v2529_v55 = vadd.f32 %v2525_v5, %v2511_v32  ;;  %v4484_v58 = vpack.c.bf16 %v4282_v23, %v4280_v22  ;;  %v4486_v5 = vpack.c.bf16 %v4287_v17, %v4285_v28 }
 0x648   : > { %v2820_v28 = vsel %vm4894_vm2, %v5753_v21, 0.0 }
 0x649   : > { %v2544_v54 = vadd.f32 %v2542_v18, %v2528_v63  ;;  %v2545_v10 = vadd.f32 %v2543_v27, %v2529_v55  ;;  %v2863_v35 = vpop.permute.xlu0 %2862  ;;  %v5868_v61 = vpop.permute.xlu1 %2912  ;;  %v4284_v18 = vld [vmem:[%s4668_s17 + $0x340] sm:$0xff]  ;;  %v4286_v27 = vld [vmem:[%s4668_s17 + $0x350] sm:$0xff]  ;;  %v4289_v63 = vld [vmem:[%s4668_s17 + $0x368] sm:$0xff] }
 0x64a   : > { %v4291_v55 = vld [vmem:[%s4668_s17 + $0x378] sm:$0xff]  ;;  %v4488_v1 = vpack.c.bf16 %v4286_v27, %v4284_v18 }
 0x64b   : > { %v2546_v11 = vsub.f32 %v2544_v54, %v4979_v19  ;;  %v2547_v25 = vsub.f32 %v2545_v10, %v4982_v20  ;;  %v4490_v10 = vpack.c.bf16 %v4291_v55, %v4289_v63 }
 0x64d   : > { %v2849_v8 = vpop.permute.xlu0 %2848  ;;  %4207 = vmatprep.subr.msk.mxu0 %vm805_vm14, %v2547_v25  ;;  %v2851_v13 = vpop.permute.xlu1 %2850 }
 0x64e   : > { %4208 = vmatpush1.msk.msra.mxu0 %vm805_vm14, %v2546_v11 }
 0x64f   : > { %4209 = vmatmul.mubr.msk.f32.vlgmr.msra.gmra.mrb[38].mxu0 %vm780_vm15, %v5560_v60  ;;  %4479 = vmatprep.subr.bf16.mxu0 %v4478_v30 }
 0x650   : > { %2624 = vmatprep.mubr.f32.mxu0 %v7269_v14  ;;  %4481 = vmatpush1.bf16.msra.mxu0 %v4480_v59  ;;  %v2852_v59 = vsel %vm633_vm3, %v5858_v29, %v2849_v8 }
 0x651   : > { %v2865_v32 = vpop.permute.xlu0 %2864  ;;  %v2867_v24 = vpop.permute.xlu1 %2866  ;;  %4483 = vmatprep.subr.bf16.mxu0 %v4482_v12  ;;  %v2853_v12 = vsel %vm633_vm3, %v2849_v8, %v2851_v13  ;;  %v2856_v29 = vsel %vm4902_vm6, %v2852_v59, 0.0  ;;  %v2822_v13 = vmul.f32 %v2820_v28, %v4778_v47 }
 0x652   : > { %v2868_v17 = vsel %vm654_vm5, %v2863_v35, %v2865_v32  ;;  %v2857_v8 = vsel %vm4906_vm7, %v2853_v12, 0.0  ;;  %v2858_v27 = vmul.f32 %v2856_v29, %v4766_v41 }
 0x653   : > { %4210 = vmatmul.mubr.msk.f32.gmra.mrb[40].mxu0 %vm780_vm15, %v5572_v56  ;;  %v2872_v21 = vsel %vm4894_vm2, %v2868_v17, 0.0 }
 0x654   : > { %2630 = vmatprep.mubr.f32.mxu0 %v7269_v14  ;;  %4485 = vmatpush1.bf16.msra.mxu0 %v4484_v58  ;;  %v2869_v58 = vsel %vm654_vm5, %v2865_v32, %v2867_v24 }
 0x655   : > { %v2901_v57 = vpop.permute.xlu0 %2900  ;;  %v2899_v54 = vpop.permute.xlu1 %2898  ;;  %4487 = vmatprep.subr.bf16.mxu0 %v4486_v5  ;;  %v2821_v5 = vsel %vm4898_vm4, %v5764_v34, 0.0  ;;  %v2873_v35 = vsel %vm4898_vm4, %v2869_v58, 0.0 }
 0x656   : > { %v2902_v34 = vsel %vm698_vm8, %v5860_v37, %v2899_v54  ;;  %v2823_v24 = vmul.f32 %v2821_v5, %v4778_v47  ;;  %v5939_v37 = vld [vmem:[%s7213_s5 + $0x30] sm:$0xff] }
 0x657   : > { %4211 = vmatmul.mubr.msk.f32.gmra.mrb[42].mxu0 %vm780_vm15, %v5582_v0  ;;  %v2906_v59 = vsel %vm4902_vm6, %v2902_v34, 0.0 }
 0x658   : > { %2636 = vmatprep.mubr.f32.mxu0 %v7269_v14  ;;  %4489 = vmatpush1.bf16.msra.mxu0 %v4488_v1  ;;  %v2859_v1 = vmul.f32 %v2857_v8, %v4766_v41  ;;  %v2908_v5 = vmul.f32 %v2906_v59, %v4772_v44 }
 0x659   : > { %v2917_v7 = vpop.permute.xlu0 %2916  ;;  %v2915_v11 = vpop.permute.xlu1 %2914  ;;  %4491 = vmatprep.subr.bf16.mxu0 %v4490_v10  ;;  %v2903_v10 = vsel %vm698_vm8, %v2899_v54, %v2901_v57 }
 0x65a   : > { %v2918_v57 = vsel %vm719_vm10, %v5868_v61, %v2915_v11  ;;  %v2919_v54 = vsel %vm719_vm10, %v2915_v11, %v2917_v7  ;;  %v2907_v58 = vsel %vm4906_vm7, %v2903_v10, 0.0 }
 0x65b   : > { %4212 = vmatmul.mubr.msk.f32.gmra.mrb[44].mxu0 %vm780_vm15, %v5590_v31  ;;  %v2922_v61 = vsel %vm4894_vm2, %v2918_v57, 0.0  ;;  %v2923_v7 = vsel %vm4898_vm4, %v2919_v54, 0.0 }
 0x65c   : > { %2642 = vmatprep.mubr.f32.mxu0 %v7269_v14  ;;  %4493 = vmatpush1.bf16.msra.mxu0 %v4492_v9  ;;  %v2874_v9 = vmul.f32 %v2872_v21, %v4768_v42 }
 0x65d   : > { %v5900_v25 = vpop.permute.xlu0 %2948  ;;  %v2833_v30 = vpop.permute.xlu1 %2832 }
 0x65f   : > { %4213 = vmatmul.mubr.msk.f32.gmra.mrb[46].mxu0 %vm780_vm15, %v5598_v26 }
 0x660   : > { %2648 = vmatprep.mubr.f32.mxu0 %v7269_v14 }
 0x661   : > { %v2885_v22 = vpop.permute.xlu0 %2884  ;;  %v2837_v23 = vpop.permute.xlu1 %2836 }
 0x663   : > { %4214 = vmatmul.mubr.msk.f32.gmra.mrb[48].mxu0 %vm780_vm15, %v5606_v3 }
 0x664   : > { %2654 = vmatprep.mubr.f32.mxu0 %v7269_v14 }
 0x665   : > { %v2835_v32 = vpop.permute.xlu0 %2834  ;;  %v2951_v18 = vpop.permute.xlu1 %2950 }
 0x666   : > { %v2838_v63 = vsel %vm614_vm9, %v2833_v30, %v2835_v32  ;;  %v2839_v55 = vsel %vm614_vm9, %v2835_v32, %v2837_v23  ;;  %v2875_v30 = vmul.f32 %v2873_v35, %v4768_v42  ;;  %v2909_v35 = vmul.f32 %v2907_v58, %v4772_v44 }
 0x667   : > { %v2842_v52 = vadd.f32 %v2838_v63, %v2822_v13  ;;  %v2843_v33 = vadd.f32 %v2839_v55, %v2823_v24  ;;  %4215 = vmatmul.mubr.msk.f32.gmra.mrb[50].mxu0 %vm780_vm15, %v5939_v37  ;;  %v5957_v13 = vld [vmem:[%s7213_s5 + $0x38] sm:$0xff]  ;;  %v2953_v34 = vsel %vm763_vm12, %v5900_v25, %v2951_v18  ;;  %v2924_v55 = vmul.f32 %v2922_v61, %v4774_v45  ;;  %v4319_v61 = vld [vmem:[%s4668_s17 + $0x380] sm:$0xff] }
 0x668   : > { %2660 = vmatprep.mubr.f32.mxu0 %v7269_v14 }
 0x669   : > { %v2860_v12 = vadd.f32 %v2858_v27, %v2842_v52  ;;  %v2861_v23 = vadd.f32 %v2859_v1, %v2843_v33  ;;  %v2889_v28 = vpop.permute.xlu0 %2888  ;;  %v2887_v17 = vpop.permute.xlu1 %2886  ;;  %v2925_v1 = vmul.f32 %v2923_v7, %v4774_v45 }
 0x66a   : > { %v2890_v11 = vsel %vm685_vm11, %v2885_v22, %v2887_v17  ;;  %v2891_v21 = vsel %vm685_vm11, %v2887_v17, %v2889_v28  ;;  %v2957_v22 = vsel %vm4906_vm7, %v2953_v34, 0.0 }
 0x66b   : > { %v2876_v29 = vadd.f32 %v2874_v9, %v2860_v12  ;;  %v2877_v8 = vadd.f32 %v2875_v30, %v2861_v23  ;;  %4216 = vmatmul.mubr.msk.f32.gmra.mrb[52].mxu0 %vm780_vm15, %v5957_v13  ;;  %v2959_v12 = vmul.f32 %v2957_v22, %v4776_v46 }
 0x66c   : > { %3213 = vmatprep.mubr.f32.mxu0 %v7269_v14 }
 0x66d   : > { %v2894_v32 = vadd.f32 %v2890_v11, %v2876_v29  ;;  %v2895_v24 = vadd.f32 %v2891_v21, %v2877_v8  ;;  %v2937_v27 = vpop.permute.xlu0 %2936  ;;  %v2939_v63 = vpop.permute.xlu1 %2938  ;;  %v4322_v29 = vld [vmem:[%s4668_s17 + $0x398] sm:$0xff]  ;;  %v4324_v11 = vld [vmem:[%s4668_s17 + $0x3a8] sm:$0xff] }
 0x66e   : > { %v2941_v59 = vsel %vm750_vm13, %v2937_v27, %v2939_v63  ;;  %v4326_v21 = vld [vmem:[%s4668_s17 + $0x3b8] sm:$0xff]  ;;  %v4323_v63 = vld [vmem:[%s4668_s17 + $0x3a0] sm:$0xff] }
 0x66f   : > { %v2910_v10 = vadd.f32 %v2908_v5, %v2894_v32  ;;  %v2911_v52 = vadd.f32 %v2909_v35, %v2895_v24  ;;  %4292 = vmatmul.mubr.msk.f32.vlgmr.msra.gmra.mrb[54].mxu0 %vm390_vm0, %v5528_v36  ;;  %v4320_v5 = vld [vmem:[%s4668_s17 + $0x388] sm:$0xff] }
 0x670   : > { %3450 = vmatprep.mubr.f32.mxu0 %v7269_v14  ;;  %v4494_v34 = vpack.c.bf16 %v4322_v29, %v4320_v5 }
 0x671   : > { %v2927_v18 = vadd.f32 %v2925_v1, %v2911_v52  ;;  %v2947_v33 = vpop.permute.xlu0 %2946  ;;  %v2926_v9 = vadd.f32 %v2924_v55, %v2910_v10  ;;  %v2935_v30 = vpop.permute.xlu1 %2934  ;;  %v4325_v55 = vld [vmem:[%s4668_s17 + $0x3b0] sm:$0xff]  ;;  %v4328_v1 = vld [vmem:[%s4668_s17 + $0x3c8] sm:$0xff]  ;;  %v4330_v10 = vld [vmem:[%s4668_s17 + $0x3d8] sm:$0xff] }
 0x672   : > { %v2952_v57 = vsel %vm763_vm12, %v2947_v33, %v5900_v25  ;;  %v2940_v54 = vsel %vm750_vm13, %v2935_v30, %v2937_v27  ;;  %v4321_v25 = vld [vmem:[%s4668_s17 + $0x390] sm:$0xff]  ;;  %v4498_v27 = vpack.c.bf16 %v4326_v21, %v4324_v11  ;;  %v4500_v52 = vpack.c.bf16 %v4325_v55, %v4323_v63  ;;  %v4334_v30 = vld [vmem:[%s4668_s17 + $0x3f8] sm:$0xff] }
 0x673   : > { %v2945_v23 = vadd.f32 %v2941_v59, %v2927_v18  ;;  %v2956_v28 = vsel %vm4902_vm6, %v2952_v57, 0.0  ;;  %v2944_v17 = vadd.f32 %v2940_v54, %v2926_v9  ;;  %v4496_v24 = vpack.c.bf16 %v4321_v25, %v4319_v61  ;;  %v4327_v18 = vld [vmem:[%s4668_s17 + $0x3c0] sm:$0xff]  ;;  %v4329_v33 = vld [vmem:[%s4668_s17 + $0x3d0] sm:$0xff]  ;;  %v4332_v9 = vld [vmem:[%s4668_s17 + $0x3e8] sm:$0xff] }
 0x674   : > { %v2958_v58 = vmul.f32 %v2956_v28, %v4776_v46  ;;  %v4502_v22 = vpack.c.bf16 %v4330_v10, %v4328_v1  ;;  %v4506_v59 = vpack.c.bf16 %v4334_v30, %v4332_v9  ;;  %v4331_v57 = vld [vmem:[%s4668_s17 + $0x3e0] sm:$0xff]  ;;  %v4333_v54 = vld [vmem:[%s4668_s17 + $0x3f0] sm:$0xff] }
 0x675   : > { %v2961_v8 = vadd.f32 %v2959_v12, %v2945_v23  ;;  %v4508_v12 = vpack.c.bf16 %v4333_v54, %v4331_v57 }
 0x676   : > { %v2960_v7 = vadd.f32 %v2958_v58, %v2944_v17 }
 0x677   : > { %v2963_v35 = vsub.f32 %v2961_v8, %v4982_v20 }
 0x678   : > { %v2962_v32 = vsub.f32 %v2960_v7, %v4979_v19 }
 0x679   : > { %4250 = vmatprep.subr.msk.mxu1 %vm805_vm14, %v2963_v35 }
 0x67a   : > { %4251 = vmatpush1.msk.msra.mxu1 %vm805_vm14, %v2962_v32 }
 0x67b   : > { %4252 = vmatmul.mubr.msk.f32.vlgmr.msra.gmra.mrb[40].mxu1 %vm780_vm15, %v5560_v60  ;;  %4495 = vmatprep.subr.bf16.mxu1 %v4494_v34  ;;  %v4504_v60 = vpack.c.bf16 %v4329_v33, %v4327_v18 }
 0x67c   : > { %3040 = vmatprep.mubr.f32.mxu1 %v7269_v14  ;;  %4497 = vmatpush1.bf16.msra.mxu1 %v4496_v24 }
 0x67d   : > { %4499 = vmatprep.subr.bf16.mxu1 %v4498_v27 }
 0x67f   : > { %4253 = vmatmul.mubr.msk.f32.gmra.mrb[42].mxu1 %vm780_vm15, %v5572_v56 }
 0x680   : > { %3046 = vmatprep.mubr.f32.mxu1 %v7269_v14  ;;  %4501 = vmatpush1.bf16.msra.mxu1 %v4500_v52 }
 0x681   : > { %4503 = vmatprep.subr.bf16.mxu1 %v4502_v22 }
 0x683   : > { %4254 = vmatmul.mubr.msk.f32.gmra.mrb[44].mxu1 %vm780_vm15, %v5582_v0 }
 0x684   : > { %3052 = vmatprep.mubr.f32.mxu1 %v7269_v14  ;;  %4505 = vmatpush1.bf16.msra.mxu1 %v4504_v60 }
 0x685   : > { %4507 = vmatprep.subr.bf16.mxu1 %v4506_v59 }
 0x687   : > { %4255 = vmatmul.mubr.msk.f32.gmra.mrb[46].mxu1 %vm780_vm15, %v5590_v31 }
 0x688   : > { %3058 = vmatprep.mubr.f32.mxu1 %v7269_v14  ;;  %4509 = vmatpush1.bf16.msra.mxu1 %v4508_v12 }
 0x68b   : > { %4256 = vmatmul.mubr.msk.f32.gmra.mrb[48].mxu1 %vm780_vm15, %v5598_v26 }
 0x68c   : > { %3064 = vmatprep.mubr.f32.mxu1 %v7269_v14 }
 0x68f   : > { %4257 = vmatmul.mubr.msk.f32.gmra.mrb[50].mxu1 %vm780_vm15, %v5606_v3 }
 0x690   : > { %3070 = vmatprep.mubr.f32.mxu1 %v7269_v14 }
 0x693   : > { %4258 = vmatmul.mubr.msk.f32.gmra.mrb[52].mxu1 %vm780_vm15, %v5939_v37 }
 0x694   : > { %3076 = vmatprep.mubr.f32.mxu1 %v7269_v14 }
 0x697   : > { %4259 = vmatmul.mubr.msk.f32.gmra.mrb[54].mxu1 %vm780_vm15, %v5957_v13 }
 0x698   : > { %3629 = vmatprep.mubr.f32.mxu1 %v7269_v14 }
 0x69b   : > { %4335 = vmatmul.mubr.msk.f32.vlgmr.msra.gmra.mrb[56].mxu1 %vm390_vm0, %v5528_v36 }
 0x69c   : > { %3878 = vmatprep.mubr.f32.mxu1 %v7269_v14 }
 0x722   : > { %v6033_v56 = vpop.f32.mrb[38].mxu0 }
 0x723   : > { %v6035_v0 = vpop.f32.mrb[39].mxu0 }
 0x726   : > { %v6037_v31 = vpop.f32.mrb[40].mxu0 }
 0x727   : > { %v6039_v26 = vpop.f32.mrb[41].mxu0 }
 0x72a   : > { %v6041_v3 = vpop.f32.mrb[42].mxu0 }
 0x72b   : > { %7300 = vst [vmem:[#allocation60_spill] sm:$0xff] %v6041_v3  ;;  %v6043_v23 = vpop.f32.mrb[43].mxu0 }
 0x72c   : > { %7301 = vst [vmem:[#allocation61_spill] sm:$0xff] %v6043_v23 }
 0x72e   : > { %v6045_v28 = vpop.f32.mrb[44].mxu0 }
 0x72f   : > { %v6047_v17 = vpop.f32.mrb[45].mxu0 }
 0x730   : > { %7302 = vst [vmem:[#allocation62_spill] sm:$0xff] %v6047_v17 }
 0x732   : > { %v6049_v58 = vpop.f32.mrb[46].mxu0 }
 0x733   : > { %7303 = vst [vmem:[#allocation63_spill] sm:$0xff] %v6049_v58  ;;  %v6051_v36 = vpop.f32.mrb[47].mxu0 }
 0x734   : > { %7304 = vst [vmem:[#allocation64_spill] sm:$0xff] %v6051_v36 }
 0x736   : > { %v6053_v5 = vpop.f32.mrb[48].mxu0 }
 0x737   : > { %7305 = vst [vmem:[#allocation65_spill] sm:$0xff] %v6053_v5  ;;  %v6055_v29 = vpop.f32.mrb[49].mxu0 }
 0x738   : > { %7306 = vst [vmem:[#allocation66_spill] sm:$0xff] %v6055_v29 }
 0x73a   : > { %v6057_v8 = vpop.f32.mrb[50].mxu0 }
 0x73b   : > { %7307 = vst [vmem:[#allocation67_spill] sm:$0xff] %v6057_v8  ;;  %v6059_v61 = vpop.f32.mrb[51].mxu0 }
 0x73c   : > { %7308 = vst [vmem:[#allocation68_spill] sm:$0xff] %v6059_v61 }
 0x73e   : > { %v6061_v25 = vpop.f32.mrb[52].mxu0 }
 0x73f   : > { %7309 = vst [vmem:[#allocation69_spill] sm:$0xff] %v6061_v25  ;;  %v6063_v7 = vpop.f32.mrb[53].mxu0 }
 0x740   : > { %7310 = vst [vmem:[#allocation70_spill] sm:$0xff] %v6063_v7 }
 0x742   : > { %v3215_v11 = vpop.f32.mrb[54].mxu0 }
 0x743   : > { %v3220_v21 = vmul.f32 %v3215_v11, %v4742_v4  ;;  %v3217_v35 = vpop.f32.mrb[55].mxu0 }
 0x744   : > { %v3221_v34 = vmul.f32 %v3217_v35, %v4742_v4 }
 0x745   : > { %v3222_v32 = vadd.f32 %v3220_v21, %v4749_v2 }
 0x746   : > { %v3223_v24 = vadd.f32 %v3221_v34, %v4749_v2 }
 0x747   : > { %3226 = vrot.lane.b32.xlu0 %v3222_v32, %s4583_s20 }
 0x748   : > { %3228 = vrot.lane.b32.xlu1 %v3223_v24, %s4583_s20 }
 0x74e   : > { %v6071_v27 = vpop.f32.mrb[40].mxu1 }
 0x74f   : > { %v6073_v63 = vpop.f32.mrb[41].mxu1 }
 0x752   : > { %v6075_v55 = vpop.f32.mrb[42].mxu1 }
 0x753   : > { %v6077_v1 = vpop.f32.mrb[43].mxu1 }
 0x756   : > { %v6079_v10 = vpop.f32.mrb[44].mxu1 }
 0x757   : > { %7311 = vst [vmem:[#allocation71_spill] sm:$0xff] %v6079_v10  ;;  %v6081_v52 = vpop.f32.mrb[45].mxu1 }
 0x758   : > { %7312 = vst [vmem:[#allocation72_spill] sm:$0xff] %v6081_v52 }
 0x75a   : > { %v6083_v22 = vpop.f32.mrb[46].mxu1 }
 0x75b   : > { %7313 = vst [vmem:[#allocation73_spill] sm:$0xff] %v6083_v22  ;;  %v6085_v18 = vpop.f32.mrb[47].mxu1 }
 0x75c   : > { %7314 = vst [vmem:[#allocation74_spill] sm:$0xff] %v6085_v18 }
 0x75e   : > { %v6087_v33 = vpop.f32.mrb[48].mxu1 }
 0x75f   : > { %7315 = vst [vmem:[#allocation75_spill] sm:$0xff] %v6087_v33  ;;  %v6089_v9 = vpop.f32.mrb[49].mxu1 }
 0x760   : > { %7316 = vst [vmem:[#allocation76_spill] sm:$0xff] %v6089_v9 }
 0x762   : > { %v6091_v30 = vpop.f32.mrb[50].mxu1 }
 0x763   : > { %7317 = vst [vmem:[#allocation77_spill] sm:$0xff] %v6091_v30  ;;  %v6093_v60 = vpop.f32.mrb[51].mxu1 }
 0x764   : > { %7318 = vst [vmem:[#allocation78_spill] sm:$0xff] %v6093_v60 }
 0x766   : > { %v6095_v59 = vpop.f32.mrb[52].mxu1 }
 0x767   : > { %7319 = vst [vmem:[#allocation79_spill] sm:$0xff] %v6095_v59  ;;  %v6097_v57 = vpop.f32.mrb[53].mxu1 }
 0x768   : > { %7320 = vst [vmem:[#allocation80_spill] sm:$0xff] %v6097_v57 }
 0x76a   : > { %v6099_v54 = vpop.f32.mrb[54].mxu1 }
 0x76b   : > { %7321 = vst [vmem:[#allocation81_spill] sm:$0xff] %v6099_v54  ;;  %v6101_v12 = vpop.f32.mrb[55].mxu1 }
 0x76c   : > { %7322 = vst [vmem:[#allocation82_spill] sm:$0xff] %v6101_v12 }
 0x76e   : > { %v3631_v11 = vpop.f32.mrb[56].mxu1 }
 0x76f   : > { %v3636_v21 = vmul.f32 %v3631_v11, %v4742_v4  ;;  %v3633_v35 = vpop.f32.mrb[57].mxu1 }
 0x770   : > { %v3637_v34 = vmul.f32 %v3633_v35, %v4742_v4 }
 0x771   : > { %v3638_v32 = vadd.f32 %v3636_v21, %v4749_v2 }
 0x772   : > { %v3639_v24 = vadd.f32 %v3637_v34, %v4749_v2 }
 0x773   : > { %3642 = vrot.lane.b32.xlu0 %v3638_v32, %s4583_s20 }
 0x774   : > { %3644 = vrot.lane.b32.xlu1 %v3639_v24, %s4583_s20 }
 0x7b9   : > { %v3227_v59 = vpop.permute.xlu0 %3226 }
 0x7ba   : > { %v6110_v57 = vsel %vm576_vm1, 0.0, %v3227_v59  ;;  %v3229_v11 = vpop.permute.xlu1 %3228 }
 0x7bb   : > { %3262 = vrot.lane.b32.xlu0 %v6110_v57, %s4585_s22  ;;  %3312 = vrot.lane.b32.xlu1 %v6110_v57, %s4587_s24  ;;  %v3235_v4 = vsel %vm576_vm1, %v3229_v11, 0.0  ;;  %v6125_v2 = vsel %vm576_vm1, %v3227_v59, %v3229_v11  ;;  %v3242_v59 = vmul.f32 %v6110_v57, %v4762_v39  ;;  %v3344_v21 = vmul.f32 %v6110_v57, %v4770_v43 }
 0x7bc   : > { %v3294_v35 = vmul.f32 %v6110_v57, %v4764_v40  ;;  %v3244_v34 = vmul.f32 %v3235_v4, %v4762_v39  ;;  %v3243_v32 = vmul.f32 %v6125_v2, %v4762_v39  ;;  %v3295_v24 = vmul.f32 %v6125_v2, %v4764_v40 }
 0x7bd   : > { %v3296_v11 = vmul.f32 %v3235_v4, %v4764_v40  ;;  %v3237_v52 = vsel %vm4898_vm4, %v6125_v2, 0.0 }
 0x7bf   : > { %3278 = vrot.lane.b32.xlu0 %v6110_v57, %s4584_s21  ;;  %3328 = vrot.lane.b32.xlu1 %v6110_v57, %s4586_s23 }
 0x7c3   : > { %3362 = vrot.lane.b32.xlu0 %v6110_v57, %s4588_s25  ;;  %3266 = vrot.lane.b32.xlu1 %v3235_v4, %s4585_s22 }
 0x7c7   : > { %3282 = vrot.lane.b32.xlu1 %v3235_v4, %s4584_s21  ;;  %3264 = vrot.lane.b32.xlu0 %v6125_v2, %s4585_s22 }
 0x7cb   : > { %3314 = vrot.lane.b32.xlu1 %v6125_v2, %s4587_s24  ;;  %3280 = vrot.lane.b32.xlu0 %v6125_v2, %s4584_s21 }
 0x7cf   : > { %3330 = vrot.lane.b32.xlu1 %v6125_v2, %s4586_s23  ;;  %3316 = vrot.lane.b32.xlu0 %v3235_v4, %s4587_s24 }
 0x7d3   : > { %3366 = vrot.lane.b32.xlu1 %v3235_v4, %s4588_s25  ;;  %3332 = vrot.lane.b32.xlu0 %v3235_v4, %s4586_s23 }
 0x7d7   : > { %3248 = vrot.lane.b32.xlu1 %v3242_v59, %s4589_s26  ;;  %3364 = vrot.lane.b32.xlu0 %v6125_v2, %s4588_s25  ;;  %v3346_v59 = vmul.f32 %v3235_v4, %v4770_v43 }
 0x7db   : > { %3350 = vrot.lane.b32.xlu1 %v3344_v21, %s4590_s28  ;;  %3300 = vrot.lane.b32.xlu0 %v3294_v35, %s4591_s30  ;;  %v3345_v21 = vmul.f32 %v6125_v2, %v4770_v43 }
 0x7df   : > { %3252 = vrot.lane.b32.xlu1 %v3244_v34, %s4589_s26  ;;  %3250 = vrot.lane.b32.xlu0 %v3243_v32, %s4589_s26 }
 0x7e3   : > { %3302 = vrot.lane.b32.xlu1 %v3295_v24, %s4591_s30  ;;  %3304 = vrot.lane.b32.xlu0 %v3296_v11, %s4591_s30 }
 0x7e5   : > { %v3643_v35 = vpop.permute.xlu0 %3642 }
 0x7e6   : > { %v6166_v34 = vsel %vm576_vm1, 0.0, %v3643_v35  ;;  %v3645_v32 = vpop.permute.xlu1 %3644 }
 0x7e7   : > { %3354 = vrot.lane.b32.xlu1 %v3346_v59, %s4590_s28  ;;  %3352 = vrot.lane.b32.xlu0 %v3345_v21, %s4590_s28  ;;  %v6177_v4 = vsel %vm576_vm1, %v3643_v35, %v3645_v32  ;;  %v3651_v24 = vsel %vm576_vm1, %v3645_v32, 0.0  ;;  %v3658_v11 = vmul.f32 %v6166_v34, %v4762_v39  ;;  %v3710_v21 = vmul.f32 %v6166_v34, %v4764_v40 }
 0x7e8   : > { %v3660_v59 = vmul.f32 %v3651_v24, %v4762_v39  ;;  %v3659_v35 = vmul.f32 %v6177_v4, %v4762_v39  ;;  %v3711_v32 = vmul.f32 %v6177_v4, %v4764_v40  ;;  %v3760_v39 = vmul.f32 %v6166_v34, %v4770_v43 }
 0x7eb   : > { %3728 = vrot.lane.b32.xlu1 %v6166_v34, %s4587_s24  ;;  %3678 = vrot.lane.b32.xlu0 %v6166_v34, %s4585_s22 }
 0x7ef   : > { %3744 = vrot.lane.b32.xlu1 %v6166_v34, %s4586_s23  ;;  %3694 = vrot.lane.b32.xlu0 %v6166_v34, %s4584_s21 }
 0x7f3   : > { %3682 = vrot.lane.b32.xlu1 %v3651_v24, %s4585_s22  ;;  %3680 = vrot.lane.b32.xlu0 %v6177_v4, %s4585_s22 }
 0x7f7   : > { %3698 = vrot.lane.b32.xlu1 %v3651_v24, %s4584_s21  ;;  %3696 = vrot.lane.b32.xlu0 %v6177_v4, %s4584_s21 }
 0x7fb   : > { %3730 = vrot.lane.b32.xlu1 %v6177_v4, %s4587_s24  ;;  %3732 = vrot.lane.b32.xlu0 %v3651_v24, %s4587_s24 }
 0x7ff   : > { %3746 = vrot.lane.b32.xlu1 %v6177_v4, %s4586_s23  ;;  %3748 = vrot.lane.b32.xlu0 %v3651_v24, %s4586_s23 }
 0x803   : > { %3664 = vrot.lane.b32.xlu1 %v3658_v11, %s4589_s26  ;;  %3780 = vrot.lane.b32.xlu0 %v6177_v4, %s4588_s25  ;;  %v3712_v11 = vmul.f32 %v3651_v24, %v4764_v40  ;;  %v326_v40 = vld [vmem:[%s7214_s6 + $0x8] sm:$0xff] }
 0x807   : > { %3668 = vrot.lane.b32.xlu1 %v3660_v59, %s4589_s26  ;;  %3716 = vrot.lane.b32.xlu0 %v3710_v21, %s4591_s30  ;;  %v3762_v59 = vmul.f32 %v3651_v24, %v4770_v43  ;;  %v3761_v21 = vmul.f32 %v6177_v4, %v4770_v43  ;;  %v328_v43 = vld [vmem:[%s7214_s6 + $0x18] sm:$0xff] }
 0x80b   : > { %3782 = vrot.lane.b32.xlu1 %v3651_v24, %s4588_s25  ;;  %3666 = vrot.lane.b32.xlu0 %v3659_v35, %s4589_s26  ;;  %v325_v24 = vld [vmem:[%s7214_s6] sm:$0xff]  ;;  %v327_v35 = vld [vmem:[%s7214_s6 + $0x10] sm:$0xff] }
 0x80f   : > { %3718 = vrot.lane.b32.xlu1 %v3711_v32, %s4591_s30  ;;  %3720 = vrot.lane.b32.xlu0 %v3712_v11, %s4591_s30  ;;  %v329_v32 = vld [vmem:[%s7214_s6 + $0x20] sm:$0xff]  ;;  %v330_v11 = vld [vmem:[%s7214_s6 + $0x28] sm:$0xff] }
 0x813   : > { %3770 = vrot.lane.b32.xlu1 %v3762_v59, %s4590_s28  ;;  %3768 = vrot.lane.b32.xlu0 %v3761_v21, %s4590_s28  ;;  %v331_v59 = vld [vmem:[%s7214_s6 + $0x30] sm:$0xff]  ;;  %v332_v21 = vld [vmem:[%s7214_s6 + $0x38] sm:$0xff] }
 0x817   : > { %3766 = vrot.lane.b32.xlu1 %v3760_v39, %s4590_s28  ;;  %3778 = vrot.lane.b32.xlu0 %v6166_v34, %s4588_s25  ;;  %v333_v39 = vld [vmem:[%s7215_s7] sm:$0xff]  ;;  %s6781_s25 = scalar_lea.vmem %s7216_s8, %s4364_s14 }
 0x81b   : > { %932 = vperm.xlu1 %4549, %v326_v40   ;;  %927 = vperm.xlu0 %4547, %v325_v24   ;;  %v334_v40 = vld [vmem:[%s7215_s7 + $0x8] sm:$0xff]  ;;  %v335_v24 = vld [vmem:[%s7215_s7 + $0x10] sm:$0xff] }
 0x81f   : > { %937 = vperm.xlu1 %4549, %v327_v35   ;;  %942 = vperm.xlu0 %4547, %v328_v43   ;;  %v336_v35 = vld [vmem:[%s7215_s7 + $0x18] sm:$0xff] }
 0x823   : > { %947 = vperm.xlu1 %4549, %v329_v32   ;;  %952 = vperm.xlu0 %4547, %v330_v11   ;;  %v337_v11 = vld [vmem:[%s7215_s7 + $0x20] sm:$0xff] }
 0x827   : > { %957 = vperm.xlu1 %4549, %v331_v59   ;;  %962 = vperm.xlu0 %4547, %v332_v21   ;;  %v338_v59 = vld [vmem:[%s7215_s7 + $0x28] sm:$0xff] }
 0x82b   : > { %983 = vperm.xlu1 %4549, %v333_v39   ;;  %988 = vperm.xlu0 %4547, %v334_v40   ;;  %v339_v40 = vld [vmem:[%s7215_s7 + $0x30] sm:$0xff] }
 0x82d   : > { %v3263_v43 = vpop.permute.xlu0 %3262  ;;  %v3313_v32 = vpop.permute.xlu1 %3312 }
 0x82f   : > { %993 = vperm.xlu1 %4549, %v335_v24   ;;  %998 = vperm.xlu0 %4547, %v336_v35   ;;  %v340_v24 = vld [vmem:[%s7215_s7 + $0x38] sm:$0xff] }
 0x831   : > { %v3279_v21 = vpop.permute.xlu0 %3278  ;;  %v3329_v39 = vpop.permute.xlu1 %3328 }
 0x833   : > { %1003 = vperm.xlu1 %4549, %v337_v11   ;;  %1008 = vperm.xlu0 %4547, %v338_v59  }
 0x835   : > { %v3363_v35 = vpop.permute.xlu0 %3362  ;;  %v3267_v61 = vpop.permute.xlu1 %3266 }
 0x837   : > { %1013 = vperm.xlu1 %4549, %v339_v40   ;;  %1018 = vperm.xlu0 %4547, %v340_v24   ;;  %v3236_v40 = vsel %vm4894_vm2, %v6110_v57, 0.0 }
 0x839   : > { %v3265_v8 = vpop.permute.xlu0 %3264  ;;  %v3283_v12 = vpop.permute.xlu1 %3282 }
 0x83a   : > { %v3268_v58 = vsel %vm633_vm3, %v3263_v43, %v3265_v8  ;;  %v3269_v60 = vsel %vm633_vm3, %v3265_v8, %v3267_v61  ;;  %v3238_v61 = vmul.f32 %v3236_v40, %v4778_v47 }
 0x83b   : > { %v3272_v10 = vsel %vm4902_vm6, %v3268_v58, 0.0  ;;  %v3273_v8 = vsel %vm4906_vm7, %v3269_v60, 0.0 }
 0x83c   : > { %v3274_v40 = vmul.f32 %v3272_v10, %v4766_v41  ;;  %v3275_v3 = vmul.f32 %v3273_v8, %v4766_v41 }
 0x83d   : > { %v3281_v54 = vpop.permute.xlu0 %3280  ;;  %v3315_v7 = vpop.permute.xlu1 %3314 }
 0x83e   : > { %v3284_v24 = vsel %vm654_vm5, %v3279_v21, %v3281_v54  ;;  %v3285_v5 = vsel %vm654_vm5, %v3281_v54, %v3283_v12  ;;  %v3318_v54 = vsel %vm698_vm8, %v3313_v32, %v3315_v7  ;;  %v3239_v21 = vmul.f32 %v3237_v52, %v4778_v47 }
 0x83f   : > { %v3288_v43 = vsel %vm4894_vm2, %v3284_v24, 0.0  ;;  %v3289_v57 = vsel %vm4898_vm4, %v3285_v5, 0.0  ;;  %v3322_v52 = vsel %vm4902_vm6, %v3318_v54, 0.0 }
 0x840   : > { %v3290_v5 = vmul.f32 %v3288_v43, %v4768_v42  ;;  %v3291_v32 = vmul.f32 %v3289_v57, %v4768_v42 }
 0x841   : > { %v3317_v25 = vpop.permute.xlu0 %3316  ;;  %v3331_v9 = vpop.permute.xlu1 %3330 }
 0x842   : > { %v3319_v23 = vsel %vm698_vm8, %v3315_v7, %v3317_v25  ;;  %v3334_v22 = vsel %vm719_vm10, %v3329_v39, %v3331_v9 }
 0x843   : > { %v3338_v43 = vsel %vm4894_vm2, %v3334_v22, 0.0 }
 0x844   : > { %v3340_v22 = vmul.f32 %v3338_v43, %v4774_v45 }
 0x845   : > { %v3333_v11 = vpop.permute.xlu0 %3332  ;;  %v3367_v59 = vpop.permute.xlu1 %3366 }
 0x846   : > { %v3335_v25 = vsel %vm719_vm10, %v3331_v9, %v3333_v11 }
 0x847   : > { %v3339_v39 = vsel %vm4898_vm4, %v3335_v25, 0.0 }
 0x849   : > { %v3365_v33 = vpop.permute.xlu0 %3364  ;;  %v3249_v36 = vpop.permute.xlu1 %3248 }
 0x84d   : > { %v3301_v30 = vpop.permute.xlu0 %3300  ;;  %v3351_v29 = vpop.permute.xlu1 %3350 }
 0x851   : > { %v3251_v12 = vpop.permute.xlu0 %3250  ;;  %v3253_v2 = vpop.permute.xlu1 %3252 }
 0x852   : > { %v3254_v58 = vsel %vm614_vm9, %v3249_v36, %v3251_v12  ;;  %v3255_v60 = vsel %vm614_vm9, %v3251_v12, %v3253_v2  ;;  %v3323_v36 = vsel %vm4906_vm7, %v3319_v23, 0.0 }
 0x853   : > { %v3258_v24 = vadd.f32 %v3254_v58, %v3238_v61  ;;  %v3259_v18 = vadd.f32 %v3255_v60, %v3239_v21  ;;  %v3324_v61 = vmul.f32 %v3322_v52, %v4772_v44  ;;  %v3325_v54 = vmul.f32 %v3323_v36, %v4772_v44 }
 0x855   : > { %v3276_v7 = vadd.f32 %v3274_v40, %v3258_v24  ;;  %v3277_v10 = vadd.f32 %v3275_v3, %v3259_v18  ;;  %v3305_v12 = vpop.permute.xlu0 %3304  ;;  %v3303_v8 = vpop.permute.xlu1 %3302  ;;  %v3368_v3 = vsel %vm763_vm12, %v3363_v35, %v3365_v33  ;;  %v3369_v18 = vsel %vm763_vm12, %v3365_v33, %v3367_v59 }
 0x856   : > { %v3306_v23 = vsel %vm685_vm11, %v3301_v30, %v3303_v8  ;;  %v3307_v9 = vsel %vm685_vm11, %v3303_v8, %v3305_v12  ;;  %v3341_v40 = vmul.f32 %v3339_v39, %v4774_v45  ;;  %v3373_v30 = vsel %vm4906_vm7, %v3369_v18, 0.0 }
 0x857   : > { %v3292_v57 = vadd.f32 %v3290_v5, %v3276_v7  ;;  %v3293_v21 = vadd.f32 %v3291_v32, %v3277_v10  ;;  %v3372_v32 = vsel %vm4902_vm6, %v3368_v3, 0.0  ;;  %v3375_v10 = vmul.f32 %v3373_v30, %v4776_v46  ;;  %v6366_v30 = vld [vmem:[%s7213_s5 + $0x20] sm:$0xff] }
 0x858   : > { %v3374_v7 = vmul.f32 %v3372_v32, %v4776_v46 }
 0x859   : > { %v3310_v11 = vadd.f32 %v3306_v23, %v3292_v57  ;;  %v3311_v2 = vadd.f32 %v3307_v9, %v3293_v21  ;;  %v3353_v58 = vpop.permute.xlu0 %3352  ;;  %v3355_v60 = vpop.permute.xlu1 %3354  ;;  %v6332_v9 = vld [vmem:[%s7213_s5] sm:$0xff] }
 0x85a   : > { %v3356_v59 = vsel %vm750_vm13, %v3351_v29, %v3353_v58  ;;  %v3357_v25 = vsel %vm750_vm13, %v3353_v58, %v3355_v60  ;;  %v6348_v60 = vld [vmem:[%s7213_s5 + $0x10] sm:$0xff] }
 0x85b   : > { %v3326_v24 = vadd.f32 %v3324_v61, %v3310_v11  ;;  %v3327_v5 = vadd.f32 %v3325_v54, %v3311_v2  ;;  %v6340_v11 = vld [vmem:[%s7213_s5 + $0x8] sm:$0xff] }
 0x85d   : > { %v3342_v52 = vadd.f32 %v3340_v22, %v3326_v24  ;;  %v3343_v35 = vadd.f32 %v3341_v40, %v3327_v5  ;;  %v3679_v36 = vpop.permute.xlu0 %3678  ;;  %v3729_v33 = vpop.permute.xlu1 %3728  ;;  %v6356_v24 = vld [vmem:[%s7213_s5 + $0x18] sm:$0xff] }
 0x85f   : > { %v3360_v12 = vadd.f32 %v3356_v59, %v3342_v52  ;;  %v3361_v8 = vadd.f32 %v3357_v25, %v3343_v35 }
 0x861   : > { %v3376_v61 = vadd.f32 %v3374_v7, %v3360_v12  ;;  %v3377_v43 = vadd.f32 %v3375_v10, %v3361_v8  ;;  %v3695_v57 = vpop.permute.xlu0 %3694  ;;  %v6323_v21 = vpop.permute.xlu1 %3744  ;;  %v3652_v7 = vsel %vm4894_vm2, %v6166_v34, 0.0  ;;  %v3653_v8 = vsel %vm4898_vm4, %v6177_v4, 0.0 }
 0x863   : > { %v3378_v54 = vsub.f32 %v3376_v61, %v4979_v19  ;;  %v3379_v39 = vsub.f32 %v3377_v43, %v4982_v20  ;;  %v6386_v61 = vld [vmem:[%s7213_s5 + $0x28] sm:$0xff]  ;;  %v3654_v43 = vmul.f32 %v3652_v7, %v4778_v47 }
 0x865   : > { %v3681_v23 = vpop.permute.xlu0 %3680  ;;  %4293 = vmatprep.subr.msk.mxu0 %vm805_vm14, %v3379_v39  ;;  %v3683_v29 = vpop.permute.xlu1 %3682 }
 0x866   : > { %4294 = vmatpush1.msk.msra.mxu0 %vm805_vm14, %v3378_v54  ;;  %v3684_v52 = vsel %vm633_vm3, %v3679_v36, %v3681_v23  ;;  %v3685_v35 = vsel %vm633_vm3, %v3681_v23, %v3683_v29  ;;  %v3655_v23 = vmul.f32 %v3653_v8, %v4778_v47 }
 0x867   : > { %4295 = vmatmul.mubr.msk.f32.vlgmr.msra.gmra.mrb[56].mxu0 %vm780_vm15, %v6332_v9  ;;  %v3688_v36 = vsel %vm4902_vm6, %v3684_v52, 0.0  ;;  %v3689_v34 = vsel %vm4906_vm7, %v3685_v35, 0.0 }
 0x868   : > { %3456 = vmatprep.mubr.f32.mxu0 %v7269_v14  ;;  %v3691_v35 = vmul.f32 %v3689_v34, %v4766_v41 }
 0x869   : > { %v3697_v3 = vpop.permute.xlu0 %3696  ;;  %v3699_v18 = vpop.permute.xlu1 %3698 }
 0x86a   : > { %v3700_v10 = vsel %vm654_vm5, %v3695_v57, %v3697_v3  ;;  %v3701_v12 = vsel %vm654_vm5, %v3697_v3, %v3699_v18  ;;  %v3690_v3 = vmul.f32 %v3688_v36, %v4766_v41 }
 0x86b   : > { %4296 = vmatmul.mubr.msk.f32.gmra.mrb[58].mxu0 %vm780_vm15, %v6340_v11  ;;  %v3704_v4 = vsel %vm4894_vm2, %v3700_v10, 0.0  ;;  %v3705_v57 = vsel %vm4898_vm4, %v3701_v12, 0.0 }
 0x86c   : > { %3462 = vmatprep.mubr.f32.mxu0 %v7269_v14  ;;  %v3707_v47 = vmul.f32 %v3705_v57, %v4768_v42 }
 0x86d   : > { %v3733_v2 = vpop.permute.xlu0 %3732  ;;  %v3731_v58 = vpop.permute.xlu1 %3730 }
 0x86e   : > { %v3734_v54 = vsel %vm698_vm8, %v3729_v33, %v3731_v58  ;;  %v3735_v7 = vsel %vm698_vm8, %v3731_v58, %v3733_v2  ;;  %v3706_v33 = vmul.f32 %v3704_v4, %v4768_v42 }
 0x86f   : > { %4297 = vmatmul.mubr.msk.f32.gmra.mrb[60].mxu0 %vm780_vm15, %v6348_v60  ;;  %v3738_v12 = vsel %vm4902_vm6, %v3734_v54, 0.0  ;;  %v3739_v36 = vsel %vm4906_vm7, %v3735_v7, 0.0 }
 0x870   : > { %3468 = vmatprep.mubr.f32.mxu0 %v7269_v14  ;;  %v3740_v34 = vmul.f32 %v3738_v12, %v4772_v44 }
 0x871   : > { %v3749_v22 = vpop.permute.xlu0 %3748  ;;  %v3747_v40 = vpop.permute.xlu1 %3746 }
 0x872   : > { %v3751_v41 = vsel %vm719_vm10, %v3747_v40, %v3749_v22 }
 0x873   : > { %4298 = vmatmul.mubr.msk.f32.gmra.mrb[62].mxu0 %vm780_vm15, %v6356_v24 }
 0x874   : > { %3474 = vmatprep.mubr.f32.mxu0 %v7269_v14 }
 0x875   : > { %v6361_v5 = vpop.permute.xlu0 %3780  ;;  %v3665_v32 = vpop.permute.xlu1 %3664 }
 0x877   : > { %4299 = vmatmul.mubr.msk.f32.gmra.mrb[64].mxu0 %vm780_vm15, %v6366_v30 }
 0x878   : > { %3480 = vmatprep.mubr.f32.mxu0 %v7269_v14 }
 0x879   : > { %v3717_v59 = vpop.permute.xlu0 %3716  ;;  %v3669_v25 = vpop.permute.xlu1 %3668 }
 0x87b   : > { %4300 = vmatmul.mubr.msk.f32.gmra.mrb[66].mxu0 %vm780_vm15, %v6386_v61 }
 0x87c   : > { %3486 = vmatprep.mubr.f32.mxu0 %v7269_v14 }
 0x87d   : > { %v3667_v39 = vpop.permute.xlu0 %3666  ;;  %v3783_v29 = vpop.permute.xlu1 %3782 }
 0x87e   : > { %v3670_v18 = vsel %vm614_vm9, %v3665_v32, %v3667_v39  ;;  %v3671_v52 = vsel %vm614_vm9, %v3667_v39, %v3669_v25  ;;  %v3750_v32 = vsel %vm719_vm10, %v6323_v21, %v3747_v40  ;;  %v3755_v21 = vsel %vm4898_vm4, %v3751_v41, 0.0 }
 0x87f   : > { %v3674_v10 = vadd.f32 %v3670_v18, %v3654_v43  ;;  %v3675_v17 = vadd.f32 %v3671_v52, %v3655_v23  ;;  %4301 = vmatmul.mubr.msk.f32.gmra.mrb[68].mxu0 %vm780_vm15, %v5939_v37  ;;  %v3754_v4 = vsel %vm4894_vm2, %v3750_v32, 0.0  ;;  %v3741_v40 = vmul.f32 %v3739_v36, %v4772_v44  ;;  %v7327_v36 = vld [vmem:[#allocation2_spill] sm:$0xff] }
 0x880   : > { %3492 = vmatprep.mubr.f32.mxu0 %v7269_v14  ;;  %v3785_v57 = vsel %vm763_vm12, %v6361_v5, %v3783_v29  ;;  %v3756_v48 = vmul.f32 %v3754_v4, %v4774_v45  ;;  %v3757_v50 = vmul.f32 %v3755_v21, %v4774_v45  ;;  %v7330_v4 = vld [vmem:[#allocation17_spill] sm:$0xff] }
 0x881   : > { %v3692_v2 = vadd.f32 %v3690_v3, %v3674_v10  ;;  %v3693_v58 = vadd.f32 %v3691_v35, %v3675_v17  ;;  %v3721_v25 = vpop.permute.xlu0 %3720  ;;  %v3719_v8 = vpop.permute.xlu1 %3718 }
 0x882   : > { %v3722_v17 = vsel %vm685_vm11, %v3717_v59, %v3719_v8  ;;  %v3723_v22 = vsel %vm685_vm11, %v3719_v8, %v3721_v25  ;;  %v3789_v59 = vsel %vm4906_vm7, %v3785_v57, 0.0 }
 0x883   : > { %v3708_v42 = vadd.f32 %v3706_v33, %v3692_v2  ;;  %v3709_v43 = vadd.f32 %v3707_v47, %v3693_v58  ;;  %4302 = vmatmul.mubr.msk.f32.gmra.mrb[70].mxu0 %vm780_vm15, %v5957_v13  ;;  %v3791_v12 = vmul.f32 %v3789_v59, %v4776_v46  ;;  %v7337_v59 = vld [vmem:[#allocation6_spill] sm:$0xff] }
 0x884   : > { %3866 = vmatprep.mubr.f32.mxu0 %v7269_v14 }
 0x885   : > { %v3726_v54 = vadd.f32 %v3722_v17, %v3708_v42  ;;  %v3727_v39 = vadd.f32 %v3723_v22, %v3709_v43  ;;  %v3769_v23 = vpop.permute.xlu0 %3768  ;;  %v3771_v3 = vpop.permute.xlu1 %3770  ;;  %v7328_v42 = vld [vmem:[#allocation3_spill] sm:$0xff]  ;;  %v7329_v43 = vld [vmem:[#allocation16_spill] sm:$0xff]  ;;  %v7333_v17 = vld [vmem:[#allocation30_spill] sm:$0xff] }
 0x886   : > { %v3773_v33 = vsel %vm750_vm13, %v3769_v23, %v3771_v3 }
 0x887   : > { %v3742_v18 = vadd.f32 %v3740_v34, %v3726_v54  ;;  %v3743_v52 = vadd.f32 %v3741_v40, %v3727_v39  ;;  %v7334_v40 = vld [vmem:[#allocation31_spill] sm:$0xff]  ;;  %v7335_v54 = vld [vmem:[#allocation46_spill] sm:$0xff] }
 0x889   : > { %v3759_v35 = vadd.f32 %v3757_v50, %v3743_v52  ;;  %v3779_v7 = vpop.permute.xlu0 %3778  ;;  %v3758_v10 = vadd.f32 %v3756_v48, %v3742_v18  ;;  %v3767_v44 = vpop.permute.xlu1 %3766 }
 0x88a   : > { %v3784_v29 = vsel %vm763_vm12, %v3779_v7, %v6361_v5  ;;  %v3772_v47 = vsel %vm750_vm13, %v3767_v44, %v3769_v23  ;;  %v7336_v23 = vld [vmem:[#allocation47_spill] sm:$0xff] }
 0x88b   : > { %v3777_v32 = vadd.f32 %v3773_v33, %v3759_v35  ;;  %v3788_v45 = vsel %vm4902_vm6, %v3784_v29, 0.0  ;;  %v3776_v41 = vadd.f32 %v3772_v47, %v3758_v10  ;;  %v7342_v33 = vld [vmem:[#allocation35_spill] sm:$0xff]  ;;  %v7343_v47 = vld [vmem:[#allocation50_spill] sm:$0xff] }
 0x88c   : > { %v3790_v53 = vmul.f32 %v3788_v45, %v4776_v46 }
 0x88d   : > { %v3793_v2 = vadd.f32 %v3791_v12, %v3777_v32  ;;  %v7344_v32 = vld [vmem:[#allocation51_spill] sm:$0xff] }
 0x88e   : > { %v3792_v58 = vadd.f32 %v3790_v53, %v3776_v41 }
 0x88f   : > { %v3795_v25 = vsub.f32 %v3793_v2, %v4982_v20 }
 0x890   : > { %v3794_v8 = vsub.f32 %v3792_v58, %v4979_v19  ;;  %v7347_v58 = vld [vmem:[#allocation62_spill] sm:$0xff] }
 0x891   : > { %4336 = vmatprep.subr.msk.mxu0 %vm805_vm14, %v3795_v25  ;;  %4510 = vmatprep.subr.msk.mxu1 %vm805_vm14, %v3795_v25 }
 0x892   : > { %4337 = vmatpush1.msk.msra.mxu0 %vm805_vm14, %v3794_v8  ;;  %4511 = vmatpush1.msk.msra.mxu1 %vm805_vm14, %v3794_v8  ;;  %v7348_v8 = vld [vmem:[#allocation73_spill] sm:$0xff] }
 0x893   : > { %4338 = vmatmul.mubr.msk.f32.vlgmr.msra.gmra.mrb[72].mxu0 %vm780_vm15, %v6332_v9  ;;  %4340 = vmatmul.mubr.msk.f32.vlgmr.msra.gmra.mrb[58].mxu1 %vm780_vm15, %v6348_v60 }
 0x894   : > { %3872 = vmatprep.mubr.f32.mxu0 %v7269_v14  ;;  %3884 = vmatprep.mubr.f32.mxu1 %v7269_v14 }
 0x897   : > { %4339 = vmatmul.mubr.msk.f32.gmra.mrb[74].mxu0 %vm780_vm15, %v6340_v11  ;;  %4341 = vmatmul.mubr.msk.f32.gmra.mrb[60].mxu1 %vm780_vm15, %v6356_v24 }
 0x898   : > { %3890 = vmatprep.mubr.f32.mxu1 %v7269_v14 }
 0x89a   : > { %v6459_v46 = vpop.permute.xlu0 %927  ;;  %v6461_v51 = vpop.permute.xlu1 %932 }
 0x89b   : > { %7323 = vst [vmem:[#allocation83_spill] sm:$0xff] %v6459_v46  ;;  %7324 = vst [vmem:[#allocation84_spill] sm:$0xff] %v6461_v51  ;;  %v6465_v19 = vmul.f32 %v6459_v46, %v5182_v6  ;;  %v6469_v20 = vmul.f32 %v6459_v46, %v5184_v49  ;;  %v6473_v9 = vmul.f32 %v5220_v15, %v6459_v46  ;;  %4342 = vmatmul.mubr.msk.f32.gmra.mrb[62].mxu1 %vm780_vm15, %v6366_v30  ;;  %v7325_v49 = vld [vmem:[#allocation44_spill] sm:$0xff]  ;;  %v7326_v15 = vld [vmem:[#allocation45_spill] sm:$0xff] }
 0x89c   : > { %v6477_v11 = vmul.f32 %v5222_v16, %v6459_v46  ;;  %v6483_v60 = vmul.f32 %v5620_v62, %v6459_v46  ;;  %v6487_v6 = vmul.f32 %v5622_v38, %v6459_v46  ;;  %v6491_v24 = vmul.f32 %v7325_v49, %v6459_v46  ;;  %3896 = vmatprep.mubr.f32.mxu1 %v7269_v14 }
 0x89d   : > { %v6495_v5 = vmul.f32 %v7326_v15, %v6459_v46  ;;  %v6500_v16 = vmul.f32 %v6033_v56, %v6459_v46  ;;  %v6504_v62 = vmul.f32 %v6035_v0, %v6459_v46  ;;  %v6508_v38 = vmul.f32 %v6071_v27, %v6459_v46  ;;  %v7349_v15 = vld [vmem:[#allocation74_spill] sm:$0xff] }
 0x89e   : > { %v6512_v30 = vmul.f32 %v6073_v63, %v6459_v46  ;;  %v6516_v34 = vmul.f32 %v6461_v51, %v7327_v36  ;;  %v6520_v56 = vmul.f32 %v6461_v51, %v7328_v42  ;;  %v6524_v0 = vmul.f32 %v7329_v43, %v6461_v51  ;;  %v6530_v21 = vpop.permute.xlu0 %942  ;;  %v6532_v63 = vpop.permute.xlu1 %937  ;;  %v7350_v42 = vld [vmem:[#allocation4_spill] sm:$0xff] }
 0x89f   : > { %v6528_v27 = vmul.f32 %v7330_v4, %v6461_v51  ;;  %7331 = vst [vmem:[#allocation44_spill] sm:$0xff] %v6530_v21  ;;  %7332 = vst [vmem:[#allocation45_spill] sm:$0xff] %v6532_v63  ;;  %v6536_v22 = vmul.f32 %v7333_v17, %v6461_v51  ;;  %v6540_v57 = vmul.f32 %v7334_v40, %v6461_v51  ;;  %4343 = vmatmul.mubr.msk.f32.gmra.mrb[64].mxu1 %vm780_vm15, %v6386_v61  ;;  %v7352_v17 = vld [vmem:[#allocation18_spill] sm:$0xff] }
 0x8a0   : > { %v6544_v39 = vmul.f32 %v7335_v54, %v6461_v51  ;;  %v6548_v3 = vmul.f32 %v7336_v23, %v6461_v51  ;;  %v6554_v48 = vmul.f32 %v6037_v31, %v6461_v51  ;;  %v6558_v50 = vmul.f32 %v6039_v26, %v6461_v51  ;;  %3902 = vmatprep.mubr.f32.mxu1 %v7269_v14  ;;  %v7338_v31 = vld [vmem:[#allocation7_spill] sm:$0xff]  ;;  %v7339_v26 = vld [vmem:[#allocation20_spill] sm:$0xff] }
 0x8a1   : > { %v6562_v18 = vmul.f32 %v6075_v55, %v6461_v51  ;;  %v6566_v52 = vmul.f32 %v6077_v1, %v6461_v51  ;;  %v6571_v61 = vmul.f32 %v6530_v21, %v7337_v59  ;;  %v6575_v35 = vmul.f32 %v6530_v21, %v7338_v31  ;;  %v7340_v55 = vld [vmem:[#allocation21_spill] sm:$0xff]  ;;  %v7341_v1 = vld [vmem:[#allocation34_spill] sm:$0xff]  ;;  %v7353_v54 = vld [vmem:[#allocation19_spill] sm:$0xff] }
 0x8a2   : > { %v6579_v7 = vmul.f32 %v7339_v26, %v6530_v21  ;;  %v6583_v10 = vmul.f32 %v7340_v55, %v6530_v21  ;;  %v6587_v44 = vmul.f32 %v7341_v1, %v6530_v21  ;;  %v6591_v29 = vmul.f32 %v7342_v33, %v6530_v21  ;;  %v6601_v41 = vpop.permute.xlu0 %952  ;;  %v6603_v53 = vpop.permute.xlu1 %947  ;;  %v7355_v31 = vld [vmem:[#allocation33_spill] sm:$0xff]  ;;  %v7356_v55 = vld [vmem:[#allocation48_spill] sm:$0xff] }
 0x8a3   : > { %v6595_v12 = vmul.f32 %v7343_v47, %v6530_v21  ;;  %v6599_v45 = vmul.f32 %v7344_v32, %v6530_v21  ;;  %7345 = vst [vmem:[#allocation2_spill] sm:$0xff] %v6601_v41  ;;  %7346 = vst [vmem:[#allocation3_spill] sm:$0xff] %v6603_v53  ;;  %v6607_v2 = vmul.f32 %v6045_v28, %v6530_v21  ;;  %4344 = vmatmul.mubr.msk.f32.gmra.mrb[66].mxu1 %vm780_vm15, %v5939_v37  ;;  %v7351_v28 = vld [vmem:[#allocation5_spill] sm:$0xff]  ;;  %v7354_v37 = vld [vmem:[#allocation32_spill] sm:$0xff] }
 0x8a4   : > { %v6611_v25 = vmul.f32 %v7347_v58, %v6530_v21  ;;  %v6615_v49 = vmul.f32 %v7348_v8, %v6530_v21  ;;  %v6619_v36 = vmul.f32 %v7349_v15, %v6530_v21  ;;  %v6625_v43 = vmul.f32 %v6532_v63, %v7350_v42  ;;  %3908 = vmatprep.mubr.f32.mxu1 %v7269_v14  ;;  %v7357_v33 = vld [vmem:[#allocation49_spill] sm:$0xff]  ;;  %v7358_v32 = vld [vmem:[#allocation60_spill] sm:$0xff]  ;;  %v7360_v15 = vld [vmem:[#allocation71_spill] sm:$0xff] }
 0x8a5   : > { %v6629_v4 = vmul.f32 %v6532_v63, %v7351_v28  ;;  %v6633_v40 = vmul.f32 %v7352_v17, %v6532_v63  ;;  %v6637_v23 = vmul.f32 %v7353_v54, %v6532_v63  ;;  %v6642_v59 = vmul.f32 %v7354_v37, %v6532_v63  ;;  %v7359_v14 = vld [vmem:[#allocation61_spill] sm:$0xff]  ;;  %v7361_v28 = vld [vmem:[#allocation72_spill] sm:$0xff]  ;;  %v7363_v37 = vld [vmem:[#allocation10_spill] sm:$0xff] }
 0x8a6   : > { %v6646_v26 = vmul.f32 %v7355_v31, %v6532_v63  ;;  %v6650_v1 = vmul.f32 %v7356_v55, %v6532_v63  ;;  %v6654_v47 = vmul.f32 %v7357_v33, %v6532_v63  ;;  %v6658_v58 = vmul.f32 %v7358_v32, %v6532_v63  ;;  %v6672_v54 = vpop.permute.xlu0 %962  ;;  %v7364_v55 = vld [vmem:[#allocation11_spill] sm:$0xff]  ;;  %v7365_v32 = vld [vmem:[#allocation24_spill] sm:$0xff] }
 0x8a7   : > { %v6662_v8 = vmul.f32 %v7359_v14, %v6532_v63  ;;  %v6666_v42 = vmul.f32 %v7360_v15, %v6532_v63  ;;  %v6670_v17 = vmul.f32 %v7361_v28, %v6532_v63  ;;  %7362 = vst [vmem:[#allocation16_spill] sm:$0xff] %v6672_v54  ;;  %v6676_v31 = vmul.f32 %v6601_v41, %v7363_v37  ;;  %v7366_v15 = vld [vmem:[#allocation25_spill] sm:$0xff]  ;;  %v6690_v28 = vpop.permute.xlu1 %957  ;;  %v7369_v37 = vld [vmem:[#allocation38_spill] sm:$0xff] }
 0x8a8   : > { %v6680_v33 = vmul.f32 %v6601_v41, %v7364_v55  ;;  %v6684_v14 = vmul.f32 %v7365_v32, %v6601_v41  ;;  %v6688_v21 = vmul.f32 %v7366_v15, %v6601_v41  ;;  %7368 = vst [vmem:[#allocation30_spill] sm:$0xff] %v6690_v28  ;;  %4345 = vmatmul.mubr.msk.f32.gmra.mrb[68].mxu1 %vm780_vm15, %v5957_v13  ;;  %v7371_v55 = vld [vmem:[#allocation39_spill] sm:$0xff]  ;;  %v7373_v32 = vld [vmem:[#allocation54_spill] sm:$0xff]  ;;  %v7377_v28 = vld [vmem:[#allocation65_spill] sm:$0xff] }
 0x8a9   : > { %v6696_v63 = vmul.f32 %v7369_v37, %v6601_v41  ;;  %v6700_v51 = vmul.f32 %v7371_v55, %v6601_v41  ;;  %v6704_v46 = vmul.f32 %v7373_v32, %v6601_v41  ;;  %v7375_v15 = vld [vmem:[#allocation55_spill] sm:$0xff]  ;;  %v7379_v13 = vld [vmem:[#allocation66_spill] sm:$0xff] }
 0x8aa   : > { %7367 = vst [vmem:[#allocation17_spill] sm:$0xff] %v6688_v21  ;;  %v6708_v54 = vmul.f32 %v7375_v15, %v6601_v41  ;;  %v6712_v21 = vmul.f32 %v7377_v28, %v6601_v41  ;;  %v6716_v37 = vmul.f32 %v7379_v13, %v6601_v41  ;;  %v7383_v32 = vld [vmem:[#allocation78_spill] sm:$0xff] }
 0x8ab   : > { %7370 = vst [vmem:[#allocation31_spill] sm:$0xff] %v6696_v63  ;;  %7372 = vst [vmem:[#allocation46_spill] sm:$0xff] %v6700_v51  ;;  %v7381_v63 = vld [vmem:[#allocation77_spill] sm:$0xff]  ;;  %v7385_v51 = vld [vmem:[#allocation8_spill] sm:$0xff] }
 0x8ac   : > { %7374 = vst [vmem:[#allocation47_spill] sm:$0xff] %v6704_v46  ;;  %7376 = vst [vmem:[#allocation6_spill] sm:$0xff] %v6708_v54  ;;  %v6720_v55 = vmul.f32 %v7381_v63, %v6601_v41  ;;  %v6724_v46 = vmul.f32 %v7383_v32, %v6601_v41  ;;  %v6728_v15 = vmul.f32 %v6603_v53, %v7385_v51  ;;  %v7387_v54 = vld [vmem:[#allocation9_spill] sm:$0xff]  ;;  %v7389_v13 = vld [vmem:[#allocation22_spill] sm:$0xff] }
 0x8ad   : > { %7378 = vst [vmem:[#allocation7_spill] sm:$0xff] %v6712_v21  ;;  %7380 = vst [vmem:[#allocation20_spill] sm:$0xff] %v6716_v37  ;;  %v6732_v28 = vmul.f32 %v6603_v53, %v7387_v54  ;;  %v6736_v37 = vmul.f32 %v7389_v13, %v6603_v53  ;;  %v7391_v21 = vld [vmem:[#allocation23_spill] sm:$0xff]  ;;  %v7393_v32 = vld [vmem:[#allocation36_spill] sm:$0xff] }
 0x8ae   : > { %7382 = vst [vmem:[#allocation21_spill] sm:$0xff] %v6720_v55  ;;  %7384 = vst [vmem:[#allocation34_spill] sm:$0xff] %v6724_v46  ;;  %v6740_v63 = vmul.f32 %v7391_v21, %v6603_v53  ;;  %v6742_v55 = vpop.permute.xlu0 %988  ;;  %v6746_v41 = vmul.f32 %v7393_v32, %v6603_v53  ;;  %v7395_v51 = vld [vmem:[#allocation37_spill] sm:$0xff]  ;;  %v7397_v54 = vld [vmem:[#allocation52_spill] sm:$0xff] }
 0x8af   : > { %7386 = vst [vmem:[#allocation35_spill] sm:$0xff] %v6728_v15  ;;  %7388 = vst [vmem:[#allocation50_spill] sm:$0xff] %v6732_v28  ;;  %v6750_v15 = vmul.f32 %v7395_v51, %v6603_v53  ;;  %v6754_v28 = vmul.f32 %v7397_v54, %v6603_v53  ;;  %v7398_v13 = vld [vmem:[#allocation53_spill] sm:$0xff]  ;;  %v7399_v21 = vld [vmem:[#allocation63_spill] sm:$0xff] }
 0x8b0   : > { %7390 = vst [vmem:[#allocation51_spill] sm:$0xff] %v6736_v37  ;;  %7392 = vst [vmem:[#allocation62_spill] sm:$0xff] %v6740_v63  ;;  %v6758_v37 = vmul.f32 %v7398_v13, %v6603_v53  ;;  %v6762_v63 = vmul.f32 %v7399_v21, %v6603_v53  ;;  %v7400_v46 = vld [vmem:[#allocation64_spill] sm:$0xff]  ;;  %v1439_v13 = vadd.f32 %v6528_v27, %v6742_v55  ;;  %v6791_v21 = vpop.permute.xlu1 %983 }
 0x8b1   : > { %7394 = vst [vmem:[#allocation73_spill] sm:$0xff] %v6746_v41  ;;  %7396 = vst [vmem:[#allocation74_spill] sm:$0xff] %v6750_v15  ;;  %v6766_v32 = vmul.f32 %v7400_v46, %v6603_v53  ;;  %v7401_v41 = vld [vmem:[#allocation75_spill] sm:$0xff]  ;;  %v7402_v15 = vld [vmem:[#allocation76_spill] sm:$0xff]  ;;  %v1023_v46 = vadd.f32 %v6742_v55, %v6516_v34  ;;  %v1855_v34 = vadd.f32 %v6540_v57, %v6742_v55 }
 0x8b2   : > { %v6770_v51 = vmul.f32 %v7401_v41, %v6603_v53  ;;  %v6774_v54 = vmul.f32 %v7402_v15, %v6603_v53  ;;  %v1024_v41 = vadd.f32 %v6742_v55, %v6520_v56  ;;  %v1438_v15 = vadd.f32 %v6524_v0, %v6742_v55  ;;  %4091 = vst [vmem:[%s6781_s25 + $0x98] sm:$0xff] %v1439_v13 }
 0x8b3   : > { %v1854_v53 = vadd.f32 %v6536_v22, %v6742_v55  ;;  %v2270_v56 = vadd.f32 %v6544_v39, %v6742_v55  ;;  %v2271_v0 = vadd.f32 %v6548_v3, %v6742_v55  ;;  %1039 = vst [vmem:[%s6781_s25 + $0x10] sm:$0xff] %v1023_v46  ;;  %v2685_v27 = vadd.f32 %v6554_v48, %v6742_v55 }
 0x8b4   : > { %1040 = vst [vmem:[%s6781_s25 + $0x18] sm:$0xff] %v1024_v41  ;;  %4090 = vst [vmem:[%s6781_s25 + $0x90] sm:$0xff] %v1438_v15  ;;  %v2686_v22 = vadd.f32 %v6558_v50, %v6742_v55  ;;  %v3101_v57 = vadd.f32 %v6562_v18, %v6742_v55  ;;  %v3102_v39 = vadd.f32 %v6566_v52, %v6742_v55  ;;  %v6825_v52 = vpop.permute.xlu0 %998 }
 0x8b5   : > { %4133 = vst [vmem:[%s6781_s25 + $0x110] sm:$0xff] %v1854_v53  ;;  %4134 = vst [vmem:[%s6781_s25 + $0x118] sm:$0xff] %v1855_v34  ;;  %v1021_v3 = vadd.f32 %v6791_v21, %v6465_v19  ;;  %v1022_v48 = vadd.f32 %v6791_v21, %v6469_v20  ;;  %v1436_v50 = vadd.f32 %v6473_v9, %v6791_v21 }
 0x8b6   : > { %4176 = vst [vmem:[%s6781_s25 + $0x190] sm:$0xff] %v2270_v56  ;;  %4177 = vst [vmem:[%s6781_s25 + $0x198] sm:$0xff] %v2271_v0  ;;  %v1437_v18 = vadd.f32 %v6477_v11, %v6791_v21  ;;  %v1852_v19 = vadd.f32 %v6483_v60, %v6791_v21  ;;  %v1853_v20 = vadd.f32 %v6487_v6, %v6791_v21  ;;  %v7407_v0 = vld [vmem:[#allocation6_spill] sm:$0xff] }
 0x8b7   : > { %4219 = vst [vmem:[%s6781_s25 + $0x210] sm:$0xff] %v2685_v27  ;;  %4220 = vst [vmem:[%s6781_s25 + $0x218] sm:$0xff] %v2686_v22  ;;  %v2268_v9 = vadd.f32 %v6491_v24, %v6791_v21  ;;  %v2269_v11 = vadd.f32 %v6495_v5, %v6791_v21  ;;  %v2683_v53 = vadd.f32 %v6500_v16, %v6791_v21  ;;  %v7408_v22 = vld [vmem:[#allocation7_spill] sm:$0xff] }
 0x8b8   : > { %4262 = vst [vmem:[%s6781_s25 + $0x290] sm:$0xff] %v3101_v57  ;;  %4263 = vst [vmem:[%s6781_s25 + $0x298] sm:$0xff] %v3102_v39  ;;  %v2684_v60 = vadd.f32 %v6504_v62, %v6791_v21  ;;  %v3099_v6 = vadd.f32 %v6508_v38, %v6791_v21  ;;  %v3100_v24 = vadd.f32 %v6512_v30, %v6791_v21  ;;  %v6863_v30 = vpop.permute.xlu1 %993  ;;  %v7409_v39 = vld [vmem:[#allocation20_spill] sm:$0xff] }
 0x8b9   : > { %1037 = vst [vmem:[%s6781_s25] sm:$0xff] %v1021_v3  ;;  %1038 = vst [vmem:[%s6781_s25 + $0x8] sm:$0xff] %v1022_v48  ;;  %v1027_v5 = vadd.f32 %v6825_v52, %v6571_v61  ;;  %v1028_v16 = vadd.f32 %v6825_v52, %v6575_v35  ;;  %v1442_v62 = vadd.f32 %v6579_v7, %v6825_v52  ;;  %v7410_v48 = vld [vmem:[#allocation21_spill] sm:$0xff] }
 0x8ba   : > { %4088 = vst [vmem:[%s6781_s25 + $0x80] sm:$0xff] %v1436_v50  ;;  %4089 = vst [vmem:[%s6781_s25 + $0x88] sm:$0xff] %v1437_v18  ;;  %v1443_v38 = vadd.f32 %v6583_v10, %v6825_v52  ;;  %v1858_v61 = vadd.f32 %v6587_v44, %v6825_v52  ;;  %v1859_v35 = vadd.f32 %v6591_v29, %v6825_v52  ;;  %v7411_v18 = vld [vmem:[#allocation34_spill] sm:$0xff] }
 0x8bb   : > { %4131 = vst [vmem:[%s6781_s25 + $0x100] sm:$0xff] %v1852_v19  ;;  %4132 = vst [vmem:[%s6781_s25 + $0x108] sm:$0xff] %v1853_v20  ;;  %v2274_v7 = vadd.f32 %v6595_v12, %v6825_v52  ;;  %v2275_v10 = vadd.f32 %v6599_v45, %v6825_v52  ;;  %v2689_v46 = vadd.f32 %v6607_v2, %v6825_v52  ;;  %v7412_v20 = vld [vmem:[#allocation35_spill] sm:$0xff] }
 0x8bc   : > { %4174 = vst [vmem:[%s6781_s25 + $0x180] sm:$0xff] %v2268_v9  ;;  %4175 = vst [vmem:[%s6781_s25 + $0x188] sm:$0xff] %v2269_v11  ;;  %v2690_v44 = vadd.f32 %v6611_v25, %v6825_v52  ;;  %v3105_v29 = vadd.f32 %v6615_v49, %v6825_v52  ;;  %v3106_v12 = vadd.f32 %v6619_v36, %v6825_v52  ;;  %v6901_v36 = vpop.permute.xlu0 %1008  ;;  %v6939_v15 = vpop.permute.xlu1 %1003  ;;  %v7413_v11 = vld [vmem:[#allocation50_spill] sm:$0xff] }
 0x8bd   : > { %4217 = vst [vmem:[%s6781_s25 + $0x200] sm:$0xff] %v2683_v53  ;;  %4218 = vst [vmem:[%s6781_s25 + $0x208] sm:$0xff] %v2684_v60  ;;  %v1025_v45 = vadd.f32 %v6863_v30, %v6625_v43  ;;  %v1026_v2 = vadd.f32 %v6863_v30, %v6629_v4  ;;  %v1440_v25 = vadd.f32 %v6633_v40, %v6863_v30  ;;  %v7414_v60 = vld [vmem:[#allocation51_spill] sm:$0xff] }
 0x8be   : > { %4260 = vst [vmem:[%s6781_s25 + $0x280] sm:$0xff] %v3099_v6  ;;  %4261 = vst [vmem:[%s6781_s25 + $0x288] sm:$0xff] %v3100_v24  ;;  %v1441_v49 = vadd.f32 %v6637_v23, %v6863_v30  ;;  %v1856_v43 = vadd.f32 %v6642_v59, %v6863_v30  ;;  %v1857_v4 = vadd.f32 %v6646_v26, %v6863_v30  ;;  %v7415_v24 = vld [vmem:[#allocation62_spill] sm:$0xff] }
 0x8bf   : > { %1043 = vst [vmem:[%s6781_s25 + $0x30] sm:$0xff] %v1027_v5  ;;  %1044 = vst [vmem:[%s6781_s25 + $0x38] sm:$0xff] %v1028_v16  ;;  %v2272_v40 = vadd.f32 %v6650_v1, %v6863_v30  ;;  %v2273_v23 = vadd.f32 %v6654_v47, %v6863_v30  ;;  %v2687_v41 = vadd.f32 %v6658_v58, %v6863_v30  ;;  %v7416_v16 = vld [vmem:[#allocation73_spill] sm:$0xff] }
 0x8c0   : > { %4094 = vst [vmem:[%s6781_s25 + $0xb0] sm:$0xff] %v1442_v62  ;;  %4095 = vst [vmem:[%s6781_s25 + $0xb8] sm:$0xff] %v1443_v38  ;;  %v2688_v59 = vadd.f32 %v6662_v8, %v6863_v30  ;;  %v3103_v26 = vadd.f32 %v6666_v42, %v6863_v30  ;;  %v3104_v1 = vadd.f32 %v6670_v17, %v6863_v30  ;;  %v7403_v42 = vld [vmem:[#allocation17_spill] sm:$0xff]  ;;  %v7417_v38 = vld [vmem:[#allocation74_spill] sm:$0xff] }
 0x8c1   : > { %4137 = vst [vmem:[%s6781_s25 + $0x130] sm:$0xff] %v1858_v61  ;;  %4138 = vst [vmem:[%s6781_s25 + $0x138] sm:$0xff] %v1859_v35  ;;  %v1031_v47 = vadd.f32 %v6901_v36, %v6676_v31  ;;  %v1032_v58 = vadd.f32 %v6901_v36, %v6680_v33  ;;  %v1446_v8 = vadd.f32 %v6684_v14, %v6901_v36  ;;  %v7404_v31 = vld [vmem:[#allocation31_spill] sm:$0xff]  ;;  %v7405_v33 = vld [vmem:[#allocation46_spill] sm:$0xff] }
 0x8c2   : > { %4180 = vst [vmem:[%s6781_s25 + $0x1b0] sm:$0xff] %v2274_v7  ;;  %4181 = vst [vmem:[%s6781_s25 + $0x1b8] sm:$0xff] %v2275_v10  ;;  %v1447_v17 = vadd.f32 %v7403_v42, %v6901_v36  ;;  %v1862_v13 = vadd.f32 %v7404_v31, %v6901_v36  ;;  %v1863_v34 = vadd.f32 %v7405_v33, %v6901_v36  ;;  %v7406_v14 = vld [vmem:[#allocation47_spill] sm:$0xff]  ;;  %v7429_v42 = vld [vmem:[#allocation81_spill] sm:$0xff] }
 0x8c3   : > { %4223 = vst [vmem:[%s6781_s25 + $0x230] sm:$0xff] %v2689_v46  ;;  %4224 = vst [vmem:[%s6781_s25 + $0x238] sm:$0xff] %v2690_v44  ;;  %v2278_v56 = vadd.f32 %v7406_v14, %v6901_v36  ;;  %v2279_v27 = vadd.f32 %v7407_v0, %v6901_v36  ;;  %v2693_v57 = vadd.f32 %v7408_v22, %v6901_v36  ;;  %v7418_v44 = vld [vmem:[#allocation14_spill] sm:$0xff] }
 0x8c4   : > { %4266 = vst [vmem:[%s6781_s25 + $0x2b0] sm:$0xff] %v3105_v29  ;;  %4267 = vst [vmem:[%s6781_s25 + $0x2b8] sm:$0xff] %v3106_v12  ;;  %v2694_v3 = vadd.f32 %v7409_v39, %v6901_v36  ;;  %v3109_v50 = vadd.f32 %v7410_v48, %v6901_v36  ;;  %v3110_v19 = vadd.f32 %v7411_v18, %v6901_v36  ;;  %v7419_v29 = vld [vmem:[#allocation16_spill] sm:$0xff]  ;;  %v7430_v31 = vld [vmem:[#allocation82_spill] sm:$0xff] }
 0x8c5   : > { %1041 = vst [vmem:[%s6781_s25 + $0x20] sm:$0xff] %v1025_v45  ;;  %1042 = vst [vmem:[%s6781_s25 + $0x28] sm:$0xff] %v1026_v2  ;;  %v1029_v9 = vadd.f32 %v6939_v15, %v7412_v20  ;;  %v1030_v53 = vadd.f32 %v6939_v15, %v7413_v11  ;;  %v1444_v6 = vadd.f32 %v7414_v60, %v6939_v15  ;;  %v7420_v45 = vld [vmem:[#allocation15_spill] sm:$0xff]  ;;  %v7421_v2 = vld [vmem:[#allocation28_spill] sm:$0xff] }
 0x8c6   : > { %4092 = vst [vmem:[%s6781_s25 + $0xa0] sm:$0xff] %v1440_v25  ;;  %4093 = vst [vmem:[%s6781_s25 + $0xa8] sm:$0xff] %v1441_v49  ;;  %v1445_v5 = vadd.f32 %v7415_v24, %v6939_v15  ;;  %v1860_v62 = vadd.f32 %v7416_v16, %v6939_v15  ;;  %v1861_v61 = vadd.f32 %v7417_v38, %v6939_v15  ;;  %v7431_v18 = vld [vmem:[#allocation12_spill] sm:$0xff]  ;;  %v7437_v38 = vld [vmem:[#allocation41_spill] sm:$0xff] }
 0x8c7   : > { %4135 = vst [vmem:[%s6781_s25 + $0x120] sm:$0xff] %v1856_v43  ;;  %4136 = vst [vmem:[%s6781_s25 + $0x128] sm:$0xff] %v1857_v4  ;;  %v2276_v35 = vadd.f32 %v6754_v28, %v6939_v15  ;;  %v2277_v7 = vadd.f32 %v6758_v37, %v6939_v15  ;;  %v2691_v10 = vadd.f32 %v6762_v63, %v6939_v15  ;;  %v7424_v4 = vld [vmem:[#allocation43_spill] sm:$0xff]  ;;  %v7436_v16 = vld [vmem:[#allocation40_spill] sm:$0xff] }
 0x8c8   : > { %4178 = vst [vmem:[%s6781_s25 + $0x1a0] sm:$0xff] %v2272_v40  ;;  %4179 = vst [vmem:[%s6781_s25 + $0x1a8] sm:$0xff] %v2273_v23  ;;  %v2692_v46 = vadd.f32 %v6766_v32, %v6939_v15  ;;  %v3107_v28 = vadd.f32 %v6770_v51, %v6939_v15  ;;  %v3108_v37 = vadd.f32 %v6774_v54, %v6939_v15  ;;  %v7422_v32 = vld [vmem:[#allocation29_spill] sm:$0xff]  ;;  %v7013_v51 = vpop.permute.xlu0 %1018  ;;  %v7423_v54 = vld [vmem:[#allocation42_spill] sm:$0xff] }
 0x8c9   : > { %4221 = vst [vmem:[%s6781_s25 + $0x220] sm:$0xff] %v2687_v41  ;;  %4222 = vst [vmem:[%s6781_s25 + $0x228] sm:$0xff] %v2688_v59  ;;  %v979_v12 = vmul.f32 %v7419_v29, %v7418_v44  ;;  %v980_v63 = vmul.f32 %v7419_v29, %v7420_v45  ;;  %v1434_v25 = vmul.f32 %v7421_v2, %v7419_v29  ;;  %v7425_v23 = vld [vmem:[#allocation58_spill] sm:$0xff]  ;;  %v7426_v59 = vld [vmem:[#allocation59_spill] sm:$0xff] }
 0x8ca   : > { %4264 = vst [vmem:[%s6781_s25 + $0x2a0] sm:$0xff] %v3103_v26  ;;  %4265 = vst [vmem:[%s6781_s25 + $0x2a8] sm:$0xff] %v3104_v1  ;;  %v1435_v49 = vmul.f32 %v7422_v32, %v7419_v29  ;;  %v1850_v43 = vmul.f32 %v7423_v54, %v7419_v29  ;;  %v1851_v40 = vmul.f32 %v7424_v4, %v7419_v29  ;;  %v7427_v1 = vld [vmem:[#allocation69_spill] sm:$0xff]  ;;  %v7441_v44 = vld [vmem:[#allocation68_spill] sm:$0xff] }
 0x8cb   : > { %1047 = vst [vmem:[%s6781_s25 + $0x50] sm:$0xff] %v1031_v47  ;;  %1048 = vst [vmem:[%s6781_s25 + $0x58] sm:$0xff] %v1032_v58  ;;  %v2266_v41 = vmul.f32 %v7425_v23, %v7419_v29  ;;  %v2267_v26 = vmul.f32 %v7426_v59, %v7419_v29  ;;  %v2681_v47 = vmul.f32 %v7427_v1, %v7419_v29  ;;  %v7428_v58 = vld [vmem:[#allocation70_spill] sm:$0xff]  ;;  %v7442_v45 = vld [vmem:[#allocation79_spill] sm:$0xff] }
 0x8cc   : > { %4098 = vst [vmem:[%s6781_s25 + $0xd0] sm:$0xff] %v1446_v8  ;;  %4099 = vst [vmem:[%s6781_s25 + $0xd8] sm:$0xff] %v1447_v17  ;;  %v2682_v8 = vmul.f32 %v7428_v58, %v7419_v29  ;;  %v3097_v17 = vmul.f32 %v7429_v42, %v7419_v29  ;;  %v1035_v33 = vadd.f32 %v7013_v51, %v979_v12  ;;  %v7443_v2 = vld [vmem:[#allocation80_spill] sm:$0xff] }
 0x8cd   : > { %4141 = vst [vmem:[%s6781_s25 + $0x150] sm:$0xff] %v1862_v13  ;;  %4142 = vst [vmem:[%s6781_s25 + $0x158] sm:$0xff] %v1863_v34  ;;  %v3098_v13 = vmul.f32 %v7430_v31, %v7419_v29  ;;  %v1036_v34 = vadd.f32 %v7013_v51, %v980_v63  ;;  %v1450_v14 = vadd.f32 %v1434_v25, %v7013_v51 }
 0x8ce   : > { %4184 = vst [vmem:[%s6781_s25 + $0x1d0] sm:$0xff] %v2278_v56  ;;  %4185 = vst [vmem:[%s6781_s25 + $0x1d8] sm:$0xff] %v2279_v27  ;;  %v1451_v56 = vadd.f32 %v1435_v49, %v7013_v51  ;;  %v1866_v0 = vadd.f32 %v1850_v43, %v7013_v51  ;;  %v1867_v27 = vadd.f32 %v1851_v40, %v7013_v51 }
 0x8cf   : > { %4227 = vst [vmem:[%s6781_s25 + $0x250] sm:$0xff] %v2693_v57  ;;  %4228 = vst [vmem:[%s6781_s25 + $0x258] sm:$0xff] %v2694_v3  ;;  %v2282_v22 = vadd.f32 %v2266_v41, %v7013_v51  ;;  %v2283_v57 = vadd.f32 %v2267_v26, %v7013_v51  ;;  %v2697_v39 = vadd.f32 %v2681_v47, %v7013_v51 }
 0x8d0   : > { %4270 = vst [vmem:[%s6781_s25 + $0x2d0] sm:$0xff] %v3109_v50  ;;  %4271 = vst [vmem:[%s6781_s25 + $0x2d8] sm:$0xff] %v3110_v19  ;;  %v2698_v3 = vadd.f32 %v2682_v8, %v7013_v51  ;;  %v3113_v48 = vadd.f32 %v3097_v17, %v7013_v51  ;;  %v3114_v50 = vadd.f32 %v3098_v13, %v7013_v51  ;;  %v7432_v19 = vld [vmem:[#allocation30_spill] sm:$0xff]  ;;  %v7444_v8 = vld [vmem:[#allocation83_spill] sm:$0xff] }
 0x8d1   : > { %1045 = vst [vmem:[%s6781_s25 + $0x40] sm:$0xff] %v1029_v9  ;;  %1046 = vst [vmem:[%s6781_s25 + $0x48] sm:$0xff] %v1030_v53  ;;  %v977_v20 = vmul.f32 %v7432_v19, %v7431_v18  ;;  %v7433_v9 = vld [vmem:[#allocation13_spill] sm:$0xff]  ;;  %v7434_v53 = vld [vmem:[#allocation26_spill] sm:$0xff]  ;;  %v2680_v12 = vmul.f32 %v7441_v44, %v7432_v19  ;;  %v3095_v63 = vmul.f32 %v7442_v45, %v7432_v19 }
 0x8d2   : > { %4096 = vst [vmem:[%s6781_s25 + $0xc0] sm:$0xff] %v1444_v6  ;;  %4097 = vst [vmem:[%s6781_s25 + $0xc8] sm:$0xff] %v1445_v5  ;;  %v978_v11 = vmul.f32 %v7432_v19, %v7433_v9  ;;  %v1432_v60 = vmul.f32 %v7434_v53, %v7432_v19  ;;  %v7435_v6 = vld [vmem:[#allocation27_spill] sm:$0xff]  ;;  %v7063_v5 = vpop.permute.xlu1 %1013  ;;  %v3096_v25 = vmul.f32 %v7443_v2, %v7432_v19  ;;  %v7447_v53 = vld [vmem:[#allocation44_spill] sm:$0xff] }
 0x8d3   : > { %4139 = vst [vmem:[%s6781_s25 + $0x140] sm:$0xff] %v1860_v62  ;;  %4140 = vst [vmem:[%s6781_s25 + $0x148] sm:$0xff] %v1861_v61  ;;  %v1433_v24 = vmul.f32 %v7435_v6, %v7432_v19  ;;  %v1848_v62 = vmul.f32 %v7436_v16, %v7432_v19  ;;  %v1849_v61 = vmul.f32 %v7437_v38, %v7432_v19  ;;  %v7449_v44 = vld [vmem:[#allocation2_spill] sm:$0xff] }
 0x8d4   : > { %4182 = vst [vmem:[%s6781_s25 + $0x1c0] sm:$0xff] %v2276_v35  ;;  %4183 = vst [vmem:[%s6781_s25 + $0x1c8] sm:$0xff] %v2277_v7  ;;  %v7438_v35 = vld [vmem:[#allocation56_spill] sm:$0xff]  ;;  %v1033_v32 = vadd.f32 %v7063_v5, %v977_v20  ;;  %v1034_v49 = vadd.f32 %v7063_v5, %v978_v11  ;;  %v1448_v54 = vadd.f32 %v1432_v60, %v7063_v5 }
 0x8d5   : > { %4225 = vst [vmem:[%s6781_s25 + $0x240] sm:$0xff] %v2691_v10  ;;  %4226 = vst [vmem:[%s6781_s25 + $0x248] sm:$0xff] %v2692_v46  ;;  %v2264_v7 = vmul.f32 %v7438_v35, %v7432_v19  ;;  %v7439_v10 = vld [vmem:[#allocation57_spill] sm:$0xff]  ;;  %v1449_v43 = vadd.f32 %v1433_v24, %v7063_v5  ;;  %v1864_v4 = vadd.f32 %v1848_v62, %v7063_v5 }
 0x8d6   : > { %4268 = vst [vmem:[%s6781_s25 + $0x2c0] sm:$0xff] %v3107_v28  ;;  %4269 = vst [vmem:[%s6781_s25 + $0x2c8] sm:$0xff] %v3108_v37  ;;  %v2265_v46 = vmul.f32 %v7439_v10, %v7432_v19  ;;  %v7440_v28 = vld [vmem:[#allocation67_spill] sm:$0xff]  ;;  %v1865_v40 = vadd.f32 %v1849_v61, %v7063_v5  ;;  %v2696_v26 = vadd.f32 %v2680_v12, %v7063_v5 }
 0x8d7   : > { %1051 = vst [vmem:[%s6781_s25 + $0x70] sm:$0xff] %v1035_v33  ;;  %1052 = vst [vmem:[%s6781_s25 + $0x78] sm:$0xff] %v1036_v34  ;;  %v2679_v37 = vmul.f32 %v7440_v28, %v7432_v19  ;;  %v2280_v23 = vadd.f32 %v2264_v7, %v7063_v5  ;;  %v3111_v1 = vadd.f32 %v3095_v63, %v7063_v5  ;;  %v7448_v61 = vld [vmem:[#allocation3_spill] sm:$0xff] }
 0x8d8   : > { %4102 = vst [vmem:[%s6781_s25 + $0xf0] sm:$0xff] %v1450_v14  ;;  %4103 = vst [vmem:[%s6781_s25 + $0xf8] sm:$0xff] %v1451_v56  ;;  %v2281_v41 = vadd.f32 %v2265_v46, %v7063_v5  ;;  %v3112_v47 = vadd.f32 %v3096_v25, %v7063_v5  ;;  %v7445_v14 = vld [vmem:[#allocation84_spill] sm:$0xff] }
 0x8d9   : > { %4145 = vst [vmem:[%s6781_s25 + $0x170] sm:$0xff] %v1866_v0  ;;  %4146 = vst [vmem:[%s6781_s25 + $0x178] sm:$0xff] %v1867_v27  ;;  %v2695_v59 = vadd.f32 %v2679_v37, %v7063_v5 }
 0x8da   : > { %4188 = vst [vmem:[%s6781_s25 + $0x1f0] sm:$0xff] %v2282_v22  ;;  %4189 = vst [vmem:[%s6781_s25 + $0x1f8] sm:$0xff] %v2283_v57 }
 0x8db   : > { %4231 = vst [vmem:[%s6781_s25 + $0x270] sm:$0xff] %v2697_v39  ;;  %4232 = vst [vmem:[%s6781_s25 + $0x278] sm:$0xff] %v2698_v3  ;;  %v7446_v3 = vld [vmem:[#allocation45_spill] sm:$0xff] }
 0x8dc   : > { %4274 = vst [vmem:[%s6781_s25 + $0x2f0] sm:$0xff] %v3113_v48  ;;  %4275 = vst [vmem:[%s6781_s25 + $0x2f8] sm:$0xff] %v3114_v50 }
 0x8dd   : > { %1049 = vst [vmem:[%s6781_s25 + $0x60] sm:$0xff] %v1033_v32  ;;  %1050 = vst [vmem:[%s6781_s25 + $0x68] sm:$0xff] %v1034_v49 }
 0x8de   : > { %4100 = vst [vmem:[%s6781_s25 + $0xe0] sm:$0xff] %v1448_v54  ;;  %4101 = vst [vmem:[%s6781_s25 + $0xe8] sm:$0xff] %v1449_v43 }
 0x8df   : > { %4143 = vst [vmem:[%s6781_s25 + $0x160] sm:$0xff] %v1864_v4  ;;  %4144 = vst [vmem:[%s6781_s25 + $0x168] sm:$0xff] %v1865_v40 }
 0x8e0   : > { %4186 = vst [vmem:[%s6781_s25 + $0x1e0] sm:$0xff] %v2280_v23  ;;  %4187 = vst [vmem:[%s6781_s25 + $0x1e8] sm:$0xff] %v2281_v41 }
 0x8e1   : > { %4229 = vst [vmem:[%s6781_s25 + $0x260] sm:$0xff] %v2695_v59  ;;  %4230 = vst [vmem:[%s6781_s25 + $0x268] sm:$0xff] %v2696_v26 }
 0x8e2   : > { %4272 = vst [vmem:[%s6781_s25 + $0x2e0] sm:$0xff] %v3111_v1  ;;  %4273 = vst [vmem:[%s6781_s25 + $0x2e8] sm:$0xff] %v3112_v47 }
 0x93a   : > { %v3452_v58 = vpop.f32.mrb[56].mxu0 }
 0x93b   : > { %v3499_v42 = vmul.f32 %v3452_v58, %v7444_v8  ;;  %v3454_v17 = vpop.f32.mrb[57].mxu0 }
 0x93c   : > { %v3500_v31 = vmul.f32 %v3454_v17, %v7444_v8 }
 0x93d   : > { %v3515_v13 = vadd.f32 %v3499_v42, %v6791_v21 }
 0x93e   : > { %v3516_v33 = vadd.f32 %v3500_v31, %v6791_v21  ;;  %v3458_v34 = vpop.f32.mrb[58].mxu0 }
 0x93f   : > { %4303 = vst [vmem:[%s6781_s25 + $0x300] sm:$0xff] %v3515_v13  ;;  %v3501_v56 = vmul.f32 %v3458_v34, %v7445_v14  ;;  %v3460_v0 = vpop.f32.mrb[59].mxu0 }
 0x940   : > { %4304 = vst [vmem:[%s6781_s25 + $0x308] sm:$0xff] %v3516_v33  ;;  %v3502_v27 = vmul.f32 %v3460_v0, %v7445_v14 }
 0x941   : > { %v3517_v22 = vadd.f32 %v3501_v56, %v6742_v55 }
 0x942   : > { %v3518_v57 = vadd.f32 %v3502_v27, %v6742_v55  ;;  %v3464_v39 = vpop.f32.mrb[60].mxu0 }
 0x943   : > { %4305 = vst [vmem:[%s6781_s25 + $0x310] sm:$0xff] %v3517_v22  ;;  %v3503_v48 = vmul.f32 %v3464_v39, %v7446_v3  ;;  %v3466_v50 = vpop.f32.mrb[61].mxu0 }
 0x944   : > { %4306 = vst [vmem:[%s6781_s25 + $0x318] sm:$0xff] %v3518_v57  ;;  %v3504_v18 = vmul.f32 %v3466_v50, %v7446_v3 }
 0x945   : > { %v3519_v20 = vadd.f32 %v3503_v48, %v6863_v30 }
 0x946   : > { %v3520_v9 = vadd.f32 %v3504_v18, %v6863_v30  ;;  %v3470_v11 = vpop.f32.mrb[62].mxu0 }
 0x947   : > { %4307 = vst [vmem:[%s6781_s25 + $0x320] sm:$0xff] %v3519_v20  ;;  %v3505_v60 = vmul.f32 %v3470_v11, %v7447_v53  ;;  %v3472_v6 = vpop.f32.mrb[63].mxu0 }
 0x948   : > { %4308 = vst [vmem:[%s6781_s25 + $0x328] sm:$0xff] %v3520_v9  ;;  %v3506_v24 = vmul.f32 %v3472_v6, %v7447_v53 }
 0x949   : > { %v3521_v16 = vadd.f32 %v3505_v60, %v6825_v52 }
 0x94a   : > { %v3522_v62 = vadd.f32 %v3506_v24, %v6825_v52  ;;  %v3476_v38 = vpop.f32.mrb[64].mxu0 }
 0x94b   : > { %4309 = vst [vmem:[%s6781_s25 + $0x330] sm:$0xff] %v3521_v16  ;;  %v3507_v35 = vmul.f32 %v3476_v38, %v7448_v61  ;;  %v3478_v7 = vpop.f32.mrb[65].mxu0 }
 0x94c   : > { %4310 = vst [vmem:[%s6781_s25 + $0x338] sm:$0xff] %v3522_v62  ;;  %v3508_v10 = vmul.f32 %v3478_v7, %v7448_v61 }
 0x94d   : > { %v3523_v46 = vadd.f32 %v3507_v35, %v6939_v15 }
 0x94e   : > { %v3524_v28 = vadd.f32 %v3508_v10, %v6939_v15  ;;  %v3482_v37 = vpop.f32.mrb[66].mxu0 }
 0x94f   : > { %4311 = vst [vmem:[%s6781_s25 + $0x340] sm:$0xff] %v3523_v46  ;;  %v3509_v12 = vmul.f32 %v3482_v37, %v7449_v44  ;;  %v3484_v45 = vpop.f32.mrb[67].mxu0 }
 0x950   : > { %4312 = vst [vmem:[%s6781_s25 + $0x348] sm:$0xff] %v3524_v28  ;;  %v3510_v63 = vmul.f32 %v3484_v45, %v7449_v44 }
 0x951   : > { %v3525_v2 = vadd.f32 %v3509_v12, %v6901_v36 }
 0x952   : > { %v3526_v25 = vadd.f32 %v3510_v63, %v6901_v36  ;;  %v3488_v32 = vpop.f32.mrb[68].mxu0 }
 0x953   : > { %4313 = vst [vmem:[%s6781_s25 + $0x350] sm:$0xff] %v3525_v2  ;;  %v3511_v49 = vmul.f32 %v3488_v32, %v7432_v19  ;;  %v3490_v54 = vpop.f32.mrb[69].mxu0 }
 0x954   : > { %4314 = vst [vmem:[%s6781_s25 + $0x358] sm:$0xff] %v3526_v25  ;;  %v3512_v43 = vmul.f32 %v3490_v54, %v7432_v19 }
 0x955   : > { %v3527_v4 = vadd.f32 %v3511_v49, %v7063_v5 }
 0x956   : > { %v3528_v40 = vadd.f32 %v3512_v43, %v7063_v5  ;;  %v3494_v23 = vpop.f32.mrb[70].mxu0 }
 0x957   : > { %4315 = vst [vmem:[%s6781_s25 + $0x360] sm:$0xff] %v3527_v4  ;;  %v3513_v41 = vmul.f32 %v3494_v23, %v7419_v29  ;;  %v3496_v59 = vpop.f32.mrb[71].mxu0 }
 0x958   : > { %4316 = vst [vmem:[%s6781_s25 + $0x368] sm:$0xff] %v3528_v40  ;;  %v3514_v26 = vmul.f32 %v3496_v59, %v7419_v29 }
 0x959   : > { %v3529_v1 = vadd.f32 %v3513_v41, %v7013_v51 }
 0x95a   : > { %v3530_v47 = vadd.f32 %v3514_v26, %v7013_v51 }
 0x95b   : > { %4317 = vst [vmem:[%s6781_s25 + $0x370] sm:$0xff] %v3529_v1 }
 0x95c   : > { %4318 = vst [vmem:[%s6781_s25 + $0x378] sm:$0xff] %v3530_v47 }
 0x966   : > { %v3868_v58 = vpop.f32.mrb[72].mxu0  ;;  %v3880_v42 = vpop.f32.mrb[58].mxu1 }
 0x967   : > { %v3915_v17 = vmul.f32 %v3868_v58, %v7444_v8  ;;  %v3870_v31 = vpop.f32.mrb[73].mxu0  ;;  %v3919_v13 = vmul.f32 %v3880_v42, %v7446_v3  ;;  %v3882_v33 = vpop.f32.mrb[59].mxu1 }
 0x968   : > { %v3916_v34 = vmul.f32 %v3870_v31, %v7444_v8  ;;  %v3920_v56 = vmul.f32 %v3882_v33, %v7446_v3 }
 0x969   : > { %v3931_v0 = vadd.f32 %v3915_v17, %v6791_v21  ;;  %v3935_v27 = vadd.f32 %v3919_v13, %v6863_v30 }
 0x96a   : > { %v3932_v22 = vadd.f32 %v3916_v34, %v6791_v21  ;;  %v3936_v57 = vadd.f32 %v3920_v56, %v6863_v30  ;;  %v3874_v39 = vpop.f32.mrb[74].mxu0  ;;  %v3886_v48 = vpop.f32.mrb[60].mxu1 }
 0x96b   : > { %4346 = vst [vmem:[%s6781_s25 + $0x380] sm:$0xff] %v3931_v0  ;;  %4350 = vst [vmem:[%s6781_s25 + $0x3a0] sm:$0xff] %v3935_v27  ;;  %v3917_v50 = vmul.f32 %v3874_v39, %v7445_v14  ;;  %v3921_v8 = vmul.f32 %v3886_v48, %v7447_v53  ;;  %v3876_v3 = vpop.f32.mrb[75].mxu0  ;;  %v3888_v18 = vpop.f32.mrb[61].mxu1 }
 0x96c   : > { %4347 = vst [vmem:[%s6781_s25 + $0x388] sm:$0xff] %v3932_v22  ;;  %4351 = vst [vmem:[%s6781_s25 + $0x3a8] sm:$0xff] %v3936_v57  ;;  %v3918_v21 = vmul.f32 %v3876_v3, %v7445_v14  ;;  %v3922_v30 = vmul.f32 %v3888_v18, %v7447_v53 }
 0x96d   : > { %v3933_v20 = vadd.f32 %v3917_v50, %v6742_v55  ;;  %v3937_v9 = vadd.f32 %v3921_v8, %v6825_v52 }
 0x96e   : > { %v3934_v11 = vadd.f32 %v3918_v21, %v6742_v55  ;;  %v3938_v60 = vadd.f32 %v3922_v30, %v6825_v52  ;;  %v3892_v6 = vpop.f32.mrb[62].mxu1 }
 0x96f   : > { %4348 = vst [vmem:[%s6781_s25 + $0x390] sm:$0xff] %v3933_v20  ;;  %4352 = vst [vmem:[%s6781_s25 + $0x3b0] sm:$0xff] %v3937_v9  ;;  %v3923_v24 = vmul.f32 %v3892_v6, %v7448_v61  ;;  %v3894_v16 = vpop.f32.mrb[63].mxu1 }
 0x970   : > { %4349 = vst [vmem:[%s6781_s25 + $0x398] sm:$0xff] %v3934_v11  ;;  %4353 = vst [vmem:[%s6781_s25 + $0x3b8] sm:$0xff] %v3938_v60  ;;  %v3924_v14 = vmul.f32 %v3894_v16, %v7448_v61 }
 0x971   : > { %v3939_v53 = vadd.f32 %v3923_v24, %v6939_v15 }
 0x972   : > { %v3940_v62 = vadd.f32 %v3924_v14, %v6939_v15  ;;  %v3898_v55 = vpop.f32.mrb[64].mxu1 }
 0x973   : > { %4354 = vst [vmem:[%s6781_s25 + $0x3c0] sm:$0xff] %v3939_v53  ;;  %v3925_v52 = vmul.f32 %v3898_v55, %v7449_v44  ;;  %v3900_v38 = vpop.f32.mrb[65].mxu1 }
 0x974   : > { %4355 = vst [vmem:[%s6781_s25 + $0x3c8] sm:$0xff] %v3940_v62  ;;  %v3926_v35 = vmul.f32 %v3900_v38, %v7449_v44 }
 0x975   : > { %v3941_v7 = vadd.f32 %v3925_v52, %v6901_v36 }
 0x976   : > { %v3942_v10 = vadd.f32 %v3926_v35, %v6901_v36  ;;  %v3904_v46 = vpop.f32.mrb[66].mxu1 }
 0x977   : > { %4356 = vst [vmem:[%s6781_s25 + $0x3d0] sm:$0xff] %v3941_v7  ;;  %v3927_v15 = vmul.f32 %v3904_v46, %v7432_v19  ;;  %v3906_v61 = vpop.f32.mrb[67].mxu1 }
 0x978   : > { %4357 = vst [vmem:[%s6781_s25 + $0x3d8] sm:$0xff] %v3942_v10  ;;  %v3928_v28 = vmul.f32 %v3906_v61, %v7432_v19 }
 0x979   : > { %v3943_v37 = vadd.f32 %v3927_v15, %v7063_v5 }
 0x97a   : > { %v3944_v12 = vadd.f32 %v3928_v28, %v7063_v5 }
 0x97b   : > { %v3910_v45 = vpop.f32.mrb[68].mxu1  ;;  %4358 = vst [vmem:[%s6781_s25 + $0x3e0] sm:$0xff] %v3943_v37 }
 0x97c   : > { %v3929_v44 = vmul.f32 %v3910_v45, %v7419_v29  ;;  %v3912_v63 = vpop.f32.mrb[69].mxu1  ;;  %4359 = vst [vmem:[%s6781_s25 + $0x3e8] sm:$0xff] %v3944_v12 }
 0x97d   : > { %v3930_v36 = vmul.f32 %v3912_v63, %v7419_v29 }
 0x97e   : > { %v3945_v2 = vadd.f32 %v3929_v44, %v7013_v51 }
 0x97f   : > { %v3946_v25 = vadd.f32 %v3930_v36, %v7013_v51 }
 0x980   : > { %4360 = vst [vmem:[%s6781_s25 + $0x3f0] sm:$0xff] %v3945_v2 }
 0x981   : > { %4361 = vst [vmem:[%s6781_s25 + $0x3f8] sm:$0xff] %v3946_v25 }
 0x982 PF: > { %s18_s27 = sadd.s32 1, %s4571_s27  }
 0x983   : > { %p15_p4 = scmp.ge.s32.totalorder %s18_s27, 6  }
 0x985   :  { %17 = sbr.rel (!%p15_p4) target bundleno = 1 (0x1), region = 96 }

</bundles_post_ra>
